<compile_context>
chip_gen: v5e
topology: v5e:2x2
jax: 0.10.0
libtpu: 0.0.40
codegen_flags: <defaults>
</compile_context>

<pallas_src>
import functools

import jax
import jax.numpy as jnp
from jax.experimental import pallas as pl
from jax.experimental.pallas import tpu as pltpu


def _round_up(x, m):
    return (x + m - 1) // m * m


# ---------------------------------------------------------------------------
# Single-K-tile batched GEMM kernel (bf16 MXU) with optional fused tanh and
# optional fused BatchNorm partial statistics.
# ---------------------------------------------------------------------------

def _matmul_kernel(a_ref, w_ref, o_ref, *stats_ref, activation):
    # Full-K block => one dot per grid step, no accumulator scratch and no
    # pl.when phases (K grid axis eliminated for these shapes).
    r = jnp.dot(a_ref[...], w_ref[...], preferred_element_type=jnp.float32)
    if stats_ref:
        # BN pass-1 statistics fused into the GEMM epilogue: per-tile partial
        # sum / sum-of-squares over the tm rows, computed from the f32 MXU
        # result while it is register/VMEM resident (VPU/XLU slack under the
        # MXU), instead of a separate pass re-reading the activation from HBM.
        s_ref = stats_ref[0]
        s_ref[0:1, :] = jnp.sum(r, axis=0, keepdims=True)
        s_ref[1:2, :] = jnp.sum(r * r, axis=0, keepdims=True)
    if activation == "tanh":
        r = jnp.tanh(r)
    o_ref[...] = r.astype(o_ref.dtype)


def _pick_tiles(M, K, N, budget_bytes=12 * 1024 * 1024):
    """Pick (tm, tn) and padded (M, K, N) for the single-K-tile GEMM.

    K_pad <= 2048 for every DCGAN layer, so the whole K panel lives in one
    VMEM block.  The ~12 MiB double-buffered budget (tm capped at 512 when
    K_pad >= 1024) keeps depth-2 pipelining legal under the 32 MiB scoped
    VMEM limit on v5e / v6e / v7x (v7x has only 64 MiB physical VMEM).
    """
    K_pad = _round_up(K, 128)
    if K_pad > 4096:
        raise NotImplementedError("single-K-tile GEMM sized for K_pad <= 4096")
    N_pad = _round_up(N, 128)
    tn = N_pad if N_pad <= 512 else 512
    while tn > 128 and 2 * K_pad * tn * 2 > budget_bytes // 3:
        tn //= 2
    N_pad = _round_up(N_pad, tn)

    M16 = _round_up(M, 16)                       # bf16 sublane packing
    w_bytes = 2 * K_pad * tn * 2                 # double-buffered weight panel
    cands = (512, 256, 128, 64, 32, 16) if K_pad >= 1024 \
        else (1024, 512, 256, 128, 64, 32, 16)
    tm = 16
    for cand in cands:
        a_bytes = 2 * cand * K_pad * 2
        o_bytes = 2 * cand * tn * 2
        if w_bytes + a_bytes + o_bytes <= budget_bytes:
            tm = cand
            break
    tm = min(tm, M16)
    M_pad = _round_up(M16, tm)
    return tm, tn, M_pad, K_pad, N_pad


def pallas_matmul(a, w, *, activation=None, with_stats=False,
                  out_dtype=jnp.bfloat16):
    """Batched GEMM: a (G, M, K) @ w (G, K, N) -> (G, M_pad, N_pad).

    If `with_stats`, also returns per-(g, M-tile) BN partial statistics of
    shape (G, M_pad//tm, 2, N_pad): row 0 = column sums, row 1 = column sums
    of squares, both from the f32 MXU result before the bf16 downcast.

    Operands are cast to bf16; M/K/N are zero-padded to tile multiples, so
    padded rows / columns of the result and of the partial statistics are
    exactly zero (tanh(0) == 0 as well) and never perturb downstream BN.
    """
    G, M, K = a.shape
    _, _, N = w.shape
    tm, tn, M_pad, K_pad, N_pad = _pick_tiles(M, K, N)

    a = a.astype(jnp.bfloat16)
    w = w.astype(jnp.bfloat16)
    if (M_pad, K_pad) != (M, K):
        a = jnp.pad(a, ((0, 0), (0, M_pad - M), (0, K_pad - K)))
    if (K_pad, N_pad) != (K, N):
        w = jnp.pad(w, ((0, 0), (0, K_pad - K), (0, N_pad - N)))

    grid = (G, M_pad // tm, N_pad // tn)
    in_specs = [
        pl.BlockSpec((None, tm, K_pad), lambda g, i, j: (g, i, 0)),
        pl.BlockSpec((None, K_pad, tn), lambda g, i, j: (g, 0, j)),
    ]
    out_shape = [jax.ShapeDtypeStruct((G, M_pad, N_pad), out_dtype)]
    out_specs = [pl.BlockSpec((None, tm, tn), lambda g, i, j: (g, i, j))]
    if with_stats:
        out_shape.append(
            jax.ShapeDtypeStruct((G, M_pad // tm, 2, N_pad), jnp.float32))
        out_specs.append(
            pl.BlockSpec((None, None, 2, tn), lambda g, i, j: (g, i, 0, j)))

    kern = functools.partial(_matmul_kernel, activation=activation)
    params = pltpu.CompilerParams(
        dimension_semantics=("parallel", "parallel", "parallel"),
        vmem_limit_bytes=32 * 1024 * 1024)

    if with_stats:
        out, stats = pl.pallas_call(
            kern, out_shape=tuple(out_shape), grid=grid,
            in_specs=in_specs, out_specs=tuple(out_specs),
            compiler_params=params)(a, w)
        return out, stats
    out = pl.pallas_call(
        kern, out_shape=out_shape[0], grid=grid,
        in_specs=in_specs, out_specs=out_specs[0],
        compiler_params=params)(a, w)
    return out, None


# ---------------------------------------------------------------------------
# BatchNorm2d (training-mode batch stats, biased variance, eps=1e-5) helpers.
# Statistics come fused out of the GEMM; only the tiny per-channel reduction
# and the per-channel scale/bias fold happen here.
# ---------------------------------------------------------------------------

def _bn_scale_bias(sum_x, sum_xx, gamma, beta, count, eps=1e-5):
    mean = sum_x / count
    var = jnp.maximum(sum_xx / count - mean * mean, 0.0)
    scale = gamma * jax.lax.rsqrt(var + eps)
    bias = beta - mean * scale
    return scale, bias


def _bn_relu_apply(y, scale, bias):
    """BN affine + ReLU.  Applied in the wrapper so XLA fuses the FMA/ReLU
    into the adjoining parity-interleave / im2col layout copies (no standalone
    activation read+write pass).  Applied to the *pre-spatial-pad* tensor so
    halo zeros stay exactly zero."""
    y = y.astype(jnp.float32) * scale + bias
    return jnp.maximum(y, 0.0).astype(jnp.bfloat16)


# ---------------------------------------------------------------------------
# ConvTranspose2d(k=4, stride=2, pad=1) via sub-pixel (parity) GEMMs
# ---------------------------------------------------------------------------

def _subpixel_cols(xp, ph, pw):
    """im2col for output parity (ph, pw).  xp: (B, H+2, W+2, Cin) zero-padded
    input (real channel count).  Returns (B*H*W, 4*Cin), column order
    (dr, dc, cin)."""
    B, Hp, Wp, Cin = xp.shape
    H, W = Hp - 2, Wp - 2
    patches = []
    for dr in range(2):
        for dc in range(2):
            patches.append(xp[:, ph + dr:ph + dr + H, pw + dc:pw + dc + W, :])
    col = jnp.stack(patches, axis=3)               # (B, H, W, 4, Cin)
    return col.reshape(B * H * W, 4 * Cin)


def _subpixel_wmat(w, ph, pw):
    """Sub-kernel weight matrix for parity (ph, pw).  w: (Cin, Cout, 4, 4)
    PyTorch ConvTranspose2d weights (real, unpadded).  Row order (dr, dc, cin)."""
    Cin, Cout = w.shape[0], w.shape[1]
    # kernel taps for this parity: kh = 3 - ph - 2*dr, kw = 3 - pw - 2*dc
    sub = w[:, :, 3 - ph::-2, 3 - pw::-2]           # (Cin, Cout, 2, 2)
    return jnp.transpose(sub, (2, 3, 0, 1)).reshape(4 * Cin, Cout)


def conv_transpose_s2(x, w, *, activation=None, with_stats=False):
    """ConvTranspose2d(4, stride=2, padding=1, bias=False) as 4 parity GEMMs.

    x: (B, H, W, Cin) NHWC (real channels); w: (Cin, Cout, 4, 4).
    Returns (out4, stats): out4 is (4, M_pad, N_pad) with parity g = 2*ph + pw
    and row index b*H*W + h*W + w; rows >= B*H*W and channels >= Cout are zero.
    """
    xp = jnp.pad(x, ((0, 0), (1, 1), (1, 1), (0, 0)))
    cols = jnp.stack([_subpixel_cols(xp, ph, pw)
                      for ph in (0, 1) for pw in (0, 1)], axis=0)
    wmats = jnp.stack([_subpixel_wmat(w, ph, pw)
                       for ph in (0, 1) for pw in (0, 1)], axis=0)
    return pallas_matmul(cols, wmats, activation=activation,
                         with_stats=with_stats)


def _interleave_parities(y4, B, H, W):
    """(4, B*H*W, C), parity-major -> (B, 2H, 2W, C) NHWC."""
    C = y4.shape[-1]
    y = y4.reshape(2, 2, B, H, W, C)
    y = jnp.transpose(y, (2, 3, 0, 4, 1, 5))        # (B, H, ph, W, pw, C)
    return y.reshape(B, 2 * H, 2 * W, C)


# ---------------------------------------------------------------------------
# Generator forward
# ---------------------------------------------------------------------------

def generator_forward(x_nchw, params):
    """DCGAN Generator forward: (B, nz, 1, 1) NCHW -> (B, nc, 64, 64) NCHW."""
    B, nz = x_nchw.shape[0], x_nchw.shape[1]
    couts = [params[f"w{i}"].shape[1] for i in range(5)]   # ngf*8, ..., nc

    # ---- layer 0: ConvTranspose2d(nz, ngf*8, 4, stride=1, pad=0) on 1x1 ----
    # One GEMM with N = 16*c0, columns ordered (kh, kw, cout).  Per-channel BN
    # statistics are the fused per-column sums reduced over the 16 spatial
    # columns (tiny XLA reduction).
    c0 = couts[0]
    w0 = jnp.transpose(params["w0"], (0, 2, 3, 1)).reshape(nz, 16 * c0)
    h0, st0 = pallas_matmul(x_nchw.reshape(1, B, nz), w0[None], with_stats=True)
    st0 = jnp.sum(st0, axis=(0, 1))[:, :16 * c0].reshape(2, 16, c0).sum(axis=1)
    scale, bias = _bn_scale_bias(st0[0], st0[1], params["gamma0"],
                                 params["beta0"], 16 * B)
    h = _bn_relu_apply(h0[0, :B, :16 * c0].reshape(B, 4, 4, c0), scale, bias)

    # ---- layers 1..4: ConvTranspose2d(4, stride=2, pad=1) ------------------
    for i in range(1, 5):
        last = (i == 4)
        cout = couts[i]
        Bh, Hh, Wh = h.shape[0], h.shape[1], h.shape[2]
        M = Bh * Hh * Wh

        out4, stats = conv_transpose_s2(
            h, params[f"w{i}"],
            activation="tanh" if last else None,
            with_stats=not last)

        if last:
            # bf16 output, sliced to the real channels before interleave/cast.
            h = _interleave_parities(out4[:, :M, :cout], Bh, Hh, Wh)
        else:
            st = jnp.sum(stats, axis=(0, 1))[:, :cout]      # (2, cout)
            scale, bias = _bn_scale_bias(st[0], st[1], params[f"gamma{i}"],
                                         params[f"beta{i}"], 4 * M)
            y = _bn_relu_apply(out4[:, :M, :cout], scale, bias)
            h = _interleave_parities(y, Bh, Hh, Wh)

    return jnp.transpose(h, (0, 3, 1, 2)).astype(jnp.float32)   # NCHW


def init_params(key, nz, ngf, nc):
    chans = [nz, ngf * 8, ngf * 4, ngf * 2, ngf, nc]
    params = {}
    for i in range(5):
        key, kw = jax.random.split(key)
        cin, cout = chans[i], chans[i + 1]
        # DCGAN init N(0, 0.02); ConvTranspose2d weight layout (Cin, Cout, k, k)
        params[f"w{i}"] = 0.02 * jax.random.normal(kw, (cin, cout, 4, 4),
                                                   jnp.float32)
        if i < 4:
            params[f"gamma{i}"] = jnp.ones((cout,), jnp.float32)
            params[f"beta{i}"] = jnp.zeros((cout,), jnp.float32)
    return params


# ---------------------------------------------------------------------------
# Pure-JAX f32 reference of the PyTorch module (for the numerical check)
# ---------------------------------------------------------------------------

def _ref_conv_transpose(x, w, stride, padding):
    k = w.shape[-1]
    kern = jnp.transpose(w, (1, 0, 2, 3))[:, :, ::-1, ::-1]   # (Cout, Cin, k, k)
    pad = k - 1 - padding
    return jax.lax.conv_general_dilated(
        x, kern, window_strides=(1, 1),
        padding=[(pad, pad), (pad, pad)],
        lhs_dilation=(stride, stride),
        dimension_numbers=("NCHW", "OIHW", "NCHW"))


def reference_forward(x, params):
    h = x.astype(jnp.float32)
    cfg = [(1, 0), (2, 1), (2, 1), (2, 1), (2, 1)]
    for i, (s, p) in enumerate(cfg):
        h = _ref_conv_transpose(h, params[f"w{i}"], s, p)
        if i < 4:
            mean = jnp.mean(h, axis=(0, 2, 3), keepdims=True)
            var = jnp.mean((h - mean) ** 2, axis=(0, 2, 3), keepdims=True)
            h = (h - mean) * jax.lax.rsqrt(var + 1e-5)
            h = h * params[f"gamma{i}"].reshape(1, -1, 1, 1) \
                + params[f"beta{i}"].reshape(1, -1, 1, 1)
            h = jnp.maximum(h, 0.0)
        else:
            h = jnp.tanh(h)
    return h


if __name__ == "__main__":
    # Small shapes, same architecture/forward as the module (nz->ngf*8->...->nc)
    nz_t, ngf_t, nc_t, batch = 16, 8, 3, 2
    key = jax.random.PRNGKey(0)
    kp, kx = jax.random.split(key)
    params = init_params(kp, nz_t, ngf_t, nc_t)
    x = jax.random.normal(kx, (batch, nz_t, 1, 1), jnp.float32)

    y = jax.jit(generator_forward)(x, params)
    y = jax.block_until_ready(y)
    assert y.shape == (batch, nc_t, 64, 64), y.shape
    assert bool(jnp.all(jnp.isfinite(y)))

    # Numerical check against the f32 pure-JAX reference of the PyTorch module
    # (kernels run in bf16 with f32 MXU accumulation, hence the loose tolerance).
    y_ref = jax.jit(reference_forward)(x, params)
    err = float(jnp.max(jnp.abs(y - y_ref)))
    assert err < 0.1, f"max abs error vs reference: {err}"

    print("KERNEL_OK")
</pallas_src>

<mosaic_0001>
module attributes {stable_mosaic.version = 11 : i64} {
  func.func @_matmul_kernel(%arg0: i32, %arg1: i32, %arg2: i32, %arg3: memref<1x16x128xbf16, #tpu.memory_space<vmem>>, %arg4: memref<1x128x512xbf16, #tpu.memory_space<vmem>>, %arg5: memref<1x16x512xbf16, #tpu.memory_space<vmem>>, %arg6: memref<1x1x2x512xf32, #tpu.memory_space<vmem>>) attributes {dimension_semantics = [#tpu.dimension_semantics<parallel>, #tpu.dimension_semantics<parallel>, #tpu.dimension_semantics<parallel>], iteration_bounds = array<i64: 1, 1, 2>, scalar_prefetch = 0 : i64, scratch_operands = 0 : i64, tpu.core_type = #tpu.core_type<tc>, window_params = [{transform_indices = @transform_0, window_bounds = array<i64: 1, 16, 128>}, {transform_indices = @transform_1, window_bounds = array<i64: 1, 128, 512>}, {transform_indices = @transform_2, window_bounds = array<i64: 1, 16, 512>}, {transform_indices = @transform_3, window_bounds = array<i64: 1, 1, 2, 512>}]} {
    %c0 = arith.constant 0 : index
    %c0_0 = arith.constant 0 : index
    %c0_1 = arith.constant 0 : index
    %0 = vector.load %arg3[%c0, %c0_0, %c0_1] : memref<1x16x128xbf16, #tpu.memory_space<vmem>>, vector<1x16x128xbf16>
    %1 = vector.shape_cast %0 : vector<1x16x128xbf16> to vector<16x128xbf16>
    %c0_2 = arith.constant 0 : index
    %c0_3 = arith.constant 0 : index
    %c0_4 = arith.constant 0 : index
    %2 = vector.load %arg4[%c0_2, %c0_3, %c0_4] : memref<1x128x512xbf16, #tpu.memory_space<vmem>>, vector<1x128x512xbf16>
    %3 = vector.shape_cast %2 : vector<1x128x512xbf16> to vector<128x512xbf16>
    %cst = arith.constant dense<0.000000e+00> : vector<16x512xf32>
    %4 = tpu.matmul %1, %3, %cst {dimension_numbers = #tpu.dot_dimension_numbers<[1], [0], [0], [1], [0, 0, 1, 1], [], []>} : vector<16x128xbf16>, vector<128x512xbf16>, vector<16x512xf32> -> vector<16x512xf32>
    %cst_5 = arith.constant dense<0.000000e+00> : vector<512xf32>
    %5 = vector.multi_reduction <add>, %4, %cst_5 [0] : vector<16x512xf32> to vector<512xf32>
    %6 = vector.shape_cast %5 : vector<512xf32> to vector<1x512xf32>
    %c0_6 = arith.constant 0 : index
    %c0_7 = arith.constant 0 : index
    %c0_8 = arith.constant 0 : index
    %c0_9 = arith.constant 0 : index
    %7 = vector.load %arg6[%c0_6, %c0_7, %c0_8, %c0_9] : memref<1x1x2x512xf32, #tpu.memory_space<vmem>>, vector<1x1x1x512xf32>
    %8 = vector.shape_cast %7 : vector<1x1x1x512xf32> to vector<1x512xf32>
    %9 = vector.shape_cast %6 : vector<1x512xf32> to vector<1x1x1x512xf32>
    tpu.vector_store %arg6[%c0_6, %c0_7, %c0_8, %c0_9], %9 {strides = array<i32>} : memref<1x1x2x512xf32, #tpu.memory_space<vmem>>, vector<1x1x1x512xf32>,
    %10 = arith.mulf %4, %4 : vector<16x512xf32>
    %cst_10 = arith.constant dense<0.000000e+00> : vector<512xf32>
    %11 = vector.multi_reduction <add>, %10, %cst_10 [0] : vector<16x512xf32> to vector<512xf32>
    %12 = vector.shape_cast %11 : vector<512xf32> to vector<1x512xf32>
    %c0_11 = arith.constant 0 : index
    %c0_12 = arith.constant 0 : index
    %c1 = arith.constant 1 : index
    %c0_13 = arith.constant 0 : index
    %13 = vector.load %arg6[%c0_11, %c0_12, %c1, %c0_13] : memref<1x1x2x512xf32, #tpu.memory_space<vmem>>, vector<1x1x1x512xf32>
    %14 = vector.shape_cast %13 : vector<1x1x1x512xf32> to vector<1x512xf32>
    %15 = vector.shape_cast %12 : vector<1x512xf32> to vector<1x1x1x512xf32>
    tpu.vector_store %arg6[%c0_11, %c0_12, %c1, %c0_13], %15 {strides = array<i32>} : memref<1x1x2x512xf32, #tpu.memory_space<vmem>>, vector<1x1x1x512xf32>,
    %16 = arith.truncf %4 : vector<16x512xf32> to vector<16x512xbf16>
    %c0_14 = arith.constant 0 : index
    %c0_15 = arith.constant 0 : index
    %c0_16 = arith.constant 0 : index
    %17 = vector.load %arg5[%c0_14, %c0_15, %c0_16] : memref<1x16x512xbf16, #tpu.memory_space<vmem>>, vector<1x16x512xbf16>
    %18 = vector.shape_cast %17 : vector<1x16x512xbf16> to vector<16x512xbf16>
    %19 = vector.shape_cast %16 : vector<16x512xbf16> to vector<1x16x512xbf16>
    tpu.vector_store %arg5[%c0_14, %c0_15, %c0_16], %19 {strides = array<i32>} : memref<1x16x512xbf16, #tpu.memory_space<vmem>>, vector<1x16x512xbf16>,
    return
  }
  func.func @transform_0(%arg0: i32, %arg1: i32, %arg2: i32) -> (i32, i32, i32) {
    %c0_i32 = arith.constant 0 : i32
    %c0_i32_0 = arith.constant 0 : i32
    return %arg0, %arg1, %c0_i32 : i32, i32, i32
  }
  func.func @transform_1(%arg0: i32, %arg1: i32, %arg2: i32) -> (i32, i32, i32) {
    %c0_i32 = arith.constant 0 : i32
    %c0_i32_0 = arith.constant 0 : i32
    return %arg0, %c0_i32, %arg2 : i32, i32, i32
  }
  func.func @transform_2(%arg0: i32, %arg1: i32, %arg2: i32) -> (i32, i32, i32) {
    %c0_i32 = arith.constant 0 : i32
    return %arg0, %arg1, %arg2 : i32, i32, i32
  }
  func.func @transform_3(%arg0: i32, %arg1: i32, %arg2: i32) -> (i32, i32, i32, i32) {
    %c0_i32 = arith.constant 0 : i32
    %c0_i32_0 = arith.constant 0 : i32
    return %arg0, %arg1, %c0_i32, %arg2 : i32, i32, i32, i32
  }
}

module attributes {stable_mosaic.version = 11 : i64} {
  func.func @_matmul_kernel(%arg0: i32, %arg1: i32, %arg2: i32, %arg3: memref<1x32x256xbf16, #tpu.memory_space<vmem>>, %arg4: memref<1x256x128xbf16, #tpu.memory_space<vmem>>, %arg5: memref<1x32x128xbf16, #tpu.memory_space<vmem>>, %arg6: memref<1x1x2x128xf32, #tpu.memory_space<vmem>>) attributes {dimension_semantics = [#tpu.dimension_semantics<parallel>, #tpu.dimension_semantics<parallel>, #tpu.dimension_semantics<parallel>], iteration_bounds = array<i64: 4, 1, 1>, scalar_prefetch = 0 : i64, scratch_operands = 0 : i64, tpu.core_type = #tpu.core_type<tc>, window_params = [{transform_indices = @transform_0, window_bounds = array<i64: 1, 32, 256>}, {transform_indices = @transform_1, window_bounds = array<i64: 1, 256, 128>}, {transform_indices = @transform_2, window_bounds = array<i64: 1, 32, 128>}, {transform_indices = @transform_3, window_bounds = array<i64: 1, 1, 2, 128>}]} {
    %c0 = arith.constant 0 : index
    %c0_0 = arith.constant 0 : index
    %c0_1 = arith.constant 0 : index
    %0 = vector.load %arg3[%c0, %c0_0, %c0_1] : memref<1x32x256xbf16, #tpu.memory_space<vmem>>, vector<1x32x256xbf16>
    %1 = vector.shape_cast %0 : vector<1x32x256xbf16> to vector<32x256xbf16>
    %c0_2 = arith.constant 0 : index
    %c0_3 = arith.constant 0 : index
    %c0_4 = arith.constant 0 : index
    %2 = vector.load %arg4[%c0_2, %c0_3, %c0_4] : memref<1x256x128xbf16, #tpu.memory_space<vmem>>, vector<1x256x128xbf16>
    %3 = vector.shape_cast %2 : vector<1x256x128xbf16> to vector<256x128xbf16>
    %cst = arith.constant dense<0.000000e+00> : vector<32x128xf32>
    %4 = tpu.matmul %1, %3, %cst {dimension_numbers = #tpu.dot_dimension_numbers<[1], [0], [0], [1], [0, 0, 1, 1], [], []>} : vector<32x256xbf16>, vector<256x128xbf16>, vector<32x128xf32> -> vector<32x128xf32>
    %cst_5 = arith.constant dense<0.000000e+00> : vector<128xf32>
    %5 = vector.multi_reduction <add>, %4, %cst_5 [0] : vector<32x128xf32> to vector<128xf32>
    %6 = vector.shape_cast %5 : vector<128xf32> to vector<1x128xf32>
    %c0_6 = arith.constant 0 : index
    %c0_7 = arith.constant 0 : index
    %c0_8 = arith.constant 0 : index
    %c0_9 = arith.constant 0 : index
    %7 = vector.load %arg6[%c0_6, %c0_7, %c0_8, %c0_9] : memref<1x1x2x128xf32, #tpu.memory_space<vmem>>, vector<1x1x1x128xf32>
    %8 = vector.shape_cast %7 : vector<1x1x1x128xf32> to vector<1x128xf32>
    %9 = vector.shape_cast %6 : vector<1x128xf32> to vector<1x1x1x128xf32>
    tpu.vector_store %arg6[%c0_6, %c0_7, %c0_8, %c0_9], %9 {strides = array<i32>} : memref<1x1x2x128xf32, #tpu.memory_space<vmem>>, vector<1x1x1x128xf32>,
    %10 = arith.mulf %4, %4 : vector<32x128xf32>
    %cst_10 = arith.constant dense<0.000000e+00> : vector<128xf32>
    %11 = vector.multi_reduction <add>, %10, %cst_10 [0] : vector<32x128xf32> to vector<128xf32>
    %12 = vector.shape_cast %11 : vector<128xf32> to vector<1x128xf32>
    %c0_11 = arith.constant 0 : index
    %c0_12 = arith.constant 0 : index
    %c1 = arith.constant 1 : index
    %c0_13 = arith.constant 0 : index
    %13 = vector.load %arg6[%c0_11, %c0_12, %c1, %c0_13] : memref<1x1x2x128xf32, #tpu.memory_space<vmem>>, vector<1x1x1x128xf32>
    %14 = vector.shape_cast %13 : vector<1x1x1x128xf32> to vector<1x128xf32>
    %15 = vector.shape_cast %12 : vector<1x128xf32> to vector<1x1x1x128xf32>
    tpu.vector_store %arg6[%c0_11, %c0_12, %c1, %c0_13], %15 {strides = array<i32>} : memref<1x1x2x128xf32, #tpu.memory_space<vmem>>, vector<1x1x1x128xf32>,
    %16 = arith.truncf %4 : vector<32x128xf32> to vector<32x128xbf16>
    %c0_14 = arith.constant 0 : index
    %c0_15 = arith.constant 0 : index
    %c0_16 = arith.constant 0 : index
    %17 = vector.load %arg5[%c0_14, %c0_15, %c0_16] : memref<1x32x128xbf16, #tpu.memory_space<vmem>>, vector<1x32x128xbf16>
    %18 = vector.shape_cast %17 : vector<1x32x128xbf16> to vector<32x128xbf16>
    %19 = vector.shape_cast %16 : vector<32x128xbf16> to vector<1x32x128xbf16>
    tpu.vector_store %arg5[%c0_14, %c0_15, %c0_16], %19 {strides = array<i32>} : memref<1x32x128xbf16, #tpu.memory_space<vmem>>, vector<1x32x128xbf16>,
    return
  }
  func.func @transform_0(%arg0: i32, %arg1: i32, %arg2: i32) -> (i32, i32, i32) {
    %c0_i32 = arith.constant 0 : i32
    %c0_i32_0 = arith.constant 0 : i32
    return %arg0, %arg1, %c0_i32 : i32, i32, i32
  }
  func.func @transform_1(%arg0: i32, %arg1: i32, %arg2: i32) -> (i32, i32, i32) {
    %c0_i32 = arith.constant 0 : i32
    %c0_i32_0 = arith.constant 0 : i32
    return %arg0, %c0_i32, %arg2 : i32, i32, i32
  }
  func.func @transform_2(%arg0: i32, %arg1: i32, %arg2: i32) -> (i32, i32, i32) {
    %c0_i32 = arith.constant 0 : i32
    return %arg0, %arg1, %arg2 : i32, i32, i32
  }
  func.func @transform_3(%arg0: i32, %arg1: i32, %arg2: i32) -> (i32, i32, i32, i32) {
    %c0_i32 = arith.constant 0 : i32
    %c0_i32_0 = arith.constant 0 : i32
    return %arg0, %arg1, %c0_i32, %arg2 : i32, i32, i32, i32
  }
}

module attributes {stable_mosaic.version = 11 : i64} {
  func.func @_matmul_kernel(%arg0: i32, %arg1: i32, %arg2: i32, %arg3: memref<1x128x128xbf16, #tpu.memory_space<vmem>>, %arg4: memref<1x128x128xbf16, #tpu.memory_space<vmem>>, %arg5: memref<1x128x128xbf16, #tpu.memory_space<vmem>>, %arg6: memref<1x1x2x128xf32, #tpu.memory_space<vmem>>) attributes {dimension_semantics = [#tpu.dimension_semantics<parallel>, #tpu.dimension_semantics<parallel>, #tpu.dimension_semantics<parallel>], iteration_bounds = array<i64: 4, 1, 1>, scalar_prefetch = 0 : i64, scratch_operands = 0 : i64, tpu.core_type = #tpu.core_type<tc>, window_params = [{transform_indices = @transform_0, window_bounds = array<i64: 1, 128, 128>}, {transform_indices = @transform_1, window_bounds = array<i64: 1, 128, 128>}, {transform_indices = @transform_2, window_bounds = array<i64: 1, 128, 128>}, {transform_indices = @transform_3, window_bounds = array<i64: 1, 1, 2, 128>}]} {
    %c0 = arith.constant 0 : index
    %c0_0 = arith.constant 0 : index
    %c0_1 = arith.constant 0 : index
    %0 = vector.load %arg3[%c0, %c0_0, %c0_1] : memref<1x128x128xbf16, #tpu.memory_space<vmem>>, vector<1x128x128xbf16>
    %1 = vector.shape_cast %0 : vector<1x128x128xbf16> to vector<128x128xbf16>
    %c0_2 = arith.constant 0 : index
    %c0_3 = arith.constant 0 : index
    %c0_4 = arith.constant 0 : index
    %2 = vector.load %arg4[%c0_2, %c0_3, %c0_4] : memref<1x128x128xbf16, #tpu.memory_space<vmem>>, vector<1x128x128xbf16>
    %3 = vector.shape_cast %2 : vector<1x128x128xbf16> to vector<128x128xbf16>
    %cst = arith.constant dense<0.000000e+00> : vector<128x128xf32>
    %4 = tpu.matmul %1, %3, %cst {dimension_numbers = #tpu.dot_dimension_numbers<[1], [0], [0], [1], [0, 0, 1, 1], [], []>} : vector<128x128xbf16>, vector<128x128xbf16>, vector<128x128xf32> -> vector<128x128xf32>
    %cst_5 = arith.constant dense<0.000000e+00> : vector<128xf32>
    %5 = vector.multi_reduction <add>, %4, %cst_5 [0] : vector<128x128xf32> to vector<128xf32>
    %6 = vector.shape_cast %5 : vector<128xf32> to vector<1x128xf32>
    %c0_6 = arith.constant 0 : index
    %c0_7 = arith.constant 0 : index
    %c0_8 = arith.constant 0 : index
    %c0_9 = arith.constant 0 : index
    %7 = vector.load %arg6[%c0_6, %c0_7, %c0_8, %c0_9] : memref<1x1x2x128xf32, #tpu.memory_space<vmem>>, vector<1x1x1x128xf32>
    %8 = vector.shape_cast %7 : vector<1x1x1x128xf32> to vector<1x128xf32>
    %9 = vector.shape_cast %6 : vector<1x128xf32> to vector<1x1x1x128xf32>
    tpu.vector_store %arg6[%c0_6, %c0_7, %c0_8, %c0_9], %9 {strides = array<i32>} : memref<1x1x2x128xf32, #tpu.memory_space<vmem>>, vector<1x1x1x128xf32>,
    %10 = arith.mulf %4, %4 : vector<128x128xf32>
    %cst_10 = arith.constant dense<0.000000e+00> : vector<128xf32>
    %11 = vector.multi_reduction <add>, %10, %cst_10 [0] : vector<128x128xf32> to vector<128xf32>
    %12 = vector.shape_cast %11 : vector<128xf32> to vector<1x128xf32>
    %c0_11 = arith.constant 0 : index
    %c0_12 = arith.constant 0 : index
    %c1 = arith.constant 1 : index
    %c0_13 = arith.constant 0 : index
    %13 = vector.load %arg6[%c0_11, %c0_12, %c1, %c0_13] : memref<1x1x2x128xf32, #tpu.memory_space<vmem>>, vector<1x1x1x128xf32>
    %14 = vector.shape_cast %13 : vector<1x1x1x128xf32> to vector<1x128xf32>
    %15 = vector.shape_cast %12 : vector<1x128xf32> to vector<1x1x1x128xf32>
    tpu.vector_store %arg6[%c0_11, %c0_12, %c1, %c0_13], %15 {strides = array<i32>} : memref<1x1x2x128xf32, #tpu.memory_space<vmem>>, vector<1x1x1x128xf32>,
    %16 = arith.truncf %4 : vector<128x128xf32> to vector<128x128xbf16>
    %c0_14 = arith.constant 0 : index
    %c0_15 = arith.constant 0 : index
    %c0_16 = arith.constant 0 : index
    %17 = vector.load %arg5[%c0_14, %c0_15, %c0_16] : memref<1x128x128xbf16, #tpu.memory_space<vmem>>, vector<1x128x128xbf16>
    %18 = vector.shape_cast %17 : vector<1x128x128xbf16> to vector<128x128xbf16>
    %19 = vector.shape_cast %16 : vector<128x128xbf16> to vector<1x128x128xbf16>
    tpu.vector_store %arg5[%c0_14, %c0_15, %c0_16], %19 {strides = array<i32>} : memref<1x128x128xbf16, #tpu.memory_space<vmem>>, vector<1x128x128xbf16>,
    return
  }
  func.func @transform_0(%arg0: i32, %arg1: i32, %arg2: i32) -> (i32, i32, i32) {
    %c0_i32 = arith.constant 0 : i32
    %c0_i32_0 = arith.constant 0 : i32
    return %arg0, %arg1, %c0_i32 : i32, i32, i32
  }
  func.func @transform_1(%arg0: i32, %arg1: i32, %arg2: i32) -> (i32, i32, i32) {
    %c0_i32 = arith.constant 0 : i32
    %c0_i32_0 = arith.constant 0 : i32
    return %arg0, %c0_i32, %arg2 : i32, i32, i32
  }
  func.func @transform_2(%arg0: i32, %arg1: i32, %arg2: i32) -> (i32, i32, i32) {
    %c0_i32 = arith.constant 0 : i32
    return %arg0, %arg1, %arg2 : i32, i32, i32
  }
  func.func @transform_3(%arg0: i32, %arg1: i32, %arg2: i32) -> (i32, i32, i32, i32) {
    %c0_i32 = arith.constant 0 : i32
    %c0_i32_0 = arith.constant 0 : i32
    return %arg0, %arg1, %c0_i32, %arg2 : i32, i32, i32, i32
  }
}

module attributes {stable_mosaic.version = 11 : i64} {
  func.func @_matmul_kernel(%arg0: i32, %arg1: i32, %arg2: i32, %arg3: memref<1x512x128xbf16, #tpu.memory_space<vmem>>, %arg4: memref<1x128x128xbf16, #tpu.memory_space<vmem>>, %arg5: memref<1x512x128xbf16, #tpu.memory_space<vmem>>, %arg6: memref<1x1x2x128xf32, #tpu.memory_space<vmem>>) attributes {dimension_semantics = [#tpu.dimension_semantics<parallel>, #tpu.dimension_semantics<parallel>, #tpu.dimension_semantics<parallel>], iteration_bounds = array<i64: 4, 1, 1>, scalar_prefetch = 0 : i64, scratch_operands = 0 : i64, tpu.core_type = #tpu.core_type<tc>, window_params = [{transform_indices = @transform_0, window_bounds = array<i64: 1, 512, 128>}, {transform_indices = @transform_1, window_bounds = array<i64: 1, 128, 128>}, {transform_indices = @transform_2, window_bounds = array<i64: 1, 512, 128>}, {transform_indices = @transform_3, window_bounds = array<i64: 1, 1, 2, 128>}]} {
    %c0 = arith.constant 0 : index
    %c0_0 = arith.constant 0 : index
    %c0_1 = arith.constant 0 : index
    %0 = vector.load %arg3[%c0, %c0_0, %c0_1] : memref<1x512x128xbf16, #tpu.memory_space<vmem>>, vector<1x512x128xbf16>
    %1 = vector.shape_cast %0 : vector<1x512x128xbf16> to vector<512x128xbf16>
    %c0_2 = arith.constant 0 : index
    %c0_3 = arith.constant 0 : index
    %c0_4 = arith.constant 0 : index
    %2 = vector.load %arg4[%c0_2, %c0_3, %c0_4] : memref<1x128x128xbf16, #tpu.memory_space<vmem>>, vector<1x128x128xbf16>
    %3 = vector.shape_cast %2 : vector<1x128x128xbf16> to vector<128x128xbf16>
    %cst = arith.constant dense<0.000000e+00> : vector<512x128xf32>
    %4 = tpu.matmul %1, %3, %cst {dimension_numbers = #tpu.dot_dimension_numbers<[1], [0], [0], [1], [0, 0, 1, 1], [], []>} : vector<512x128xbf16>, vector<128x128xbf16>, vector<512x128xf32> -> vector<512x128xf32>
    %cst_5 = arith.constant dense<0.000000e+00> : vector<128xf32>
    %5 = vector.multi_reduction <add>, %4, %cst_5 [0] : vector<512x128xf32> to vector<128xf32>
    %6 = vector.shape_cast %5 : vector<128xf32> to vector<1x128xf32>
    %c0_6 = arith.constant 0 : index
    %c0_7 = arith.constant 0 : index
    %c0_8 = arith.constant 0 : index
    %c0_9 = arith.constant 0 : index
    %7 = vector.load %arg6[%c0_6, %c0_7, %c0_8, %c0_9] : memref<1x1x2x128xf32, #tpu.memory_space<vmem>>, vector<1x1x1x128xf32>
    %8 = vector.shape_cast %7 : vector<1x1x1x128xf32> to vector<1x128xf32>
    %9 = vector.shape_cast %6 : vector<1x128xf32> to vector<1x1x1x128xf32>
    tpu.vector_store %arg6[%c0_6, %c0_7, %c0_8, %c0_9], %9 {strides = array<i32>} : memref<1x1x2x128xf32, #tpu.memory_space<vmem>>, vector<1x1x1x128xf32>,
    %10 = arith.mulf %4, %4 : vector<512x128xf32>
    %cst_10 = arith.constant dense<0.000000e+00> : vector<128xf32>
    %11 = vector.multi_reduction <add>, %10, %cst_10 [0] : vector<512x128xf32> to vector<128xf32>
    %12 = vector.shape_cast %11 : vector<128xf32> to vector<1x128xf32>
    %c0_11 = arith.constant 0 : index
    %c0_12 = arith.constant 0 : index
    %c1 = arith.constant 1 : index
    %c0_13 = arith.constant 0 : index
    %13 = vector.load %arg6[%c0_11, %c0_12, %c1, %c0_13] : memref<1x1x2x128xf32, #tpu.memory_space<vmem>>, vector<1x1x1x128xf32>
    %14 = vector.shape_cast %13 : vector<1x1x1x128xf32> to vector<1x128xf32>
    %15 = vector.shape_cast %12 : vector<1x128xf32> to vector<1x1x1x128xf32>
    tpu.vector_store %arg6[%c0_11, %c0_12, %c1, %c0_13], %15 {strides = array<i32>} : memref<1x1x2x128xf32, #tpu.memory_space<vmem>>, vector<1x1x1x128xf32>,
    %16 = arith.truncf %4 : vector<512x128xf32> to vector<512x128xbf16>
    %c0_14 = arith.constant 0 : index
    %c0_15 = arith.constant 0 : index
    %c0_16 = arith.constant 0 : index
    %17 = vector.load %arg5[%c0_14, %c0_15, %c0_16] : memref<1x512x128xbf16, #tpu.memory_space<vmem>>, vector<1x512x128xbf16>
    %18 = vector.shape_cast %17 : vector<1x512x128xbf16> to vector<512x128xbf16>
    %19 = vector.shape_cast %16 : vector<512x128xbf16> to vector<1x512x128xbf16>
    tpu.vector_store %arg5[%c0_14, %c0_15, %c0_16], %19 {strides = array<i32>} : memref<1x512x128xbf16, #tpu.memory_space<vmem>>, vector<1x512x128xbf16>,
    return
  }
  func.func @transform_0(%arg0: i32, %arg1: i32, %arg2: i32) -> (i32, i32, i32) {
    %c0_i32 = arith.constant 0 : i32
    %c0_i32_0 = arith.constant 0 : i32
    return %arg0, %arg1, %c0_i32 : i32, i32, i32
  }
  func.func @transform_1(%arg0: i32, %arg1: i32, %arg2: i32) -> (i32, i32, i32) {
    %c0_i32 = arith.constant 0 : i32
    %c0_i32_0 = arith.constant 0 : i32
    return %arg0, %c0_i32, %arg2 : i32, i32, i32
  }
  func.func @transform_2(%arg0: i32, %arg1: i32, %arg2: i32) -> (i32, i32, i32) {
    %c0_i32 = arith.constant 0 : i32
    return %arg0, %arg1, %arg2 : i32, i32, i32
  }
  func.func @transform_3(%arg0: i32, %arg1: i32, %arg2: i32) -> (i32, i32, i32, i32) {
    %c0_i32 = arith.constant 0 : i32
    %c0_i32_0 = arith.constant 0 : i32
    return %arg0, %arg1, %c0_i32, %arg2 : i32, i32, i32, i32
  }
}

module attributes {stable_mosaic.version = 11 : i64} {
  func.func @_matmul_kernel(%arg0: i32, %arg1: i32, %arg2: i32, %arg3: memref<1x1024x128xbf16, #tpu.memory_space<vmem>>, %arg4: memref<1x128x128xbf16, #tpu.memory_space<vmem>>, %arg5: memref<1x1024x128xbf16, #tpu.memory_space<vmem>>) attributes {dimension_semantics = [#tpu.dimension_semantics<parallel>, #tpu.dimension_semantics<parallel>, #tpu.dimension_semantics<parallel>], iteration_bounds = array<i64: 4, 2, 1>, scalar_prefetch = 0 : i64, scratch_operands = 0 : i64, tpu.core_type = #tpu.core_type<tc>, window_params = [{transform_indices = @transform_0, window_bounds = array<i64: 1, 1024, 128>}, {transform_indices = @transform_1, window_bounds = array<i64: 1, 128, 128>}, {transform_indices = @transform_2, window_bounds = array<i64: 1, 1024, 128>}]} {
    %c0 = arith.constant 0 : index
    %c0_0 = arith.constant 0 : index
    %c0_1 = arith.constant 0 : index
    %0 = vector.load %arg3[%c0, %c0_0, %c0_1] : memref<1x1024x128xbf16, #tpu.memory_space<vmem>>, vector<1x1024x128xbf16>
    %1 = vector.shape_cast %0 : vector<1x1024x128xbf16> to vector<1024x128xbf16>
    %c0_2 = arith.constant 0 : index
    %c0_3 = arith.constant 0 : index
    %c0_4 = arith.constant 0 : index
    %2 = vector.load %arg4[%c0_2, %c0_3, %c0_4] : memref<1x128x128xbf16, #tpu.memory_space<vmem>>, vector<1x128x128xbf16>
    %3 = vector.shape_cast %2 : vector<1x128x128xbf16> to vector<128x128xbf16>
    %cst = arith.constant dense<0.000000e+00> : vector<1024x128xf32>
    %4 = tpu.matmul %1, %3, %cst {dimension_numbers = #tpu.dot_dimension_numbers<[1], [0], [0], [1], [0, 0, 1, 1], [], []>} : vector<1024x128xbf16>, vector<128x128xbf16>, vector<1024x128xf32> -> vector<1024x128xf32>
    %5 = math.tanh %4 : vector<1024x128xf32>
    %6 = arith.truncf %5 : vector<1024x128xf32> to vector<1024x128xbf16>
    %c0_5 = arith.constant 0 : index
    %c0_6 = arith.constant 0 : index
    %c0_7 = arith.constant 0 : index
    %7 = vector.load %arg5[%c0_5, %c0_6, %c0_7] : memref<1x1024x128xbf16, #tpu.memory_space<vmem>>, vector<1x1024x128xbf16>
    %8 = vector.shape_cast %7 : vector<1x1024x128xbf16> to vector<1024x128xbf16>
    %9 = vector.shape_cast %6 : vector<1024x128xbf16> to vector<1x1024x128xbf16>
    tpu.vector_store %arg5[%c0_5, %c0_6, %c0_7], %9 {strides = array<i32>} : memref<1x1024x128xbf16, #tpu.memory_space<vmem>>, vector<1x1024x128xbf16>,
    return
  }
  func.func @transform_0(%arg0: i32, %arg1: i32, %arg2: i32) -> (i32, i32, i32) {
    %c0_i32 = arith.constant 0 : i32
    %c0_i32_0 = arith.constant 0 : i32
    return %arg0, %arg1, %c0_i32 : i32, i32, i32
  }
  func.func @transform_1(%arg0: i32, %arg1: i32, %arg2: i32) -> (i32, i32, i32) {
    %c0_i32 = arith.constant 0 : i32
    %c0_i32_0 = arith.constant 0 : i32
    return %arg0, %c0_i32, %arg2 : i32, i32, i32
  }
  func.func @transform_2(%arg0: i32, %arg1: i32, %arg2: i32) -> (i32, i32, i32) {
    %c0_i32 = arith.constant 0 : i32
    return %arg0, %arg1, %arg2 : i32, i32, i32
  }
}

</mosaic_0001>

<bundles_post_ra>
// kernel: generator_forward.5
= control target key start
LH: loop header
LB: loop body
LE: loop exit
PB: predicated region body
PF: predicated region fallthrough
CT: control target
= control target key end

     0   :  { %s1194_s12 = smov 0   ;;  %s1196_s13 = smov 0   ;;  %s1436_s0 = inlined_call_operand.vmem [shape: bf16[1,16,128], index: 0, kind: input, shape index: {}]   ;;  %s1437_s1 = inlined_call_operand.vmem [shape: bf16[1,128,1024], index: 1, kind: input, shape index: {}]   ;;  %s1438_s2 = inlined_call_operand.vmem [shape: bf16[1,16,1024], index: 2, kind: output, shape index: {0}]   ;;  %s1439_s3 = inlined_call_operand.vmem [shape: f32[1,1,2,1024], index: 3, kind: output, shape index: {1}]  }
   0x1   :  { %s1198_s14 = smov 0   ;;  %s1200_s15 = smov 0  }
   0x2   :  { %s1202_s16 = smov 0  }
   0x3 LB: > { %s26_s17 = sadd.s32 1, %s1168_s15  ;;  %s908_s18 = sadd.s32 4294967295, %s1172_s16   ;;  %s1172_s16 = sphi %s1202_s16, %s14_s16   ;;  %s1168_s15 = sphi %s1200_s15, %s1445_s15   ;;  %s1164_s14 = sphi %s1198_s14, %s1444_s14   ;;  %s1160_s13 = sphi %s1196_s13, %s1443_s13   ;;  %s1156_s12 = sphi %s1194_s12, %s1442_s12  }
   0x4   : > { %p27_p0 = scmp.ge.s32.totalorder %s26_s17, 2  ;;  %p77_p1 = scmp.ne.s32.totalorder %s1160_s13, %s1156_s12 }
   0x5   : > { %p78_p2 = scmp.eq.s32.totalorder %s1172_s16, 0  ;;  %p111_p4 = scmp.eq.s32.totalorder %s908_s18, 1 }
   0x6   : > { %s1447_s17 = smov (%p27_p0, %s26_s17), 0  ;;  %s70_s20 = sadd.s32 1, %s1160_s13 }
   0x7   : > { %p79_p3 = por %p78_p2, %p77_p1  ;;  %s66_s19 = ssub.s32 %s1168_s15, %s1447_s17 }
   0x8   : > { %p68_p5 = scmp.eq.s32.totalorder %s66_s19, 0  ;;  %p1229_p6 = por %p111_p4, %p77_p1 }
   0x9   : > { %p912_p7 = scmp.ge.s32.totalorder %s1172_s16, 2 }
   0xa   : > { %s1234_s22 = scalar_select %p68_p5, %s1160_s13, %s70_s20  }
   0xb   : > { %176 = sbr.rel (%p912_p7) target bundleno = 52 (0x34), region = 20 }
  0x10   : > { %179 = sbr.rel (!%p79_p3) target bundleno = 52 (0x34), region = 24  ;;  %s181_s23 = sand.u32 (%p79_p3), 1, %s1160_s13  }
  0x11   : > { %s1059_s24 = sshll.u32 (%p79_p3), %s1168_s15, 4  ;;  %s913_s25 = sshll.u32 (%p79_p3), %s181_s23, 8 }
  0x12   : > { %s1242_s28 = scalar_lea.vmem (%p79_p3), %s1437_s1, %s1059_s24  ;;  %s1247_s29 = scalar_lea.vmem (%p79_p3), [#allocation2], %s913_s25 }
  0x13   : > { %v201_v0 = vld [vmem:[%s1242_s28] sm:$0xff] (%p79_p3)  ;;  %v203_v1 = vld [vmem:[%s1242_s28 + $0x8] sm:$0xff] (%p79_p3) }
  0x14   : > { %v205_v2 = vld [vmem:[%s1242_s28 + $0x20] sm:$0xff] (%p79_p3)  ;;  %202 = vst [vmem:[%s1247_s29] sm:$0xff] (%p79_p3), %v201_v0  ;;  %v207_v3 = vld [vmem:[%s1242_s28 + $0x28] sm:$0xff] (%p79_p3) }
  0x15   : > { %204 = vst [vmem:[%s1247_s29 + $0x8] sm:$0xff] %v203_v1  ;;  %v209_v4 = vld [vmem:[%s1242_s28 + $0x40] sm:$0xff]  ;;  %v211_v5 = vld [vmem:[%s1242_s28 + $0x48] sm:$0xff] }
  0x16   : > { %206 = vst [vmem:[%s1247_s29 + $0x10] sm:$0xff] %v205_v2  ;;  %v213_v6 = vld [vmem:[%s1242_s28 + $0x60] sm:$0xff]  ;;  %v215_v7 = vld [vmem:[%s1242_s28 + $0x68] sm:$0xff] }
  0x17   : > { %208 = vst [vmem:[%s1247_s29 + $0x18] sm:$0xff] %v207_v3  ;;  %v217_v8 = vld [vmem:[%s1242_s28 + $0x80] sm:$0xff]  ;;  %v219_v9 = vld [vmem:[%s1242_s28 + $0x88] sm:$0xff] }
  0x18   : > { %210 = vst [vmem:[%s1247_s29 + $0x20] sm:$0xff] %v209_v4  ;;  %v221_v10 = vld [vmem:[%s1242_s28 + $0xa0] sm:$0xff]  ;;  %v223_v11 = vld [vmem:[%s1242_s28 + $0xa8] sm:$0xff] }
  0x19   : > { %212 = vst [vmem:[%s1247_s29 + $0x28] sm:$0xff] %v211_v5  ;;  %v225_v12 = vld [vmem:[%s1242_s28 + $0xc0] sm:$0xff]  ;;  %v227_v13 = vld [vmem:[%s1242_s28 + $0xc8] sm:$0xff] }
  0x1a   : > { %214 = vst [vmem:[%s1247_s29 + $0x30] sm:$0xff] %v213_v6  ;;  %v229_v14 = vld [vmem:[%s1242_s28 + $0xe0] sm:$0xff]  ;;  %v231_v15 = vld [vmem:[%s1242_s28 + $0xe8] sm:$0xff] }
  0x1b   : > { %216 = vst [vmem:[%s1247_s29 + $0x38] sm:$0xff] %v215_v7  ;;  %v233_v16 = vld [vmem:[%s1242_s28 + $0x100] sm:$0xff]  ;;  %v235_v17 = vld [vmem:[%s1242_s28 + $0x108] sm:$0xff] }
  0x1c   : > { %218 = vst [vmem:[%s1247_s29 + $0x40] sm:$0xff] %v217_v8  ;;  %v237_v18 = vld [vmem:[%s1242_s28 + $0x120] sm:$0xff]  ;;  %v239_v19 = vld [vmem:[%s1242_s28 + $0x128] sm:$0xff] }
  0x1d   : > { %220 = vst [vmem:[%s1247_s29 + $0x48] sm:$0xff] %v219_v9  ;;  %v241_v20 = vld [vmem:[%s1242_s28 + $0x140] sm:$0xff]  ;;  %v243_v21 = vld [vmem:[%s1242_s28 + $0x148] sm:$0xff] }
  0x1e   : > { %222 = vst [vmem:[%s1247_s29 + $0x50] sm:$0xff] %v221_v10  ;;  %v245_v22 = vld [vmem:[%s1242_s28 + $0x160] sm:$0xff]  ;;  %v247_v23 = vld [vmem:[%s1242_s28 + $0x168] sm:$0xff] }
  0x1f   : > { %224 = vst [vmem:[%s1247_s29 + $0x58] sm:$0xff] %v223_v11  ;;  %v249_v24 = vld [vmem:[%s1242_s28 + $0x180] sm:$0xff]  ;;  %v251_v25 = vld [vmem:[%s1242_s28 + $0x188] sm:$0xff] }
  0x20   : > { %226 = vst [vmem:[%s1247_s29 + $0x60] sm:$0xff] %v225_v12  ;;  %v253_v26 = vld [vmem:[%s1242_s28 + $0x1a0] sm:$0xff]  ;;  %v255_v27 = vld [vmem:[%s1242_s28 + $0x1a8] sm:$0xff] }
  0x21   : > { %228 = vst [vmem:[%s1247_s29 + $0x68] sm:$0xff] %v227_v13  ;;  %v257_v28 = vld [vmem:[%s1242_s28 + $0x1c0] sm:$0xff]  ;;  %v259_v29 = vld [vmem:[%s1242_s28 + $0x1c8] sm:$0xff] }
  0x22   : > { %230 = vst [vmem:[%s1247_s29 + $0x70] sm:$0xff] %v229_v14  ;;  %v261_v30 = vld [vmem:[%s1242_s28 + $0x1e0] sm:$0xff]  ;;  %v263_v31 = vld [vmem:[%s1242_s28 + $0x1e8] sm:$0xff] }
  0x23   : > { %232 = vst [vmem:[%s1247_s29 + $0x78] sm:$0xff] %v231_v15 }
  0x24   : > { %234 = vst [vmem:[%s1247_s29 + $0x80] sm:$0xff] %v233_v16 }
  0x25   : > { %236 = vst [vmem:[%s1247_s29 + $0x88] sm:$0xff] %v235_v17 }
  0x26   : > { %238 = vst [vmem:[%s1247_s29 + $0x90] sm:$0xff] %v237_v18 }
  0x27   : > { %240 = vst [vmem:[%s1247_s29 + $0x98] sm:$0xff] %v239_v19 }
  0x28   : > { %242 = vst [vmem:[%s1247_s29 + $0xa0] sm:$0xff] %v241_v20 }
  0x29   : > { %244 = vst [vmem:[%s1247_s29 + $0xa8] sm:$0xff] %v243_v21 }
  0x2a   : > { %246 = vst [vmem:[%s1247_s29 + $0xb0] sm:$0xff] %v245_v22 }
  0x2b   : > { %248 = vst [vmem:[%s1247_s29 + $0xb8] sm:$0xff] %v247_v23 }
  0x2c   : > { %250 = vst [vmem:[%s1247_s29 + $0xc0] sm:$0xff] %v249_v24 }
  0x2d   : > { %252 = vst [vmem:[%s1247_s29 + $0xc8] sm:$0xff] %v251_v25 }
  0x2e   : > { %254 = vst [vmem:[%s1247_s29 + $0xd0] sm:$0xff] %v253_v26 }
  0x2f   : > { %256 = vst [vmem:[%s1247_s29 + $0xd8] sm:$0xff] %v255_v27 }
  0x30   : > { %258 = vst [vmem:[%s1247_s29 + $0xe0] sm:$0xff] %v257_v28 }
  0x31   : > { %260 = vst [vmem:[%s1247_s29 + $0xe8] sm:$0xff] %v259_v29 }
  0x32   : > { %262 = vst [vmem:[%s1247_s29 + $0xf0] sm:$0xff] %v261_v30 }
  0x33   : > { %264 = vst [vmem:[%s1247_s29 + $0xf8] sm:$0xff] %v263_v31 }
  0x34 PF: > { %p916_p8 = scmp.ge.s32.totalorder %s1172_s16, 1  ;;  %p269_p9 = scmp.lt.s32.totalorder %s1172_s16, 3 }
  0x36   : > { %p270_p10 = pnand %p916_p8, %p269_p9 }
  0x37   : > { %s276_s30 = sand.u32 (!%p270_p10), 1, %s1156_s12   ;;  %s919_s10 = sshll.u32 (!%p270_p10), %s1164_s14, 2 }
  0x38   : > { %273 = sbr.rel (%p270_p10) target bundleno = 258 (0x102), region = 47  ;;  %s917_s4 = sshll.u32 (!%p270_p10), %s276_s30, 8 }
  0x39   : > { %s1315_s5 = scalar_lea.vmem (!%p270_p10), [#allocation2], %s917_s4  ;;  %s918_s8 = sshll.u32 (!%p270_p10), %s276_s30, 5 }
  0x3a   : > { %s1386_s9 = scalar_lea.vmem (!%p270_p10), [#allocation3], %s918_s8  ;;  %p1392_p11 = scmp.lt.s32.totalorder (!%p270_p10), %s919_s10, 7 }
  0x3d   : > { %v1039_v32 = vld [vmem:[%s1315_s5 + $0xe0] sm:$0xf]  ;;  %v1091_v33 = vld [vmem:[%s1315_s5 + $0xec] sm:$0xf0]  ;;  %v1089_v34 = vld [vmem:[%s1315_s5 + $0xe4] sm:$0xf] }
  0x3e   : > { %v1040_v35 = vor.u32 %v1091_v33, %v1039_v32  ;;  %v1041_v36 = vld [vmem:[%s1315_s5 + $0xf0] sm:$0xf0]  ;;  %v1047_v37 = vld [vmem:[%s1315_s5 + $0xe8] sm:$0xf]  ;;  %v1092_v38 = vld [vmem:[%s1315_s5 + $0xf4] sm:$0xf0] }
  0x3f   : > { %v1044_v39 = vor.u32 %v1089_v34, %v1041_v36  ;;  %v1048_v40 = vor.u32 %v1092_v38, %v1047_v37  ;;  %v1090_v41 = vld [vmem:[%s1315_s5 + $0xec] sm:$0xf]  ;;  %v1049_v42 = vld [vmem:[%s1315_s5 + $0xf8] sm:$0xf0]  ;;  %v1023_v43 = vld [vmem:[%s1315_s5 + $0xc0] sm:$0xf] }
  0x40   : > { %547 = vmatpush.bf16.msra.mxu0 %v1040_v35  ;;  %v1052_v44 = vor.u32 %v1090_v41, %v1049_v42  ;;  %v1087_v45 = vld [vmem:[%s1315_s5 + $0xcc] sm:$0xf0]  ;;  %v1085_v46 = vld [vmem:[%s1315_s5 + $0xc4] sm:$0xf]  ;;  %v1025_v47 = vld [vmem:[%s1315_s5 + $0xd0] sm:$0xf0] }
  0x41   : > { %561 = vmatpush.bf16.msra.mxu1 %v1044_v39  ;;  %575 = vmatpush.bf16.msra.mxu2 %v1048_v40  ;;  %v1024_v48 = vor.u32 %v1087_v45, %v1023_v43  ;;  %v1028_v49 = vor.u32 %v1085_v46, %v1025_v47  ;;  %v1031_v50 = vld [vmem:[%s1315_s5 + $0xc8] sm:$0xf]  ;;  %v1088_v51 = vld [vmem:[%s1315_s5 + $0xd4] sm:$0xf0]  ;;  %v1086_v52 = vld [vmem:[%s1315_s5 + $0xcc] sm:$0xf] }
  0x42   : > { %589 = vmatpush.bf16.msra.mxu3 %v1052_v44  ;;  %v1032_v53 = vor.u32 %v1088_v51, %v1031_v50  ;;  %v1033_v54 = vld [vmem:[%s1315_s5 + $0xd8] sm:$0xf0]  ;;  %v1007_v55 = vld [vmem:[%s1315_s5 + $0xa0] sm:$0xf]  ;;  %v1083_v56 = vld [vmem:[%s1315_s5 + $0xac] sm:$0xf0] }
  0x43   : > { %v1036_v57 = vor.u32 %v1086_v52, %v1033_v54  ;;  %v1081_v58 = vld [vmem:[%s1315_s5 + $0xa4] sm:$0xf]  ;;  %v1009_v59 = vld [vmem:[%s1315_s5 + $0xb0] sm:$0xf0]  ;;  %v1015_v60 = vld [vmem:[%s1315_s5 + $0xa8] sm:$0xf]  ;;  %v1008_v61 = vor.u32 %v1083_v56, %v1007_v55 }
  0x44   : > { %548 = vmatpush.bf16.msra.mxu0 %v1024_v48  ;;  %v1084_v62 = vld [vmem:[%s1315_s5 + $0xb4] sm:$0xf0]  ;;  %v1082_v63 = vld [vmem:[%s1315_s5 + $0xac] sm:$0xf]  ;;  %v1017_v0 = vld [vmem:[%s1315_s5 + $0xb8] sm:$0xf0]  ;;  %v1012_v1 = vor.u32 %v1081_v58, %v1009_v59 }
  0x45   : > { %562 = vmatpush.bf16.msra.mxu1 %v1028_v49  ;;  %576 = vmatpush.bf16.msra.mxu2 %v1032_v53  ;;  %v1016_v2 = vor.u32 %v1084_v62, %v1015_v60  ;;  %v991_v3 = vld [vmem:[%s1315_s5 + $0x80] sm:$0xf]  ;;  %v1079_v4 = vld [vmem:[%s1315_s5 + $0x8c] sm:$0xf0]  ;;  %v1077_v5 = vld [vmem:[%s1315_s5 + $0x84] sm:$0xf]  ;;  %v1020_v6 = vor.u32 %v1082_v63, %v1017_v0 }
  0x46   : > { %590 = vmatpush.bf16.msra.mxu3 %v1036_v57  ;;  %v993_v7 = vld [vmem:[%s1315_s5 + $0x90] sm:$0xf0]  ;;  %v999_v8 = vld [vmem:[%s1315_s5 + $0x88] sm:$0xf]  ;;  %v1080_v9 = vld [vmem:[%s1315_s5 + $0x94] sm:$0xf0]  ;;  %v992_v12 = vor.u32 %v1079_v4, %v991_v3 }
  0x47   : > { %v1078_v10 = vld [vmem:[%s1315_s5 + $0x8c] sm:$0xf]  ;;  %v1001_v11 = vld [vmem:[%s1315_s5 + $0x98] sm:$0xf0]  ;;  %v996_v13 = vor.u32 %v1077_v5, %v993_v7  ;;  %v1000_v14 = vor.u32 %v1080_v9, %v999_v8  ;;  %v975_v15 = vld [vmem:[%s1315_s5 + $0x60] sm:$0xf] }
  0x48   : > { %549 = vmatpush.bf16.msra.mxu0 %v1008_v61  ;;  %v1075_v16 = vld [vmem:[%s1315_s5 + $0x6c] sm:$0xf0]  ;;  %v1073_v17 = vld [vmem:[%s1315_s5 + $0x64] sm:$0xf]  ;;  %v1004_v18 = vor.u32 %v1078_v10, %v1001_v11  ;;  %v977_v19 = vld [vmem:[%s1315_s5 + $0x70] sm:$0xf0] }
  0x49   : > { %563 = vmatpush.bf16.msra.mxu1 %v1012_v1  ;;  %577 = vmatpush.bf16.msra.mxu2 %v1016_v2  ;;  %v983_v20 = vld [vmem:[%s1315_s5 + $0x68] sm:$0xf]  ;;  %v1076_v21 = vld [vmem:[%s1315_s5 + $0x74] sm:$0xf0]  ;;  %v1074_v22 = vld [vmem:[%s1315_s5 + $0x6c] sm:$0xf]  ;;  %v976_v24 = vor.u32 %v1075_v16, %v975_v15  ;;  %v980_v25 = vor.u32 %v1073_v17, %v977_v19 }
  0x4a   : > { %591 = vmatpush.bf16.msra.mxu3 %v1020_v6  ;;  %v985_v23 = vld [vmem:[%s1315_s5 + $0x78] sm:$0xf0]  ;;  %v984_v26 = vor.u32 %v1076_v21, %v983_v20  ;;  %v959_v27 = vld [vmem:[%s1315_s5 + $0x40] sm:$0xf]  ;;  %v1071_v28 = vld [vmem:[%s1315_s5 + $0x4c] sm:$0xf0] }
  0x4b   : > { %v1069_v29 = vld [vmem:[%s1315_s5 + $0x44] sm:$0xf]  ;;  %v988_v30 = vor.u32 %v1074_v22, %v985_v23  ;;  %v961_v31 = vld [vmem:[%s1315_s5 + $0x50] sm:$0xf0]  ;;  %v967_v32 = vld [vmem:[%s1315_s5 + $0x48] sm:$0xf]  ;;  %v960_v36 = vor.u32 %v1071_v28, %v959_v27 }
  0x4c   : > { %550 = vmatpush.bf16.msra.mxu0 %v992_v12  ;;  %v1072_v33 = vld [vmem:[%s1315_s5 + $0x54] sm:$0xf0]  ;;  %v1070_v34 = vld [vmem:[%s1315_s5 + $0x4c] sm:$0xf]  ;;  %v969_v35 = vld [vmem:[%s1315_s5 + $0x58] sm:$0xf0]  ;;  %v964_v37 = vor.u32 %v1069_v29, %v961_v31 }
  0x4d   : > { %564 = vmatpush.bf16.msra.mxu1 %v996_v13  ;;  %578 = vmatpush.bf16.msra.mxu2 %v1000_v14  ;;  %v968_v38 = vor.u32 %v1072_v33, %v967_v32  ;;  %v943_v39 = vld [vmem:[%s1315_s5 + $0x20] sm:$0xf]  ;;  %v1067_v40 = vld [vmem:[%s1315_s5 + $0x2c] sm:$0xf0]  ;;  %v1065_v41 = vld [vmem:[%s1315_s5 + $0x24] sm:$0xf]  ;;  %v972_v42 = vor.u32 %v1070_v34, %v969_v35 }
  0x4e   : > { %592 = vmatpush.bf16.msra.mxu3 %v1004_v18  ;;  %v945_v43 = vld [vmem:[%s1315_s5 + $0x30] sm:$0xf0]  ;;  %v951_v44 = vld [vmem:[%s1315_s5 + $0x28] sm:$0xf]  ;;  %v1068_v45 = vld [vmem:[%s1315_s5 + $0x34] sm:$0xf0]  ;;  %v944_v48 = vor.u32 %v1067_v40, %v943_v39 }
  0x4f   : > { %v1066_v46 = vld [vmem:[%s1315_s5 + $0x2c] sm:$0xf]  ;;  %v953_v47 = vld [vmem:[%s1315_s5 + $0x38] sm:$0xf0]  ;;  %v948_v49 = vor.u32 %v1065_v41, %v945_v43  ;;  %v952_v50 = vor.u32 %v1068_v45, %v951_v44  ;;  %v927_v51 = vld [vmem:[%s1315_s5] sm:$0xf] }
  0x50   : > { %551 = vmatpush.bf16.msra.mxu0 %v976_v24  ;;  %v1063_v52 = vld [vmem:[%s1315_s5 + $0xc] sm:$0xf0]  ;;  %v1061_v53 = vld [vmem:[%s1315_s5 + $0x4] sm:$0xf]  ;;  %v956_v54 = vor.u32 %v1066_v46, %v953_v47  ;;  %v929_v55 = vld [vmem:[%s1315_s5 + $0x10] sm:$0xf0] }
  0x51   : > { %565 = vmatpush.bf16.msra.mxu1 %v980_v25  ;;  %579 = vmatpush.bf16.msra.mxu2 %v984_v26  ;;  %v935_v56 = vld [vmem:[%s1315_s5 + $0x8] sm:$0xf]  ;;  %v1064_v57 = vld [vmem:[%s1315_s5 + $0x14] sm:$0xf0]  ;;  %v1062_v58 = vld [vmem:[%s1315_s5 + $0xc] sm:$0xf]  ;;  %v928_v60 = vor.u32 %v1063_v52, %v927_v51  ;;  %v932_v61 = vor.u32 %v1061_v53, %v929_v55 }
  0x52   : > { %593 = vmatpush.bf16.msra.mxu3 %v988_v30  ;;  %v937_v59 = vld [vmem:[%s1315_s5 + $0x18] sm:$0xf0]  ;;  %v936_v62 = vor.u32 %v1064_v57, %v935_v56  ;;  %v1060_v0 = vld [vmem:[%s1436_s0] sm:$0xff]  ;;  %s1449_s10 = smov (!%p1392_p11, %s919_s10), 7  ;;  %vm638_vm0 = vcmask 1040384   ;;  %vm640_vm1 = vcmask 1042434  }
  0x53   : > { %v940_v63 = vor.u32 %v1062_v58, %v937_v59  ;;  %s920_s12 = sshll.u32 %s1449_s10, 1  ;;  %vm642_vm2 = vcmask 1041408   ;;  %s1093_s23 = sshll.u32 (%p1229_p6), %s1164_s14, 4 }
  0x54   : > { %552 = vmatpush.bf16.msra.mxu0 %v960_v36  ;;  %s345_s20 = scalar_lea.vmem %s1439_s3, %s920_s12  ;;  %s734_s26 = scalar_lea.vmem (%p1229_p6), %s1438_s2, %s1093_s23 }
  0x55   : > { %566 = vmatpush.bf16.msra.mxu1 %v964_v37  ;;  %580 = vmatpush.bf16.msra.mxu2 %v968_v38 }
  0x56   : > { %594 = vmatpush.bf16.msra.mxu3 %v972_v42 }
  0x58   : > { %553 = vmatpush.bf16.msra.mxu0 %v944_v48 }
  0x59   : > { %567 = vmatpush.bf16.msra.mxu1 %v948_v49  ;;  %581 = vmatpush.bf16.msra.mxu2 %v952_v50 }
  0x5a   : > { %595 = vmatpush.bf16.msra.mxu3 %v956_v54 }
  0x5c   : > { %554 = vmatpush.bf16.msra.mxu0 %v928_v60 }
  0x5d   : > { %568 = vmatpush.bf16.msra.mxu1 %v932_v61  ;;  %582 = vmatpush.bf16.msra.mxu2 %v936_v62 }
  0x5e   : > { %596 = vmatpush.bf16.msra.mxu3 %v940_v63 }
  0x5f   : > { %555 = vmatmul.bf16.vlgmr.msra.gmra.mxu0 %v1060_v0 }
  0x60   : > { %569 = vmatmul.bf16.vlgmr.msra.gmra.mxu1 %v1060_v0  ;;  %583 = vmatmul.bf16.vlgmr.msra.gmra.mxu2 %v1060_v0 }
  0x61   : > { %597 = vmatmul.bf16.vlgmr.msra.gmra.mxu3 %v1060_v0 }
  0xdc   : > { %v556_v1 = vpop.f32.mrf.mxu0 }
  0xdd   : > { %v570_v2 = vpop.f32.mrf.mxu1  ;;  %v650_v4 = vmul.f32 %v556_v1, %v556_v1 }
  0xde   : > { %v699_v3 = vpack.c.bf16 %v570_v2, %v556_v1  ;;  %v651_v12 = vmul.f32 %v570_v2, %v570_v2 }
  0xe0   : > { %703 = vst [vmem:[%s1386_s9] sm:$0xff] %v699_v3 }
  0xe3   : > { %v584_v5 = vpop.f32.mrf.mxu2 }
  0xe4   : > { %v598_v6 = vpop.f32.mrf.mxu3  ;;  %v558_v7 = vpop.f32.mrf.mxu0  ;;  %v652_v24 = vmul.f32 %v584_v5, %v584_v5 }
  0xe5   : > { %v700_v8 = vpack.c.bf16 %v598_v6, %v584_v5  ;;  %v603_v9 = vadd.f32 %v558_v7, %v556_v1  ;;  %v654_v10 = vmul.f32 %v558_v7, %v558_v7  ;;  %v572_v11 = vpop.f32.mrf.mxu1  ;;  %v653_v25 = vmul.f32 %v598_v6, %v598_v6 }
  0xe6   : > { %v610_v13 = vadd.f32 %v572_v11, %v570_v2  ;;  %v655_v14 = vmul.f32 %v572_v11, %v572_v11  ;;  %v701_v15 = vpack.c.bf16 %v572_v11, %v558_v7 }
  0xe7   : > { %704 = vst [vmem:[%s1386_s9 + $0x8] sm:$0xff] %v700_v8  ;;  %v604_v16 = vrot.slane %v603_v9, 4  ;;  %v658_v17 = vadd.f32 %v654_v10, %v650_v4 }
  0xe8   : > { %v611_v18 = vrot.slane %v610_v13, 4  ;;  %v665_v19 = vadd.f32 %v655_v14, %v651_v12  ;;  %705 = vst [vmem:[%s1386_s9 + $0x10] sm:$0xff] %v701_v15 }
  0xe9   : > { %v605_v20 = vadd.f32 %v604_v16, %v603_v9  ;;  %v659_v21 = vrot.slane %v658_v17, 4 }
  0xea   : > { %v612_v22 = vadd.f32 %v611_v18, %v610_v13  ;;  %v666_v23 = vrot.slane %v665_v19, 4 }
  0xeb   : > { %v586_v26 = vpop.f32.mrf.mxu2  ;;  %v606_v32 = vrot.slane %v605_v20, 2  ;;  %v660_v33 = vadd.f32 %v659_v21, %v658_v17 }
  0xec   : > { %v613_v27 = vrot.slane %v612_v22, 2  ;;  %v667_v28 = vadd.f32 %v666_v23, %v665_v19  ;;  %v617_v29 = vadd.f32 %v586_v26, %v584_v5  ;;  %v656_v30 = vmul.f32 %v586_v26, %v586_v26  ;;  %v600_v31 = vpop.f32.mrf.mxu3 }
  0xed   : > { %v624_v34 = vadd.f32 %v600_v31, %v598_v6  ;;  %v657_v35 = vmul.f32 %v600_v31, %v600_v31  ;;  %v661_v45 = vrot.slane %v660_v33, 2  ;;  %v607_v49 = vadd.f32 %v606_v32, %v605_v20 }
  0xee   : > { %v614_v36 = vadd.f32 %v613_v27, %v612_v22  ;;  %v668_v37 = vrot.slane %v667_v28, 2  ;;  %v618_v38 = vrot.slane %v617_v29, 4  ;;  %v672_v39 = vadd.f32 %v656_v30, %v652_v24  ;;  %v749_v27 = vld [vmem:[%s1386_s9 + $0x8] sm:$0xff] (%p1229_p6) }
  0xef   : > { %v625_v40 = vrot.slane %v624_v34, 4  ;;  %v679_v41 = vadd.f32 %v657_v35, %v653_v25  ;;  %v702_v55 = vpack.c.bf16 %v600_v31, %v586_v26  ;;  %v662_v58 = vadd.f32 %v661_v45, %v660_v33  ;;  %v747_v26 = vld [vmem:[%s1386_s9] sm:$0xff] (%p1229_p6)  ;;  %750 = vst [vmem:[%s734_s26 + $0x8] sm:$0xff] (%p1229_p6), %v749_v27 }
  0xf0   : > { %v669_v42 = vadd.f32 %v668_v37, %v667_v28  ;;  %v619_v43 = vadd.f32 %v618_v38, %v617_v29  ;;  %v673_v44 = vrot.slane %v672_v39, 4  ;;  %v615_v46 = vrot.slane %v614_v36, 1  ;;  %v751_v28 = vld [vmem:[%s1386_s9 + $0x10] sm:$0xff] (%p1229_p6)  ;;  %748 = vst [vmem:[%s734_s26] sm:$0xff] (%p1229_p6), %v747_v26 }
  0xf1   : > { %v626_v47 = vadd.f32 %v625_v40, %v624_v34  ;;  %v680_v48 = vrot.slane %v679_v41, 4  ;;  %706 = vst [vmem:[%s1386_s9 + $0x18] sm:$0xff] %v702_v55  ;;  %v608_v0 = vrot.slane %v607_v49, 1  ;;  %v645_v6 = vlaneseq }
  0xf2   : > { %v620_v50 = vrot.slane %v619_v43, 2  ;;  %v674_v51 = vadd.f32 %v673_v44, %v672_v39  ;;  %v670_v52 = vrot.slane %v669_v42, 1  ;;  %v616_v59 = vadd.f32 %v615_v46, %v614_v36  ;;  %752 = vst [vmem:[%s734_s26 + $0x20] sm:$0xff] (%p1229_p6), %v751_v28 }
  0xf3   : > { %v627_v53 = vrot.slane %v626_v47, 2  ;;  %v681_v54 = vadd.f32 %v680_v48, %v679_v41  ;;  %v663_v7 = vrot.slane %v662_v58, 1  ;;  %v609_v13 = vadd.f32 %v608_v0, %v607_v49 }
  0xf4   : > { %v621_v56 = vadd.f32 %v620_v50, %v619_v43  ;;  %v675_v57 = vrot.slane %v674_v51, 2  ;;  %v671_v1 = vadd.f32 %v670_v52, %v669_v42  ;;  %v635_v8 = vrot.slane %v616_v59, 7 }
  0xf5   : > { %v628_v60 = vadd.f32 %v627_v53, %v626_v47  ;;  %v682_v61 = vrot.slane %v681_v54, 2  ;;  %vm647_vm3 = vcmp.lt.s32.totalorder %v645_v6, 512  ;;  %v664_v18 = vadd.f32 %v663_v7, %v662_v58 }
  0xf6   : > { %v622_v62 = vrot.slane %v621_v56, 1  ;;  %v676_v63 = vadd.f32 %v675_v57, %v674_v51  ;;  %v690_v14 = vrot.slane %v671_v1, 7  ;;  %v639_v19 = vsel %vm638_vm0, %v609_v13, %v635_v8 }
  0xf7   : > { %v629_v2 = vrot.slane %v628_v60, 1  ;;  %v683_v3 = vadd.f32 %v682_v61, %v681_v54 }
  0xf8   : > { %v623_v4 = vadd.f32 %v622_v62, %v621_v56  ;;  %v677_v5 = vrot.slane %v676_v63, 1  ;;  %v693_v23 = vsel %vm638_vm0, %v664_v18, %v690_v14  ;;  %v753_v29 = vld [vmem:[%s1386_s9 + $0x18] sm:$0xff] (%p1229_p6) }
  0xf9   : > { %v630_v9 = vadd.f32 %v629_v2, %v628_v60  ;;  %v684_v10 = vrot.slane %v683_v3, 1  ;;  %754 = vst [vmem:[%s734_s26 + $0x28] sm:$0xff] (%p1229_p6), %v753_v29 }
  0xfa   : > { %v636_v11 = vrot.slane %v623_v4, 6  ;;  %v678_v12 = vadd.f32 %v677_v5, %v676_v63 }
  0xfb   : > { %v637_v15 = vrot.slane %v630_v9, 5  ;;  %v685_v16 = vadd.f32 %v684_v10, %v683_v3 }
  0xfc   : > { %v691_v17 = vrot.slane %v678_v12, 6 }
  0xfd   : > { %v641_v20 = vsel %vm640_vm1, %v636_v11, %v637_v15  ;;  %v692_v21 = vrot.slane %v685_v16, 5  ;;  %726 = sbr.rel (!%p1229_p6) target bundleno = 258 (0x102), region = 55 }
  0xfe   : > { %v643_v22 = vsel %vm642_vm2, %v639_v19, %v641_v20 }
  0xff   : > { %649 = vst.msk [vmem:[%s345_s20] ss:$2 sm:$0xf] %vm647_vm3, %v643_v22  ;;  %v694_v24 = vsel %vm640_vm1, %v691_v17, %v692_v21 }
 0x100   : > { %v695_v25 = vsel %vm642_vm2, %v693_v23, %v694_v24 }
 0x101   : > { %1053 = vst.msk [vmem:[%s345_s20 + $0x1] ss:$2 sm:$0xf] %vm647_vm3, %v695_v25 }
 0x102 PF: > { %s14_s16 = sadd.s32 1, %s1172_s16   ;;  %s1442_s12 = smov %s1160_s13 }
 0x103   : > { %p11_p12 = scmp.ge.s32.totalorder %s14_s16, 4   ;;  %s1443_s13 = smov %s1234_s22 }
 0x104   : > { %s1444_s14 = smov %s1168_s15  ;;  %s1445_s15 = smov %s1447_s17 }
 0x105   :  { %13 = sbr.rel (!%p11_p12) target bundleno = 3 (0x3), region = 125 }

// kernel: generator_forward.6
= control target key start
LH: loop header
LB: loop body
LE: loop exit
PB: predicated region body
PF: predicated region fallthrough
CT: control target
= control target key end

     0   :  { %s892_s12 = smov 0   ;;  %s894_s13 = smov 0   ;;  %s955_s0 = inlined_call_operand.vmem [shape: bf16[4,32,256], index: 0, kind: input, shape index: {}]   ;;  %s956_s1 = inlined_call_operand.vmem [shape: bf16[4,256,128], index: 1, kind: input, shape index: {}]   ;;  %s957_s2 = inlined_call_operand.vmem [shape: bf16[4,32,128], index: 2, kind: output, shape index: {0}]   ;;  %s958_s3 = inlined_call_operand.vmem [shape: f32[4,1,2,128], index: 3, kind: output, shape index: {1}]  }
   0x1   :  { %s896_s14 = smov 0  }
   0x2 LB: > { %s33_s15 = sadd.s32 1, %s866_s13  ;;  %p684_p0 = scmp.ge.s32.totalorder %s870_s14, 1  ;;  %s870_s14 = sphi %s896_s14, %s14_s14   ;;  %s866_s13 = sphi %s894_s13, %s960_s13   ;;  %s862_s12 = sphi %s892_s12, %s959_s12  }
   0x3   : > { %p35_p1 = scmp.ge.s32.totalorder %s33_s15, 4  ;;  %p190_p2 = scmp.lt.s32.totalorder %s870_s14, 5 }
   0x5   : > { %s962_s15 = smov (%p35_p1, %s33_s15), 0  ;;  %p191_p3 = pnand %p684_p0, %p190_p2 }
   0x6   : > { %p245_p4 = scmp.lt.s32.totalorder (!%p191_p3), %s862_s12, 3 }
   0x7   : > { %194 = sbr.rel (%p191_p3) target bundleno = 207 (0xcf), region = 28 }
   0xc   : > { %s964_s12 = smov (!%p245_p4, %s862_s12), 3 }
   0xd   : > { %s775_s16 = sshll.u32 %s964_s12, 7  ;;  %s774_s20 = sshll.u32 %s964_s12, 5 }
   0xe   : > { %s916_s19 = scalar_lea.vmem %s956_s1, %s775_s16  ;;  %s253_s23 = scalar_lea.vmem %s955_s0, %s774_s20 }
   0xf   : > { %v788_v0 = vld [vmem:[%s916_s19 + $0x38] sm:$0xff]  ;;  %v787_v2 = vld [vmem:[%s916_s19 + $0x30] sm:$0xff]  ;;  %v786_v4 = vld [vmem:[%s916_s19 + $0x28] sm:$0xff]  ;;  %s776_s24 = sshll.u32 %s964_s12, 4  ;;  %s691_s28 = sshll.u32 %s964_s12, 1 }
  0x10   : > { %v796_v1 = vld [vmem:[%s916_s19 + $0x78] sm:$0xff]  ;;  %438 = vmatpush.bf16.msra.mxu0 %v788_v0  ;;  %808 = vmatpush.bf16.msra.mxu2 %v788_v0  ;;  %v795_v3 = vld [vmem:[%s916_s19 + $0x70] sm:$0xff]  ;;  %v794_v5 = vld [vmem:[%s916_s19 + $0x68] sm:$0xff]  ;;  %s274_s27 = scalar_lea.vmem %s957_s2, %s776_s24  ;;  %s285_s4 = scalar_lea.vmem %s958_s3, %s691_s28 }
  0x11   : > { %457 = vmatpush.bf16.msra.mxu1 %v796_v1  ;;  %816 = vmatpush.bf16.msra.mxu3 %v796_v1  ;;  %v785_v6 = vld [vmem:[%s916_s19 + $0x20] sm:$0xff]  ;;  %v784_v8 = vld [vmem:[%s916_s19 + $0x18] sm:$0xff]  ;;  %v783_v10 = vld [vmem:[%s916_s19 + $0x10] sm:$0xff] }
  0x12   : > { %v793_v7 = vld [vmem:[%s916_s19 + $0x60] sm:$0xff]  ;;  %v792_v9 = vld [vmem:[%s916_s19 + $0x58] sm:$0xff]  ;;  %v791_v11 = vld [vmem:[%s916_s19 + $0x50] sm:$0xff] }
  0x13   : > { %v782_v12 = vld [vmem:[%s916_s19 + $0x8] sm:$0xff]  ;;  %v781_v14 = vld [vmem:[%s916_s19] sm:$0xff]  ;;  %v702_v18 = vld [vmem:[%s253_s23 + $0x10] sm:$0xf] }
  0x14   : > { %439 = vmatpush.bf16.msra.mxu0 %v787_v2  ;;  %809 = vmatpush.bf16.msra.mxu2 %v787_v2  ;;  %v790_v13 = vld [vmem:[%s916_s19 + $0x48] sm:$0xff]  ;;  %v789_v15 = vld [vmem:[%s916_s19 + $0x40] sm:$0xff]  ;;  %v780_v19 = vld [vmem:[%s253_s23 + $0x14] sm:$0xf0] }
  0x15   : > { %458 = vmatpush.bf16.msra.mxu1 %v795_v3  ;;  %817 = vmatpush.bf16.msra.mxu3 %v795_v3  ;;  %v694_v16 = vld [vmem:[%s253_s23] sm:$0xf]  ;;  %v778_v17 = vld [vmem:[%s253_s23 + $0x4] sm:$0xf0]  ;;  %v777_v20 = vld [vmem:[%s253_s23 + $0x4] sm:$0xf]  ;;  %v703_v25 = vor.u32 %v780_v19, %v702_v18 }
  0x16   : > { %v696_v21 = vld [vmem:[%s253_s23 + $0x8] sm:$0xf0]  ;;  %v779_v22 = vld [vmem:[%s253_s23 + $0x14] sm:$0xf]  ;;  %v704_v23 = vld [vmem:[%s253_s23 + $0x18] sm:$0xf0]  ;;  %v695_v24 = vor.u32 %v778_v17, %v694_v16 }
  0x17   : > { %v699_v26 = vor.u32 %v777_v20, %v696_v21  ;;  %v707_v27 = vor.u32 %v779_v22, %v704_v23 }
  0x18   : > { %440 = vmatpush.bf16.msra.mxu0 %v786_v4  ;;  %810 = vmatpush.bf16.msra.mxu2 %v786_v4 }
  0x19   : > { %459 = vmatpush.bf16.msra.mxu1 %v794_v5  ;;  %818 = vmatpush.bf16.msra.mxu3 %v794_v5 }
  0x1c   : > { %441 = vmatpush.bf16.msra.mxu0 %v785_v6  ;;  %811 = vmatpush.bf16.msra.mxu2 %v785_v6 }
  0x1d   : > { %460 = vmatpush.bf16.msra.mxu1 %v793_v7  ;;  %819 = vmatpush.bf16.msra.mxu3 %v793_v7 }
  0x20   : > { %442 = vmatpush.bf16.msra.mxu0 %v784_v8  ;;  %812 = vmatpush.bf16.msra.mxu2 %v784_v8 }
  0x21   : > { %461 = vmatpush.bf16.msra.mxu1 %v792_v9  ;;  %820 = vmatpush.bf16.msra.mxu3 %v792_v9 }
  0x24   : > { %443 = vmatpush.bf16.msra.mxu0 %v783_v10  ;;  %813 = vmatpush.bf16.msra.mxu2 %v783_v10 }
  0x25   : > { %462 = vmatpush.bf16.msra.mxu1 %v791_v11  ;;  %821 = vmatpush.bf16.msra.mxu3 %v791_v11 }
  0x28   : > { %444 = vmatpush.bf16.msra.mxu0 %v782_v12  ;;  %814 = vmatpush.bf16.msra.mxu2 %v782_v12 }
  0x29   : > { %463 = vmatpush.bf16.msra.mxu1 %v790_v13  ;;  %822 = vmatpush.bf16.msra.mxu3 %v790_v13 }
  0x2c   : > { %445 = vmatpush.bf16.msra.mxu0 %v781_v14  ;;  %815 = vmatpush.bf16.msra.mxu2 %v781_v14 }
  0x2d   : > { %464 = vmatpush.bf16.msra.mxu1 %v789_v15  ;;  %823 = vmatpush.bf16.msra.mxu3 %v789_v15 }
  0x2f   : > { %446 = vmatmul.bf16.vlgmr.msra.gmra.mxu0 %v695_v24  ;;  %451 = vmatmul.bf16.vlgmr.msra.gmra.mxu2 %v703_v25 }
  0x30   : > { %465 = vmatmul.bf16.vlgmr.msra.gmra.mxu1 %v699_v26  ;;  %470 = vmatmul.bf16.vlgmr.msra.gmra.mxu3 %v707_v27 }
  0xac   : > { %v447_v28 = vpop.f32.mrf.mxu0 }
  0xad   : > { %v466_v29 = vpop.f32.mrf.mxu1 }
  0xae   : > { %v467_v31 = vadd.f32 %v466_v29, %v447_v28 }
  0xb0   : > { %v486_v36 = vmul.f32 %v467_v31, %v467_v31 }
  0xb2   : > { %v452_v30 = vpop.f32.mrf.mxu2 }
  0xb3   : > { %v471_v32 = vpop.f32.mrf.mxu3 }
  0xb4   : > { %v449_v33 = vpop.f32.mrf.mxu0  ;;  %v472_v37 = vadd.f32 %v471_v32, %v452_v30 }
  0xb5   : > { %v468_v34 = vpop.f32.mrf.mxu1 }
  0xb6   : > { %v469_v35 = vadd.f32 %v468_v34, %v449_v33  ;;  %v488_v44 = vmul.f32 %v472_v37, %v472_v37 }
  0xb8   : > { %v476_v38 = vadd.f32 %v469_v35, %v467_v31  ;;  %v487_v39 = vmul.f32 %v469_v35, %v469_v35  ;;  %v800_v40 = vpack.c.bf16 %v469_v35, %v467_v31 }
  0xba   : > { %v490_v41 = vadd.f32 %v487_v39, %v486_v36  ;;  %801 = vst [vmem:[%s274_s27] sm:$0xff] %v800_v40   ;;  %v454_v42 = vpop.f32.mrf.mxu2  ;;  %v477_v46 = vadd.f32 %v476_v38, %v472_v37 }
  0xbb   : > { %v473_v43 = vpop.f32.mrf.mxu3 }
  0xbc   : > { %v474_v45 = vadd.f32 %v473_v43, %v454_v42  ;;  %v491_v49 = vadd.f32 %v490_v41, %v488_v44 }
  0xbe   : > { %v478_v47 = vadd.f32 %v477_v46, %v474_v45  ;;  %v489_v48 = vmul.f32 %v474_v45, %v474_v45  ;;  %v805_v50 = vpack.c.bf16 %v474_v45, %v472_v37 }
  0xc0   : > { %v479_v51 = vrot.slane %v478_v47, 4  ;;  %v492_v52 = vadd.f32 %v491_v49, %v489_v48  ;;  %807 = vst [vmem:[%s274_s27 + $0x8] sm:$0xff] %v805_v50  }
  0xc2   : > { %v480_v53 = vadd.f32 %v479_v51, %v478_v47  ;;  %v493_v54 = vrot.slane %v492_v52, 4 }
  0xc4   : > { %v481_v55 = vrot.slane %v480_v53, 2  ;;  %v494_v56 = vadd.f32 %v493_v54, %v492_v52 }
  0xc6   : > { %v482_v57 = vadd.f32 %v481_v55, %v480_v53  ;;  %v495_v58 = vrot.slane %v494_v56, 2 }
  0xc8   : > { %v483_v59 = vrot.slane %v482_v57, 1  ;;  %v496_v60 = vadd.f32 %v495_v58, %v494_v56 }
  0xca   : > { %v484_v61 = vadd.f32 %v483_v59, %v482_v57  ;;  %v497_v62 = vrot.slane %v496_v60, 1 }
  0xcc   : > { %485 = vst [vmem:[%s285_s4] sm:$0x1] %v484_v61  ;;  %v498_v63 = vadd.f32 %v497_v62, %v496_v60 }
  0xce   : > { %499 = vst [vmem:[%s285_s4 + $0x1] sm:$0x1] %v498_v63 }
  0xcf PF: > { %s14_s14 = sadd.s32 1, %s870_s14   ;;  %s959_s12 = smov %s866_s13 }
  0xd0   : > { %p11_p5 = scmp.ge.s32.totalorder %s14_s14, 6   ;;  %s960_s13 = smov %s962_s15 }
  0xd2   :  { %13 = sbr.rel (!%p11_p5) target bundleno = 2 (0x2), region = 73 }

// kernel: generator_forward.7
= control target key start
LH: loop header
LB: loop body
LE: loop exit
PB: predicated region body
PF: predicated region fallthrough
CT: control target
= control target key end

     0   :  { %s957_s12 = smov 0   ;;  %s959_s13 = smov 0   ;;  %s1031_s0 = inlined_call_operand.vmem [shape: bf16[4,128,128], index: 0, kind: input, shape index: {}]   ;;  %s1032_s1 = inlined_call_operand.vmem [shape: bf16[4,128,128], index: 1, kind: input, shape index: {}]   ;;  %s1033_s2 = inlined_call_operand.vmem [shape: bf16[4,128,128], index: 2, kind: output, shape index: {0}]   ;;  %s1034_s3 = inlined_call_operand.vmem [shape: f32[4,1,2,128], index: 3, kind: output, shape index: {1}]  }
   0x1   :  { %s961_s14 = smov 0  }
   0x2 LB: > { %s33_s15 = sadd.s32 1, %s931_s13  ;;  %p725_p0 = scmp.ge.s32.totalorder %s935_s14, 1  ;;  %s935_s14 = sphi %s961_s14, %s14_s14   ;;  %s931_s13 = sphi %s959_s13, %s1036_s13   ;;  %s927_s12 = sphi %s957_s12, %s1035_s12  }
   0x3   : > { %p35_p1 = scmp.ge.s32.totalorder %s33_s15, 4  ;;  %p189_p2 = scmp.lt.s32.totalorder %s935_s14, 5 }
   0x5   : > { %s1038_s15 = smov (%p35_p1, %s33_s15), 0  ;;  %p190_p3 = pnand %p725_p0, %p189_p2 }
   0x6   : > { %p243_p4 = scmp.lt.s32.totalorder (!%p190_p3), %s927_s12, 3 }
   0x7   : > { %193 = sbr.rel (%p190_p3) target bundleno = 238 (0xee), region = 28 }
   0xc   : > { %s1040_s12 = smov (!%p243_p4, %s927_s12), 3 }
   0xd   : > { %s978_s16 = sshll.u32 %s1040_s12, 6  ;;  %s732_s26 = sshll.u32 %s1040_s12, 1 }
   0xe   : > { %s984_s19 = scalar_lea.vmem %s1032_s1, %s978_s16  ;;  %s250_s22 = scalar_lea.vmem %s1031_s0, %s978_s16 }
   0xf   : > { %v817_v0 = vld [vmem:[%s984_s19 + $0x38] sm:$0xff]  ;;  %v816_v1 = vld [vmem:[%s984_s19 + $0x30] sm:$0xff]  ;;  %v815_v2 = vld [vmem:[%s984_s19 + $0x28] sm:$0xff]  ;;  %s1004_s25 = scalar_lea.vmem %s1033_s2, %s978_s16  ;;  %s282_s29 = scalar_lea.vmem %s1034_s3, %s732_s26 }
  0x10   : > { %411 = vmatpush.bf16.msra.mxu0 %v817_v0  ;;  %865 = vmatpush.bf16.msra.mxu1 %v817_v0  ;;  %v814_v3 = vld [vmem:[%s984_s19 + $0x20] sm:$0xff]  ;;  %v813_v4 = vld [vmem:[%s984_s19 + $0x18] sm:$0xff]  ;;  %v812_v5 = vld [vmem:[%s984_s19 + $0x10] sm:$0xff] }
  0x11   : > { %866 = vmatpush.bf16.msra.mxu2 %v817_v0  ;;  %867 = vmatpush.bf16.msra.mxu3 %v817_v0  ;;  %v811_v6 = vld [vmem:[%s984_s19 + $0x8] sm:$0xff]  ;;  %v810_v7 = vld [vmem:[%s984_s19] sm:$0xff]  ;;  %v804_v9 = vld [vmem:[%s250_s22 + $0x10] sm:$0xff] }
  0x12   : > { %v802_v8 = vld [vmem:[%s250_s22] sm:$0xff]  ;;  %v808_v11 = vld [vmem:[%s250_s22 + $0x30] sm:$0xff]  ;;  %v803_v12 = vld [vmem:[%s250_s22 + $0x8] sm:$0xff] }
  0x13   : > { %v806_v10 = vld [vmem:[%s250_s22 + $0x20] sm:$0xff]  ;;  %v805_v13 = vld [vmem:[%s250_s22 + $0x18] sm:$0xff]  ;;  %v807_v14 = vld [vmem:[%s250_s22 + $0x28] sm:$0xff] }
  0x14   : > { %412 = vmatpush.bf16.msra.mxu0 %v816_v1  ;;  %868 = vmatpush.bf16.msra.mxu1 %v816_v1  ;;  %v809_v15 = vld [vmem:[%s250_s22 + $0x38] sm:$0xff] }
  0x15   : > { %869 = vmatpush.bf16.msra.mxu2 %v816_v1  ;;  %870 = vmatpush.bf16.msra.mxu3 %v816_v1 }
  0x18   : > { %413 = vmatpush.bf16.msra.mxu0 %v815_v2  ;;  %871 = vmatpush.bf16.msra.mxu1 %v815_v2 }
  0x19   : > { %872 = vmatpush.bf16.msra.mxu2 %v815_v2  ;;  %873 = vmatpush.bf16.msra.mxu3 %v815_v2 }
  0x1c   : > { %414 = vmatpush.bf16.msra.mxu0 %v814_v3  ;;  %874 = vmatpush.bf16.msra.mxu1 %v814_v3 }
  0x1d   : > { %875 = vmatpush.bf16.msra.mxu2 %v814_v3  ;;  %876 = vmatpush.bf16.msra.mxu3 %v814_v3 }
  0x20   : > { %415 = vmatpush.bf16.msra.mxu0 %v813_v4  ;;  %877 = vmatpush.bf16.msra.mxu1 %v813_v4 }
  0x21   : > { %878 = vmatpush.bf16.msra.mxu2 %v813_v4  ;;  %879 = vmatpush.bf16.msra.mxu3 %v813_v4 }
  0x24   : > { %416 = vmatpush.bf16.msra.mxu0 %v812_v5  ;;  %880 = vmatpush.bf16.msra.mxu1 %v812_v5 }
  0x25   : > { %881 = vmatpush.bf16.msra.mxu2 %v812_v5  ;;  %882 = vmatpush.bf16.msra.mxu3 %v812_v5 }
  0x28   : > { %417 = vmatpush.bf16.msra.mxu0 %v811_v6  ;;  %883 = vmatpush.bf16.msra.mxu1 %v811_v6 }
  0x29   : > { %884 = vmatpush.bf16.msra.mxu2 %v811_v6  ;;  %885 = vmatpush.bf16.msra.mxu3 %v811_v6 }
  0x2c   : > { %418 = vmatpush.bf16.msra.mxu0 %v810_v7  ;;  %886 = vmatpush.bf16.msra.mxu1 %v810_v7 }
  0x2d   : > { %887 = vmatpush.bf16.msra.mxu2 %v810_v7  ;;  %888 = vmatpush.bf16.msra.mxu3 %v810_v7 }
  0x2f   : > { %419 = vmatmul.bf16.vlgmr.msra.gmra.mxu0 %v802_v8  ;;  %429 = vmatmul.bf16.vlgmr.msra.gmra.mxu1 %v804_v9 }
  0x30   : > { %439 = vmatmul.bf16.vlgmr.msra.gmra.mxu2 %v806_v10  ;;  %449 = vmatmul.bf16.vlgmr.msra.gmra.mxu3 %v808_v11 }
  0x3f   : > { %424 = vmatmul.bf16.gmra.mxu0 %v803_v12  ;;  %434 = vmatmul.bf16.gmra.mxu1 %v805_v13 }
  0x40   : > { %444 = vmatmul.bf16.gmra.mxu2 %v807_v14  ;;  %454 = vmatmul.bf16.gmra.mxu3 %v809_v15 }
  0xac   : > { %v420_v16 = vpop.f32.mrf.mxu0  ;;  %v430_v17 = vpop.f32.mrf.mxu1 }
  0xad   : > { %v482_v31 = vmul.f32 %v420_v16, %v420_v16  ;;  %v486_v45 = vmul.f32 %v430_v17, %v430_v17 }
  0xb3   : > { %v440_v18 = vpop.f32.mrf.mxu2  ;;  %v998_v19 = vpop.f32.mrf.mxu3 }
  0xb4   : > { %v422_v20 = vpop.f32.mrf.mxu0  ;;  %v432_v21 = vpop.f32.mrf.mxu1  ;;  %v490_v61 = vmul.f32 %v440_v18, %v440_v18  ;;  %v494_v9 = vmul.f32 %v998_v19, %v998_v19 }
  0xb5   : > { %v821_v22 = vpack.c.bf16 %v422_v20, %v420_v16  ;;  %v831_v23 = vpack.c.bf16 %v432_v21, %v430_v17  ;;  %v483_v30 = vmul.f32 %v422_v20, %v422_v20  ;;  %v460_v32 = vadd.f32 %v422_v20, %v420_v16 }
  0xb6   : > { %v487_v48 = vmul.f32 %v432_v21, %v432_v21 }
  0xb7   : > { %822 = vst [vmem:[%s1004_s25] sm:$0xff] %v821_v22   ;;  %v498_v34 = vadd.f32 %v483_v30, %v482_v31 }
  0xb8   : > { %859 = vst [vmem:[%s1004_s25 + $0x10] sm:$0xff] %v831_v23  }
  0xbb   : > { %v442_v24 = vpop.f32.mrf.mxu2  ;;  %v452_v25 = vpop.f32.mrf.mxu3 }
  0xbc   : > { %v425_v26 = vpop.f32.mrf.mxu0  ;;  %v435_v27 = vpop.f32.mrf.mxu1  ;;  %v841_v28 = vpack.c.bf16 %v442_v24, %v440_v18  ;;  %v851_v29 = vpack.c.bf16 %v452_v25, %v998_v19  ;;  %v491_v0 = vmul.f32 %v442_v24, %v442_v24  ;;  %v495_v12 = vmul.f32 %v452_v25, %v452_v25 }
  0xbd   : > { %v484_v33 = vmul.f32 %v425_v26, %v425_v26  ;;  %v461_v35 = vadd.f32 %v460_v32, %v425_v26  ;;  %v488_v51 = vmul.f32 %v435_v27, %v435_v27 }
  0xbe   : > { %861 = vst [vmem:[%s1004_s25 + $0x20] sm:$0xff] %v841_v28  }
  0xbf   : > { %863 = vst [vmem:[%s1004_s25 + $0x30] sm:$0xff] %v851_v29   ;;  %v499_v40 = vadd.f32 %v498_v34, %v484_v33 }
  0xc3   : > { %v445_v36 = vpop.f32.mrf.mxu2  ;;  %v455_v37 = vpop.f32.mrf.mxu3 }
  0xc4   : > { %v427_v38 = vpop.f32.mrf.mxu0  ;;  %v437_v39 = vpop.f32.mrf.mxu1  ;;  %v492_v4 = vmul.f32 %v445_v36, %v445_v36  ;;  %v496_v16 = vmul.f32 %v455_v37, %v455_v37 }
  0xc5   : > { %v462_v41 = vadd.f32 %v461_v35, %v427_v38  ;;  %v485_v42 = vmul.f32 %v427_v38, %v427_v38  ;;  %v826_v43 = vpack.c.bf16 %v427_v38, %v425_v26  ;;  %v836_v44 = vpack.c.bf16 %v437_v39, %v435_v27 }
  0xc6   : > { %v489_v59 = vmul.f32 %v437_v39, %v437_v39 }
  0xc7   : > { %v463_v46 = vadd.f32 %v462_v41, %v430_v17  ;;  %v500_v47 = vadd.f32 %v499_v40, %v485_v42  ;;  %858 = vst [vmem:[%s1004_s25 + $0x8] sm:$0xff] %v826_v43  }
  0xc8   : > { %860 = vst [vmem:[%s1004_s25 + $0x18] sm:$0xff] %v836_v44  }
  0xc9   : > { %v501_v49 = vadd.f32 %v500_v47, %v486_v45  ;;  %v464_v50 = vadd.f32 %v463_v46, %v432_v21 }
  0xcb   : > { %v465_v52 = vadd.f32 %v464_v50, %v435_v27  ;;  %v502_v53 = vadd.f32 %v501_v49, %v487_v48  ;;  %v447_v54 = vpop.f32.mrf.mxu2  ;;  %v457_v55 = vpop.f32.mrf.mxu3 }
  0xcc   : > { %v846_v56 = vpack.c.bf16 %v447_v54, %v445_v36  ;;  %v856_v57 = vpack.c.bf16 %v457_v55, %v455_v37  ;;  %v493_v8 = vmul.f32 %v447_v54, %v447_v54  ;;  %v497_v21 = vmul.f32 %v457_v55, %v457_v55 }
  0xcd   : > { %v466_v58 = vadd.f32 %v465_v52, %v437_v39  ;;  %v503_v60 = vadd.f32 %v502_v53, %v488_v51 }
  0xce   : > { %862 = vst [vmem:[%s1004_s25 + $0x28] sm:$0xff] %v846_v56  }
  0xcf   : > { %v467_v62 = vadd.f32 %v466_v58, %v440_v18  ;;  %v504_v63 = vadd.f32 %v503_v60, %v489_v59  ;;  %864 = vst [vmem:[%s1004_s25 + $0x38] sm:$0xff] %v856_v57  }
  0xd1   : > { %v505_v1 = vadd.f32 %v504_v63, %v490_v61  ;;  %v468_v2 = vadd.f32 %v467_v62, %v442_v24 }
  0xd3   : > { %v469_v3 = vadd.f32 %v468_v2, %v445_v36  ;;  %v506_v5 = vadd.f32 %v505_v1, %v491_v0 }
  0xd5   : > { %v507_v6 = vadd.f32 %v506_v5, %v492_v4  ;;  %v470_v7 = vadd.f32 %v469_v3, %v447_v54 }
  0xd7   : > { %v471_v10 = vadd.f32 %v470_v7, %v998_v19  ;;  %v508_v11 = vadd.f32 %v507_v6, %v493_v8 }
  0xd9   : > { %v509_v13 = vadd.f32 %v508_v11, %v494_v9  ;;  %v472_v14 = vadd.f32 %v471_v10, %v452_v25 }
  0xdb   : > { %v473_v15 = vadd.f32 %v472_v14, %v455_v37  ;;  %v510_v17 = vadd.f32 %v509_v13, %v495_v12 }
  0xdd   : > { %v511_v18 = vadd.f32 %v510_v17, %v496_v16  ;;  %v474_v20 = vadd.f32 %v473_v15, %v457_v55 }
  0xdf   : > { %v475_v22 = vrot.slane %v474_v20, 4  ;;  %v512_v23 = vadd.f32 %v511_v18, %v497_v21 }
  0xe1   : > { %v476_v24 = vadd.f32 %v475_v22, %v474_v20  ;;  %v513_v26 = vrot.slane %v512_v23, 4 }
  0xe3   : > { %v477_v27 = vrot.slane %v476_v24, 2  ;;  %v514_v28 = vadd.f32 %v513_v26, %v512_v23 }
  0xe5   : > { %v478_v29 = vadd.f32 %v477_v27, %v476_v24  ;;  %v515_v19 = vrot.slane %v514_v28, 2 }
  0xe7   : > { %v479_v30 = vrot.slane %v478_v29, 1  ;;  %v516_v31 = vadd.f32 %v515_v19, %v514_v28 }
  0xe9   : > { %v480_v25 = vadd.f32 %v479_v30, %v478_v29  ;;  %v517_v32 = vrot.slane %v516_v31, 1 }
  0xeb   : > { %481 = vst [vmem:[%s282_s29] sm:$0x1] %v480_v25  ;;  %v518_v33 = vadd.f32 %v517_v32, %v516_v31 }
  0xed   : > { %519 = vst [vmem:[%s282_s29 + $0x1] sm:$0x1] %v518_v33 }
  0xee PF: > { %s14_s14 = sadd.s32 1, %s935_s14   ;;  %s1035_s12 = smov %s931_s13 }
  0xef   : > { %p11_p5 = scmp.ge.s32.totalorder %s14_s14, 6   ;;  %s1036_s13 = smov %s1038_s15 }
  0xf1   :  { %13 = sbr.rel (!%p11_p5) target bundleno = 2 (0x2), region = 73 }

// kernel: generator_forward.8
= control target key start
LH: loop header
LB: loop body
LE: loop exit
PB: predicated region body
PF: predicated region fallthrough
CT: control target
= control target key end

     0   :  { %s1773_s12 = smov 0   ;;  %s1775_s13 = smov 0   ;;  %s2187_s0 = inlined_call_operand.vmem [shape: bf16[4,512,128], index: 0, kind: input, shape index: {}]   ;;  %s2188_s1 = inlined_call_operand.vmem [shape: bf16[4,128,128], index: 1, kind: input, shape index: {}]   ;;  %s2189_s2 = inlined_call_operand.vmem [shape: bf16[4,512,128], index: 2, kind: output, shape index: {0}]   ;;  %s2190_s3 = inlined_call_operand.vmem [shape: f32[4,1,2,128], index: 3, kind: output, shape index: {1}]  }
   0x1   :  { %s1777_s14 = smov 0  }
   0x2 LB: > { %s33_s15 = sadd.s32 1, %s1747_s13  ;;  %p1277_p0 = scmp.ge.s32.totalorder %s1751_s14, 1  ;;  %s1751_s14 = sphi %s1777_s14, %s14_s14   ;;  %s1747_s13 = sphi %s1775_s13, %s2192_s13   ;;  %s1743_s12 = sphi %s1773_s12, %s2191_s12  }
   0x3   : > { %p35_p1 = scmp.ge.s32.totalorder %s33_s15, 4  ;;  %p189_p2 = scmp.lt.s32.totalorder %s1751_s14, 5 }
   0x5   : > { %s2194_s15 = smov (%p35_p1, %s33_s15), 0  ;;  %p190_p3 = pnand %p1277_p0, %p189_p2 }
   0x6   : > { %p243_p4 = scmp.lt.s32.totalorder (!%p190_p3), %s1743_s12, 3 }
   0x7   : > { %193 = sbr.rel (%p190_p3) target bundleno = 406 (0x196), region = 28 }
   0xc   : > { %s2196_s12 = smov (!%p243_p4, %s1743_s12), 3 }
   0xd   : > { %s1448_s16 = sshll.u32 %s2196_s12, 6  ;;  %s1447_s20 = sshll.u32 %s2196_s12, 8 }
   0xe   : > { %s1797_s19 = scalar_lea.vmem %s2188_s1, %s1448_s16  ;;  %s1812_s23 = scalar_lea.vmem %s2187_s0, %s1447_s20 }
   0xf   : > { %v1489_v0 = vld [vmem:[%s1797_s19 + $0x38] sm:$0xff]  ;;  %v1488_v1 = vld [vmem:[%s1797_s19 + $0x30] sm:$0xff]  ;;  %v1487_v2 = vld [vmem:[%s1797_s19 + $0x28] sm:$0xff]  ;;  %s1852_s26 = scalar_lea.vmem %s2189_s2, %s1447_s20  ;;  %s1284_s27 = sshll.u32 %s2196_s12, 1 }
  0x10   : > { %603 = vmatpush.bf16.msra.mxu0 %v1489_v0  ;;  %1681 = vmatpush.bf16.msra.mxu1 %v1489_v0  ;;  %v1486_v3 = vld [vmem:[%s1797_s19 + $0x20] sm:$0xff]  ;;  %v1485_v4 = vld [vmem:[%s1797_s19 + $0x18] sm:$0xff]  ;;  %v1484_v5 = vld [vmem:[%s1797_s19 + $0x10] sm:$0xff]  ;;  %s282_s30 = scalar_lea.vmem %s2190_s3, %s1284_s27 }
  0x11   : > { %1682 = vmatpush.bf16.msra.mxu2 %v1489_v0  ;;  %1683 = vmatpush.bf16.msra.mxu3 %v1489_v0  ;;  %v1483_v6 = vld [vmem:[%s1797_s19 + $0x8] sm:$0xff]  ;;  %v1482_v7 = vld [vmem:[%s1797_s19] sm:$0xff]  ;;  %v1452_v13 = vld [vmem:[%s1812_s23 + $0x10] sm:$0xff] }
  0x12   : > { %v1450_v8 = vld [vmem:[%s1812_s23] sm:$0xff]  ;;  %v1451_v10 = vld [vmem:[%s1812_s23 + $0x8] sm:$0xff]  ;;  %v1460_v14 = vld [vmem:[%s1812_s23 + $0x50] sm:$0xff] }
  0x13   : > { %v1458_v9 = vld [vmem:[%s1812_s23 + $0x40] sm:$0xff]  ;;  %v1459_v11 = vld [vmem:[%s1812_s23 + $0x48] sm:$0xff]  ;;  %v1453_v16 = vld [vmem:[%s1812_s23 + $0x18] sm:$0xff] }
  0x14   : > { %604 = vmatpush.bf16.msra.mxu0 %v1488_v1  ;;  %1684 = vmatpush.bf16.msra.mxu1 %v1488_v1  ;;  %v1466_v12 = vld [vmem:[%s1812_s23 + $0x80] sm:$0xff]  ;;  %v1467_v15 = vld [vmem:[%s1812_s23 + $0x88] sm:$0xff]  ;;  %v1461_v17 = vld [vmem:[%s1812_s23 + $0x58] sm:$0xff] }
  0x15   : > { %1685 = vmatpush.bf16.msra.mxu2 %v1488_v1  ;;  %1686 = vmatpush.bf16.msra.mxu3 %v1488_v1  ;;  %v1468_v18 = vld [vmem:[%s1812_s23 + $0x90] sm:$0xff]  ;;  %v1474_v19 = vld [vmem:[%s1812_s23 + $0xc0] sm:$0xff]  ;;  %v1469_v22 = vld [vmem:[%s1812_s23 + $0x98] sm:$0xff] }
  0x16   : > { %v1454_v20 = vld [vmem:[%s1812_s23 + $0x20] sm:$0xff]  ;;  %v1475_v23 = vld [vmem:[%s1812_s23 + $0xc8] sm:$0xff]  ;;  %v1476_v27 = vld [vmem:[%s1812_s23 + $0xd0] sm:$0xff] }
  0x17   : > { %v1462_v21 = vld [vmem:[%s1812_s23 + $0x60] sm:$0xff]  ;;  %v1455_v24 = vld [vmem:[%s1812_s23 + $0x28] sm:$0xff]  ;;  %v1456_v28 = vld [vmem:[%s1812_s23 + $0x30] sm:$0xff] }
  0x18   : > { %605 = vmatpush.bf16.msra.mxu0 %v1487_v2  ;;  %1687 = vmatpush.bf16.msra.mxu1 %v1487_v2  ;;  %v1463_v25 = vld [vmem:[%s1812_s23 + $0x68] sm:$0xff]  ;;  %v1470_v26 = vld [vmem:[%s1812_s23 + $0xa0] sm:$0xff]  ;;  %v1464_v29 = vld [vmem:[%s1812_s23 + $0x70] sm:$0xff] }
  0x19   : > { %1688 = vmatpush.bf16.msra.mxu2 %v1487_v2  ;;  %1689 = vmatpush.bf16.msra.mxu3 %v1487_v2  ;;  %v1471_v30 = vld [vmem:[%s1812_s23 + $0xa8] sm:$0xff]  ;;  %v1477_v31 = vld [vmem:[%s1812_s23 + $0xd8] sm:$0xff]  ;;  %v1472_v34 = vld [vmem:[%s1812_s23 + $0xb0] sm:$0xff] }
  0x1a   : > { %v1457_v32 = vld [vmem:[%s1812_s23 + $0x38] sm:$0xff]  ;;  %v1478_v35 = vld [vmem:[%s1812_s23 + $0xe0] sm:$0xff]  ;;  %v1479_v39 = vld [vmem:[%s1812_s23 + $0xe8] sm:$0xff] }
  0x1b   : > { %v1465_v33 = vld [vmem:[%s1812_s23 + $0x78] sm:$0xff]  ;;  %v1480_v53 = vld [vmem:[%s1812_s23 + $0xf0] sm:$0xff] }
  0x1c   : > { %606 = vmatpush.bf16.msra.mxu0 %v1486_v3  ;;  %1690 = vmatpush.bf16.msra.mxu1 %v1486_v3  ;;  %v1473_v38 = vld [vmem:[%s1812_s23 + $0xb8] sm:$0xff] }
  0x1d   : > { %1691 = vmatpush.bf16.msra.mxu2 %v1486_v3  ;;  %1692 = vmatpush.bf16.msra.mxu3 %v1486_v3 }
  0x20   : > { %607 = vmatpush.bf16.msra.mxu0 %v1485_v4  ;;  %1693 = vmatpush.bf16.msra.mxu1 %v1485_v4 }
  0x21   : > { %1694 = vmatpush.bf16.msra.mxu2 %v1485_v4  ;;  %1695 = vmatpush.bf16.msra.mxu3 %v1485_v4 }
  0x24   : > { %608 = vmatpush.bf16.msra.mxu0 %v1484_v5  ;;  %1696 = vmatpush.bf16.msra.mxu1 %v1484_v5 }
  0x25   : > { %1697 = vmatpush.bf16.msra.mxu2 %v1484_v5  ;;  %1698 = vmatpush.bf16.msra.mxu3 %v1484_v5  ;;  %v1481_v5 = vld [vmem:[%s1812_s23 + $0xf8] sm:$0xff] }
  0x28   : > { %609 = vmatpush.bf16.msra.mxu0 %v1483_v6  ;;  %1699 = vmatpush.bf16.msra.mxu1 %v1483_v6 }
  0x29   : > { %1700 = vmatpush.bf16.msra.mxu2 %v1483_v6  ;;  %1701 = vmatpush.bf16.msra.mxu3 %v1483_v6 }
  0x2c   : > { %610 = vmatpush.bf16.msra.mxu0 %v1482_v7  ;;  %1702 = vmatpush.bf16.msra.mxu1 %v1482_v7 }
  0x2d   : > { %1703 = vmatpush.bf16.msra.mxu2 %v1482_v7  ;;  %1704 = vmatpush.bf16.msra.mxu3 %v1482_v7 }
  0x2f   : > { %611 = vmatmul.bf16.vlgmr.msra.gmra.mxu0 %v1450_v8  ;;  %651 = vmatmul.bf16.vlgmr.msra.gmra.mxu1 %v1458_v9 }
  0x30   : > { %691 = vmatmul.bf16.vlgmr.msra.gmra.mxu2 %v1466_v12  ;;  %731 = vmatmul.bf16.vlgmr.msra.gmra.mxu3 %v1474_v19 }
  0x3f   : > { %616 = vmatmul.bf16.gmra.mxu0 %v1451_v10  ;;  %656 = vmatmul.bf16.gmra.mxu1 %v1459_v11 }
  0x40   : > { %696 = vmatmul.bf16.gmra.mxu2 %v1467_v15  ;;  %736 = vmatmul.bf16.gmra.mxu3 %v1475_v23 }
  0x4f   : > { %621 = vmatmul.bf16.gmra.mxu0 %v1452_v13  ;;  %661 = vmatmul.bf16.gmra.mxu1 %v1460_v14 }
  0x50   : > { %701 = vmatmul.bf16.gmra.mxu2 %v1468_v18  ;;  %741 = vmatmul.bf16.gmra.mxu3 %v1476_v27 }
  0x5f   : > { %626 = vmatmul.bf16.gmra.mxu0 %v1453_v16  ;;  %666 = vmatmul.bf16.gmra.mxu1 %v1461_v17 }
  0x60   : > { %706 = vmatmul.bf16.gmra.mxu2 %v1469_v22  ;;  %746 = vmatmul.bf16.gmra.mxu3 %v1477_v31 }
  0x6f   : > { %631 = vmatmul.bf16.gmra.mxu0 %v1454_v20  ;;  %671 = vmatmul.bf16.gmra.mxu1 %v1462_v21 }
  0x70   : > { %711 = vmatmul.bf16.gmra.mxu2 %v1470_v26  ;;  %751 = vmatmul.bf16.gmra.mxu3 %v1478_v35 }
  0x7f   : > { %636 = vmatmul.bf16.gmra.mxu0 %v1455_v24  ;;  %676 = vmatmul.bf16.gmra.mxu1 %v1463_v25 }
  0x80   : > { %716 = vmatmul.bf16.gmra.mxu2 %v1471_v30  ;;  %756 = vmatmul.bf16.gmra.mxu3 %v1479_v39 }
  0x8f   : > { %641 = vmatmul.bf16.gmra.mxu0 %v1456_v28  ;;  %681 = vmatmul.bf16.gmra.mxu1 %v1464_v29 }
  0x90   : > { %721 = vmatmul.bf16.gmra.mxu2 %v1472_v34  ;;  %761 = vmatmul.bf16.gmra.mxu3 %v1480_v53 }
  0x9f   : > { %646 = vmatmul.bf16.gmra.mxu0 %v1457_v32  ;;  %686 = vmatmul.bf16.gmra.mxu1 %v1465_v33 }
  0xa0   : > { %726 = vmatmul.bf16.gmra.mxu2 %v1473_v38  ;;  %766 = vmatmul.bf16.gmra.mxu3 %v1481_v5 }
  0xac   : > { %v612_v36 = vpop.f32.mrf.mxu0  ;;  %v1843_v37 = vpop.f32.mrf.mxu1 }
  0xad   : > { %v842_v42 = vmul.f32 %v612_v36, %v612_v36 }
  0xb3   : > { %v1865_v59 = vpop.f32.mrf.mxu2  ;;  %v1902_v19 = vpop.f32.mrf.mxu3 }
  0xb4   : > { %v614_v40 = vpop.f32.mrf.mxu0  ;;  %v1854_v41 = vpop.f32.mrf.mxu1 }
  0xb5   : > { %v772_v43 = vadd.f32 %v614_v40, %v612_v36  ;;  %v843_v44 = vmul.f32 %v614_v40, %v614_v40  ;;  %v1493_v45 = vpack.c.bf16 %v614_v40, %v612_v36  ;;  %v1533_v46 = vpack.c.bf16 %v1854_v41, %v1843_v37 }
  0xb7   : > { %v906_v47 = vadd.f32 %v843_v44, %v842_v42  ;;  %1494 = vst [vmem:[%s1852_s26] sm:$0xff] %v1493_v45  }
  0xb8   : > { %1657 = vst [vmem:[%s1852_s26 + $0x40] sm:$0xff] %v1533_v46  }
  0xbb   : > { %v1875_v2 = vpop.f32.mrf.mxu2  ;;  %v1912_v24 = vpop.f32.mrf.mxu3 }
  0xbc   : > { %v617_v48 = vpop.f32.mrf.mxu0  ;;  %v1860_v49 = vpop.f32.mrf.mxu1  ;;  %v1573_v3 = vpack.c.bf16 %v1875_v2, %v1865_v59  ;;  %v1613_v26 = vpack.c.bf16 %v1912_v24, %v1902_v19 }
  0xbd   : > { %v773_v50 = vadd.f32 %v772_v43, %v617_v48  ;;  %v844_v51 = vmul.f32 %v617_v48, %v617_v48 }
  0xbe   : > { %1665 = vst [vmem:[%s1852_s26 + $0x80] sm:$0xff] %v1573_v3  }
  0xbf   : > { %v907_v52 = vadd.f32 %v906_v47, %v844_v51  ;;  %1673 = vst [vmem:[%s1852_s26 + $0xc0] sm:$0xff] %v1613_v26  }
  0xc3   : > { %v1885_v9 = vpop.f32.mrf.mxu2  ;;  %v1924_v31 = vpop.f32.mrf.mxu3 }
  0xc4   : > { %v619_v54 = vpop.f32.mrf.mxu0  ;;  %v1863_v55 = vpop.f32.mrf.mxu1 }
  0xc5   : > { %v774_v56 = vadd.f32 %v773_v50, %v619_v54  ;;  %v845_v57 = vmul.f32 %v619_v54, %v619_v54  ;;  %v1498_v58 = vpack.c.bf16 %v619_v54, %v617_v48  ;;  %v1538_v60 = vpack.c.bf16 %v1863_v55, %v1860_v49 }
  0xc7   : > { %v908_v61 = vadd.f32 %v907_v52, %v845_v57  ;;  %1650 = vst [vmem:[%s1852_s26 + $0x8] sm:$0xff] %v1498_v58  }
  0xc8   : > { %1658 = vst [vmem:[%s1852_s26 + $0x48] sm:$0xff] %v1538_v60  }
  0xcb   : > { %v1893_v13 = vpop.f32.mrf.mxu2  ;;  %v1934_v36 = vpop.f32.mrf.mxu3 }
  0xcc   : > { %v622_v62 = vpop.f32.mrf.mxu0  ;;  %v1871_v63 = vpop.f32.mrf.mxu1  ;;  %v1578_v14 = vpack.c.bf16 %v1893_v13, %v1885_v9  ;;  %v1618_v39 = vpack.c.bf16 %v1934_v36, %v1924_v31 }
  0xcd   : > { %v1873_v0 = vadd.f32 %v774_v56, %v622_v62  ;;  %v846_v1 = vmul.f32 %v622_v62, %v622_v62 }
  0xce   : > { %1666 = vst [vmem:[%s1852_s26 + $0x88] sm:$0xff] %v1578_v14  }
  0xcf   : > { %v1879_v4 = vadd.f32 %v908_v61, %v846_v1  ;;  %1674 = vst [vmem:[%s1852_s26 + $0xc8] sm:$0xff] %v1618_v39  }
  0xd3   : > { %v1900_v18 = vpop.f32.mrf.mxu2  ;;  %v1946_v45 = vpop.f32.mrf.mxu3 }
  0xd4   : > { %v624_v6 = vpop.f32.mrf.mxu0  ;;  %v1883_v7 = vpop.f32.mrf.mxu1 }
  0xd5   : > { %v1503_v8 = vpack.c.bf16 %v624_v6, %v622_v62  ;;  %v1543_v10 = vpack.c.bf16 %v1883_v7, %v1871_v63  ;;  %v847_v53 = vmul.f32 %v624_v6, %v624_v6  ;;  %v776_v56 = vadd.f32 %v1873_v0, %v624_v6 }
  0xd7   : > { %1651 = vst [vmem:[%s1852_s26 + $0x10] sm:$0xff] %v1503_v8   ;;  %v910_v58 = vadd.f32 %v1879_v4, %v847_v53 }
  0xd8   : > { %1659 = vst [vmem:[%s1852_s26 + $0x50] sm:$0xff] %v1543_v10  }
  0xdb   : > { %v1910_v23 = vpop.f32.mrf.mxu2  ;;  %v1956_v51 = vpop.f32.mrf.mxu3 }
  0xdc   : > { %v627_v11 = vpop.f32.mrf.mxu0  ;;  %v1891_v12 = vpop.f32.mrf.mxu1  ;;  %v1583_v25 = vpack.c.bf16 %v1910_v23, %v1900_v18  ;;  %v1623_v54 = vpack.c.bf16 %v1956_v51, %v1946_v45 }
  0xdd   : > { %v848_v57 = vmul.f32 %v627_v11, %v627_v11  ;;  %v777_v60 = vadd.f32 %v776_v56, %v627_v11 }
  0xde   : > { %1667 = vst [vmem:[%s1852_s26 + $0x90] sm:$0xff] %v1583_v25  }
  0xdf   : > { %1675 = vst [vmem:[%s1852_s26 + $0xd0] sm:$0xff] %v1623_v54   ;;  %v911_v3 = vadd.f32 %v910_v58, %v848_v57 }
  0xe3   : > { %v1922_v30 = vpop.f32.mrf.mxu2 }
  0xe4   : > { %v629_v15 = vpop.f32.mrf.mxu0  ;;  %v1898_v16 = vpop.f32.mrf.mxu1 }
  0xe5   : > { %v1508_v17 = vpack.c.bf16 %v629_v15, %v627_v11  ;;  %v1548_v20 = vpack.c.bf16 %v1898_v16, %v1891_v12  ;;  %v849_v61 = vmul.f32 %v629_v15, %v629_v15  ;;  %v778_v5 = vadd.f32 %v777_v60, %v629_v15 }
  0xe7   : > { %1652 = vst [vmem:[%s1852_s26 + $0x18] sm:$0xff] %v1508_v17   ;;  %v1970_v17 = vpop.f32.mrf.mxu3  ;;  %v912_v6 = vadd.f32 %v911_v3, %v849_v61 }
  0xe8   : > { %1660 = vst [vmem:[%s1852_s26 + $0x58] sm:$0xff] %v1548_v20  }
  0xeb   : > { %v1932_v35 = vpop.f32.mrf.mxu2 }
  0xec   : > { %v632_v21 = vpop.f32.mrf.mxu0  ;;  %v1908_v22 = vpop.f32.mrf.mxu1  ;;  %v1588_v38 = vpack.c.bf16 %v1932_v35, %v1922_v30 }
  0xed   : > { %v850_v8 = vmul.f32 %v632_v21, %v632_v21  ;;  %v779_v20 = vadd.f32 %v778_v5, %v632_v21 }
  0xee   : > { %1668 = vst [vmem:[%s1852_s26 + $0x98] sm:$0xff] %v1588_v38  }
  0xef   : > { %v913_v11 = vadd.f32 %v912_v6, %v850_v8 }
  0xf3   : > { %v1944_v44 = vpop.f32.mrf.mxu2 }
  0xf4   : > { %v634_v27 = vpop.f32.mrf.mxu0  ;;  %v1920_v28 = vpop.f32.mrf.mxu1 }
  0xf5   : > { %v1513_v29 = vpack.c.bf16 %v634_v27, %v632_v21  ;;  %v1553_v32 = vpack.c.bf16 %v1920_v28, %v1908_v22  ;;  %v851_v4 = vmul.f32 %v634_v27, %v634_v27  ;;  %v780_v25 = vadd.f32 %v779_v20, %v634_v27  ;;  %v1980_v21 = vpop.f32.mrf.mxu3 }
  0xf7   : > { %1653 = vst [vmem:[%s1852_s26 + $0x20] sm:$0xff] %v1513_v29   ;;  %v914_v29 = vadd.f32 %v913_v11, %v851_v4  ;;  %v858_v11 = vmul.f32 %v1843_v37, %v1843_v37 }
  0xf8   : > { %1661 = vst [vmem:[%s1852_s26 + $0x60] sm:$0xff] %v1553_v32  }
  0xfb   : > { %v1954_v50 = vpop.f32.mrf.mxu2 }
  0xfc   : > { %v637_v33 = vpop.f32.mrf.mxu0  ;;  %v1930_v34 = vpop.f32.mrf.mxu1  ;;  %v1593_v52 = vpack.c.bf16 %v1954_v50, %v1944_v44 }
  0xfd   : > { %v852_v26 = vmul.f32 %v637_v33, %v637_v33  ;;  %v781_v15 = vadd.f32 %v780_v25, %v637_v33  ;;  %v1992_v4 = vpop.f32.mrf.mxu3 }
  0xfe   : > { %1669 = vst [vmem:[%s1852_s26 + $0xa0] sm:$0xff] %v1593_v52  }
 0x103   : > { %v1968_v14 = vpop.f32.mrf.mxu2 }
 0x104   : > { %v639_v40 = vpop.f32.mrf.mxu0  ;;  %v1942_v42 = vpop.f32.mrf.mxu1 }
 0x105   : > { %v1518_v43 = vpack.c.bf16 %v639_v40, %v637_v33  ;;  %v1558_v46 = vpack.c.bf16 %v1942_v42, %v1930_v34  ;;  %v853_v32 = vmul.f32 %v639_v40, %v639_v40  ;;  %v1628_v33 = vpack.c.bf16 %v1980_v21, %v1970_v17 }
 0x107   : > { %1654 = vst [vmem:[%s1852_s26 + $0x28] sm:$0xff] %v1518_v43   ;;  %v915_v43 = vadd.f32 %v914_v29, %v852_v26  ;;  %v859_v29 = vmul.f32 %v1854_v41, %v1854_v41 }
 0x108   : > { %1662 = vst [vmem:[%s1852_s26 + $0x68] sm:$0xff] %v1558_v46   ;;  %v782_v46 = vadd.f32 %v781_v15, %v639_v40 }
 0x109   : > { %v916_v27 = vadd.f32 %v915_v43, %v853_v32  ;;  %1676 = vst [vmem:[%s1852_s26 + $0xd8] sm:$0xff] %v1628_v33  }
 0x10b   : > { %v1978_v53 = vpop.f32.mrf.mxu2 }
 0x10c   : > { %v642_v47 = vpop.f32.mrf.mxu0  ;;  %v1952_v48 = vpop.f32.mrf.mxu1  ;;  %v1598_v54 = vpack.c.bf16 %v1978_v53, %v1968_v14 }
 0x10d   : > { %v854_v52 = vmul.f32 %v642_v47, %v642_v47  ;;  %v783_v56 = vadd.f32 %v782_v46, %v642_v47 }
 0x10e   : > { %1670 = vst [vmem:[%s1852_s26 + $0xa8] sm:$0xff] %v1598_v54  }
 0x10f   : > { %v917_v58 = vadd.f32 %v916_v27, %v854_v52 }
 0x113   : > { %v1990_v20 = vpop.f32.mrf.mxu2 }
 0x114   : > { %v644_v62 = vpop.f32.mrf.mxu0  ;;  %v1966_v1 = vpop.f32.mrf.mxu1 }
 0x115   : > { %v1523_v10 = vpack.c.bf16 %v644_v62, %v642_v47  ;;  %v1563_v0 = vpack.c.bf16 %v1966_v1, %v1952_v48  ;;  %v855_v57 = vmul.f32 %v644_v62, %v644_v62  ;;  %v784_v60 = vadd.f32 %v783_v56, %v644_v62  ;;  %v2012_v56 = vpop.f32.mrf.mxu3 }
 0x117   : > { %1655 = vst [vmem:[%s1852_s26 + $0x30] sm:$0xff] %v1523_v10   ;;  %v918_v40 = vadd.f32 %v917_v58, %v855_v57  ;;  %v1633_v57 = vpack.c.bf16 %v2012_v56, %v1992_v4 }
 0x118   : > { %1663 = vst [vmem:[%s1852_s26 + $0x70] sm:$0xff] %v1563_v0  }
 0x119   : > { %1677 = vst [vmem:[%s1852_s26 + $0xe0] sm:$0xff] %v1633_v57   ;;  %v871_v57 = vmul.f32 %v1966_v1, %v1966_v1 }
 0x11b   : > { %v2010_v27 = vpop.f32.mrf.mxu2 }
 0x11c   : > { %v647_v38 = vpop.f32.mrf.mxu0  ;;  %v1976_v39 = vpop.f32.mrf.mxu1 }
 0x11d   : > { %v856_v61 = vmul.f32 %v647_v38, %v647_v38  ;;  %v785_v3 = vadd.f32 %v784_v60, %v647_v38 }
 0x11f   : > { %v919_v10 = vadd.f32 %v918_v40, %v856_v61  ;;  %v864_v40 = vmul.f32 %v1891_v12, %v1891_v12 }
 0x124   : > { %v649_v5 = vpop.f32.mrf.mxu0  ;;  %v1988_v8 = vpop.f32.mrf.mxu1 }
 0x125   : > { %v786_v0 = vadd.f32 %v785_v3, %v649_v5  ;;  %v857_v6 = vmul.f32 %v649_v5, %v649_v5  ;;  %v1528_v47 = vpack.c.bf16 %v649_v5, %v647_v38  ;;  %v1568_v62 = vpack.c.bf16 %v1988_v8, %v1976_v39 }
 0x126   : > { %v860_v38 = vmul.f32 %v1860_v49, %v1860_v49 }
 0x127   : > { %v787_v25 = vadd.f32 %v786_v0, %v1843_v37  ;;  %v920_v26 = vadd.f32 %v919_v10, %v857_v6  ;;  %1656 = vst [vmem:[%s1852_s26 + $0x38] sm:$0xff] %v1528_v47   ;;  %v861_v37 = vmul.f32 %v1863_v55, %v1863_v55  ;;  %v865_v10 = vmul.f32 %v1898_v16, %v1898_v16  ;;  %v2032_v6 = vpop.f32.mrf.mxu2  ;;  %v2034_v47 = vpop.f32.mrf.mxu3 }
 0x128   : > { %1664 = vst [vmem:[%s1852_s26 + $0x78] sm:$0xff] %v1568_v62  }
 0x129   : > { %v788_v15 = vadd.f32 %v787_v25, %v1854_v41  ;;  %v921_v32 = vadd.f32 %v920_v26, %v858_v11  ;;  %v1603_v41 = vpack.c.bf16 %v2010_v27, %v1990_v20  ;;  %v867_v25 = vmul.f32 %v1920_v28, %v1920_v28 }
 0x12b   : > { %v789_v43 = vadd.f32 %v788_v15, %v1860_v49  ;;  %v922_v46 = vadd.f32 %v921_v32, %v859_v29  ;;  %v862_v49 = vmul.f32 %v1871_v63, %v1871_v63  ;;  %1671 = vst [vmem:[%s1852_s26 + $0xb0] sm:$0xff] %v1603_v41   ;;  %v869_v32 = vmul.f32 %v1942_v42, %v1942_v42 }
 0x12d   : > { %v790_v52 = vadd.f32 %v789_v43, %v1863_v55  ;;  %v923_v54 = vadd.f32 %v922_v46, %v860_v38  ;;  %v863_v55 = vmul.f32 %v1883_v7, %v1883_v7 }
 0x12f   : > { %v791_v33 = vadd.f32 %v790_v52, %v1871_v63  ;;  %v924_v58 = vadd.f32 %v923_v54, %v861_v37  ;;  %v2048_v43 = vpop.f32.mrf.mxu2  ;;  %v2050_v46 = vpop.f32.mrf.mxu3  ;;  %v870_v52 = vmul.f32 %v1952_v48, %v1952_v48 }
 0x130   : > { %v1638_v37 = vpack.c.bf16 %v2050_v46, %v2034_v47 }
 0x131   : > { %v792_v60 = vadd.f32 %v791_v33, %v1883_v7  ;;  %v925_v61 = vadd.f32 %v924_v58, %v862_v49  ;;  %v866_v7 = vmul.f32 %v1908_v22, %v1908_v22  ;;  %v872_v58 = vmul.f32 %v1976_v39, %v1976_v39 }
 0x132   : > { %1678 = vst [vmem:[%s1852_s26 + $0xe8] sm:$0xff] %v1638_v37   ;;  %v882_v37 = vmul.f32 %v1944_v44, %v1944_v44 }
 0x133   : > { %v926_v3 = vadd.f32 %v925_v61, %v863_v55  ;;  %v793_v5 = vadd.f32 %v792_v60, %v1891_v12 }
 0x135   : > { %v794_v63 = vadd.f32 %v793_v5, %v1898_v16  ;;  %v927_v0 = vadd.f32 %v926_v3, %v864_v40  ;;  %v868_v16 = vmul.f32 %v1930_v34, %v1930_v34  ;;  %v874_v40 = vmul.f32 %v1865_v59, %v1865_v59 }
 0x136   : > { %v875_v5 = vmul.f32 %v1875_v2, %v1875_v2 }
 0x137   : > { %v795_v62 = vadd.f32 %v794_v63, %v1908_v22  ;;  %v928_v11 = vadd.f32 %v927_v0, %v865_v10  ;;  %v2070_v61 = vpop.f32.mrf.mxu3  ;;  %v876_v63 = vmul.f32 %v1885_v9, %v1885_v9 }
 0x139   : > { %v796_v12 = vadd.f32 %v795_v62, %v1920_v28  ;;  %v929_v26 = vadd.f32 %v928_v11, %v866_v7  ;;  %v1608_v28 = vpack.c.bf16 %v2048_v43, %v2032_v6  ;;  %v877_v7 = vmul.f32 %v1893_v13, %v1893_v13 }
 0x13b   : > { %v797_v29 = vadd.f32 %v796_v12, %v1930_v34  ;;  %v930_v15 = vadd.f32 %v929_v26, %v867_v25  ;;  %1672 = vst [vmem:[%s1852_s26 + $0xb8] sm:$0xff] %v1608_v28  }
 0x13d   : > { %v798_v22 = vadd.f32 %v797_v29, %v1942_v42  ;;  %v931_v38 = vadd.f32 %v930_v15, %v868_v16 }
 0x13f   : > { %v799_v34 = vadd.f32 %v798_v22, %v1952_v48  ;;  %v932_v54 = vadd.f32 %v931_v38, %v869_v32  ;;  %v873_v48 = vmul.f32 %v1988_v8, %v1988_v8  ;;  %v2084_v11 = vpop.f32.mrf.mxu3  ;;  %v881_v22 = vmul.f32 %v1932_v35, %v1932_v35 }
 0x140   : > { %v1643_v25 = vpack.c.bf16 %v2084_v11, %v2070_v61 }
 0x141   : > { %v933_v41 = vadd.f32 %v932_v54, %v870_v52  ;;  %v800_v42 = vadd.f32 %v799_v34, %v1966_v1  ;;  %v883_v52 = vmul.f32 %v1954_v50, %v1954_v50 }
 0x142   : > { %1679 = vst [vmem:[%s1852_s26 + $0xf0] sm:$0xff] %v1643_v25  }
 0x143   : > { %v934_v49 = vadd.f32 %v933_v41, %v871_v57  ;;  %v801_v33 = vadd.f32 %v800_v42, %v1976_v39  ;;  %v884_v41 = vmul.f32 %v1968_v14, %v1968_v14 }
 0x145   : > { %v935_v55 = vadd.f32 %v934_v49, %v872_v58  ;;  %v802_v60 = vadd.f32 %v801_v33, %v1988_v8  ;;  %v885_v49 = vmul.f32 %v1978_v53, %v1978_v53 }
 0x147   : > { %v803_v1 = vadd.f32 %v802_v60, %v1865_v59  ;;  %v936_v3 = vadd.f32 %v935_v55, %v873_v48  ;;  %v2101_v28 = vpop.f32.mrf.mxu3 }
 0x149   : > { %v804_v39 = vadd.f32 %v803_v1, %v1875_v2  ;;  %v937_v10 = vadd.f32 %v936_v3, %v874_v40  ;;  %v878_v2 = vmul.f32 %v1900_v18, %v1900_v18  ;;  %v887_v40 = vmul.f32 %v2010_v27, %v2010_v27 }
 0x14a   : > { %v888_v3 = vmul.f32 %v2032_v6, %v2032_v6 }
 0x14b   : > { %v805_v8 = vadd.f32 %v804_v39, %v1885_v9  ;;  %v938_v0 = vadd.f32 %v937_v10, %v875_v5  ;;  %v879_v9 = vmul.f32 %v1910_v23, %v1910_v23  ;;  %v889_v10 = vmul.f32 %v2048_v43, %v2048_v43 }
 0x14d   : > { %v806_v62 = vadd.f32 %v805_v8, %v1893_v13  ;;  %v939_v59 = vadd.f32 %v938_v0, %v876_v63  ;;  %v880_v13 = vmul.f32 %v1922_v30, %v1922_v30 }
 0x14f   : > { %v807_v12 = vadd.f32 %v806_v62, %v1900_v18  ;;  %v940_v26 = vadd.f32 %v939_v59, %v877_v7  ;;  %v769_v33 = vpop.f32.mrf.mxu3 }
 0x150   : > { %v1648_v58 = vpack.c.bf16 %v769_v33, %v2101_v28 }
 0x151   : > { %v808_v16 = vadd.f32 %v807_v12, %v1910_v23  ;;  %v941_v29 = vadd.f32 %v940_v26, %v878_v2 }
 0x152   : > { %1680 = vst [vmem:[%s1852_s26 + $0xf8] sm:$0xff] %v1648_v58   ;;  %v905_v58 = vmul.f32 %v769_v33, %v769_v33 }
 0x153   : > { %v942_v15 = vadd.f32 %v941_v29, %v879_v9  ;;  %v809_v32 = vadd.f32 %v808_v16, %v1922_v30 }
 0x155   : > { %v810_v38 = vadd.f32 %v809_v32, %v1932_v35  ;;  %v943_v18 = vadd.f32 %v942_v15, %v880_v13 }
 0x157   : > { %v811_v23 = vadd.f32 %v810_v38, %v1944_v44  ;;  %v944_v34 = vadd.f32 %v943_v18, %v881_v22 }
 0x159   : > { %v812_v30 = vadd.f32 %v811_v23, %v1954_v50  ;;  %v945_v54 = vadd.f32 %v944_v34, %v882_v37  ;;  %v886_v50 = vmul.f32 %v1990_v20, %v1990_v20 }
 0x15b   : > { %v813_v35 = vadd.f32 %v812_v30, %v1968_v14  ;;  %v946_v42 = vadd.f32 %v945_v54, %v883_v52  ;;  %v901_v52 = vmul.f32 %v2050_v46, %v2050_v46 }
 0x15d   : > { %v814_v57 = vadd.f32 %v813_v35, %v1978_v53  ;;  %v947_v44 = vadd.f32 %v946_v42, %v884_v41  ;;  %v902_v41 = vmul.f32 %v2070_v61, %v2070_v61 }
 0x15f   : > { %v948_v55 = vadd.f32 %v947_v44, %v885_v49  ;;  %v815_v60 = vadd.f32 %v814_v57, %v1990_v20  ;;  %v890_v20 = vmul.f32 %v1902_v19, %v1902_v19 }
 0x161   : > { %v949_v48 = vadd.f32 %v948_v55, %v886_v50  ;;  %v816_v14 = vadd.f32 %v815_v60, %v2010_v27  ;;  %v891_v27 = vmul.f32 %v1912_v24, %v1912_v24 }
 0x163   : > { %v950_v1 = vadd.f32 %v949_v48, %v887_v40  ;;  %v817_v53 = vadd.f32 %v816_v14, %v2032_v6  ;;  %v892_v6 = vmul.f32 %v1924_v31, %v1924_v31 }
 0x165   : > { %v951_v5 = vadd.f32 %v950_v1, %v888_v3  ;;  %v818_v39 = vadd.f32 %v817_v53, %v2048_v43  ;;  %v893_v43 = vmul.f32 %v1934_v36, %v1934_v36 }
 0x167   : > { %v819_v63 = vadd.f32 %v818_v39, %v1902_v19  ;;  %v952_v8 = vadd.f32 %v951_v5, %v889_v10  ;;  %v894_v19 = vmul.f32 %v1946_v45, %v1946_v45 }
 0x169   : > { %v820_v0 = vadd.f32 %v819_v63, %v1912_v24  ;;  %v953_v7 = vadd.f32 %v952_v8, %v890_v20  ;;  %v895_v24 = vmul.f32 %v1956_v51, %v1956_v51 }
 0x16b   : > { %v821_v62 = vadd.f32 %v820_v0, %v1924_v31  ;;  %v954_v59 = vadd.f32 %v953_v7, %v891_v27  ;;  %v896_v31 = vmul.f32 %v1970_v17, %v1970_v17 }
 0x16d   : > { %v822_v25 = vadd.f32 %v821_v62, %v1934_v36  ;;  %v955_v2 = vadd.f32 %v954_v59, %v892_v6  ;;  %v897_v36 = vmul.f32 %v1980_v21, %v1980_v21 }
 0x16f   : > { %v823_v12 = vadd.f32 %v822_v25, %v1946_v45  ;;  %v956_v26 = vadd.f32 %v955_v2, %v893_v43  ;;  %v898_v45 = vmul.f32 %v1992_v4, %v1992_v4 }
 0x171   : > { %v824_v9 = vadd.f32 %v823_v12, %v1956_v51  ;;  %v957_v16 = vadd.f32 %v956_v26, %v894_v19  ;;  %v899_v51 = vmul.f32 %v2012_v56, %v2012_v56 }
 0x173   : > { %v958_v29 = vadd.f32 %v957_v16, %v895_v24  ;;  %v825_v13 = vadd.f32 %v824_v9, %v1970_v17  ;;  %v900_v17 = vmul.f32 %v2034_v47, %v2034_v47 }
 0x175   : > { %v826_v15 = vadd.f32 %v825_v13, %v1980_v21  ;;  %v959_v32 = vadd.f32 %v958_v29, %v896_v31 }
 0x177   : > { %v827_v22 = vadd.f32 %v826_v15, %v1992_v4  ;;  %v960_v38 = vadd.f32 %v959_v32, %v897_v36 }
 0x179   : > { %v828_v18 = vadd.f32 %v827_v22, %v2012_v56  ;;  %v961_v37 = vadd.f32 %v960_v38, %v898_v45 }
 0x17b   : > { %v829_v23 = vadd.f32 %v828_v18, %v2034_v47  ;;  %v962_v34 = vadd.f32 %v961_v37, %v899_v51  ;;  %v903_v47 = vmul.f32 %v2084_v11, %v2084_v11 }
 0x17d   : > { %v830_v21 = vadd.f32 %v829_v23, %v2050_v46  ;;  %v963_v30 = vadd.f32 %v962_v34, %v900_v17  ;;  %v904_v46 = vmul.f32 %v2101_v28, %v2101_v28 }
 0x17f   : > { %v964_v4 = vadd.f32 %v963_v30, %v901_v52  ;;  %v831_v54 = vadd.f32 %v830_v21, %v2070_v61 }
 0x181   : > { %v965_v56 = vadd.f32 %v964_v4, %v902_v41  ;;  %v832_v35 = vadd.f32 %v831_v54, %v2084_v11 }
 0x183   : > { %v966_v42 = vadd.f32 %v965_v56, %v903_v47  ;;  %v833_v57 = vadd.f32 %v832_v35, %v2101_v28 }
 0x185   : > { %v967_v49 = vadd.f32 %v966_v42, %v904_v46  ;;  %v834_v44 = vadd.f32 %v833_v57, %v769_v33 }
 0x187   : > { %v835_v55 = vrot.slane %v834_v44, 4  ;;  %v968_v60 = vadd.f32 %v967_v49, %v905_v58 }
 0x189   : > { %v836_v50 = vadd.f32 %v835_v55, %v834_v44  ;;  %v969_v61 = vrot.slane %v968_v60, 4 }
 0x18b   : > { %v837_v48 = vrot.slane %v836_v50, 2  ;;  %v970_v14 = vadd.f32 %v969_v61, %v968_v60 }
 0x18d   : > { %v838_v40 = vadd.f32 %v837_v48, %v836_v50  ;;  %v971_v1 = vrot.slane %v970_v14, 2 }
 0x18f   : > { %v839_v53 = vrot.slane %v838_v40, 1  ;;  %v972_v11 = vadd.f32 %v971_v1, %v970_v14 }
 0x191   : > { %v840_v3 = vadd.f32 %v839_v53, %v838_v40  ;;  %v973_v28 = vrot.slane %v972_v11, 1 }
 0x193   : > { %841 = vst [vmem:[%s282_s30] sm:$0x1] %v840_v3  ;;  %v974_v5 = vadd.f32 %v973_v28, %v972_v11 }
 0x195   : > { %975 = vst [vmem:[%s282_s30 + $0x1] sm:$0x1] %v974_v5 }
 0x196 PF: > { %s14_s14 = sadd.s32 1, %s1751_s14   ;;  %s2191_s12 = smov %s1747_s13 }
 0x197   : > { %p11_p5 = scmp.ge.s32.totalorder %s14_s14, 6   ;;  %s2192_s13 = smov %s2194_s15 }
 0x199   :  { %13 = sbr.rel (!%p11_p5) target bundleno = 2 (0x2), region = 73 }

// kernel: generator_forward.9
= control target key start
LH: loop header
LB: loop body
LE: loop exit
PB: predicated region body
PF: predicated region fallthrough
CT: control target
= control target key end

     0   :  { %s2773_s9 = smov 0   ;;  %s2775_s10 = smov 0   ;;  %s2983_s0 = inlined_call_operand.vmem [shape: bf16[4,2048,128], index: 0, kind: input, shape index: {}]   ;;  %s2984_s1 = inlined_call_operand.vmem [shape: bf16[4,128,128], index: 1, kind: input, shape index: {}]   ;;  %s2985_s2 = inlined_call_operand.vmem [shape: bf16[4,2048,128], index: 2, kind: output, shape index: {}]  }
   0x1   :  { %s2777_s11 = smov 0   ;;  %s2779_s12 = smov 0  }
   0x2   :  { %s2781_s13 = smov 0  }
   0x3 LB: > { %s27_s14 = sadd.s32 1, %s2748_s11  ;;  %s31_s15 = sadd.s32 1, %s2752_s12  ;;  %s2756_s13 = sphi %s2781_s13, %s12_s13   ;;  %s2752_s12 = sphi %s2779_s12, %s2989_s12   ;;  %s2748_s11 = sphi %s2777_s11, %s2988_s11   ;;  %s2744_s10 = sphi %s2775_s10, %s2987_s10   ;;  %s2740_s9 = sphi %s2773_s9, %s2986_s9  }
   0x4   : > { %p29_p0 = scmp.ge.s32.totalorder %s27_s14, 2  ;;  %p1643_p1 = scmp.ge.s32.totalorder %s2756_s13, 1 }
   0x5   : > { %p157_p2 = scmp.lt.s32.totalorder %s2756_s13, 9 }
   0x6   : > { %s2991_s14 = smov (%p29_p0, %s27_s14), 0  ;;  %s2993_s15 = smov (!%p29_p0, %s31_s15), %s2752_s12 }
   0x7   : > { %p158_p3 = pnand %p1643_p1, %p157_p2  ;;  %p33_p4 = scmp.ge.s32.totalorder %s2993_s15, 4 }
   0x8   : > { %p199_p5 = scmp.lt.s32.totalorder (!%p158_p3), %s2744_s10, 3  ;;  %s1644_s20 = sshll.u32 (!%p158_p3), %s2740_s9, 7 }
   0x9   : > { %s2995_s15 = smov (%p33_p4, %s2993_s15), 0  ;;  %161 = sbr.rel (%p158_p3) target bundleno = 441 (0x1b9), region = 28 }
   0xa   : > { %p201_p6 = scmp.lt.s32.totalorder (!%p158_p3), %s1644_s20, 255 }
   0xe   : > { %s2997_s10 = smov (!%p199_p5, %s2744_s10), 3  ;;  %s2999_s20 = smov (!%p201_p6, %s1644_s20), 255 }
   0xf   : > { %s1942_s16 = sshll.u32 %s2997_s10, 6  ;;  %s1645_s21 = sshll.u32 %s2997_s10, 8 }
  0x10   : > { %s2811_s19 = scalar_lea.vmem %s2984_s1, %s1942_s16  ;;  %s2821_s22 = sadd.s32 %s1645_s21, %s2999_s20 }
  0x11   : > { %v2014_v0 = vld [vmem:[%s2811_s19 + $0x38] sm:$0xff]  ;;  %v2013_v1 = vld [vmem:[%s2811_s19 + $0x30] sm:$0xff]  ;;  %v2012_v2 = vld [vmem:[%s2811_s19 + $0x28] sm:$0xff]  ;;  %s1646_s23 = sshll.u32 %s2821_s22, 2 }
  0x12   : > { %805 = vmatpush.bf16.msra.mxu0 %v2014_v0  ;;  %2398 = vmatpush.bf16.msra.mxu1 %v2014_v0  ;;  %v2011_v3 = vld [vmem:[%s2811_s19 + $0x20] sm:$0xff]  ;;  %v2010_v4 = vld [vmem:[%s2811_s19 + $0x18] sm:$0xff]  ;;  %v2009_v5 = vld [vmem:[%s2811_s19 + $0x10] sm:$0xff]  ;;  %s2830_s26 = scalar_lea.vmem %s2983_s0, %s1646_s23  ;;  %s2876_s29 = scalar_lea.vmem %s2985_s2, %s1646_s23 }
  0x13   : > { %2399 = vmatpush.bf16.msra.mxu2 %v2014_v0  ;;  %2400 = vmatpush.bf16.msra.mxu3 %v2014_v0  ;;  %v2008_v6 = vld [vmem:[%s2811_s19 + $0x8] sm:$0xff]  ;;  %v2007_v7 = vld [vmem:[%s2811_s19] sm:$0xff]  ;;  %v1945_v16 = vld [vmem:[%s2830_s26 + $0x10] sm:$0xff] }
  0x14   : > { %v1943_v8 = vld [vmem:[%s2830_s26] sm:$0xff]  ;;  %v1944_v12 = vld [vmem:[%s2830_s26 + $0x8] sm:$0xff]  ;;  %v1961_v17 = vld [vmem:[%s2830_s26 + $0x90] sm:$0xff] }
  0x15   : > { %v1959_v9 = vld [vmem:[%s2830_s26 + $0x80] sm:$0xff]  ;;  %v1960_v13 = vld [vmem:[%s2830_s26 + $0x88] sm:$0xff]  ;;  %v1977_v18 = vld [vmem:[%s2830_s26 + $0x110] sm:$0xff] }
  0x16   : > { %806 = vmatpush.bf16.msra.mxu0 %v2013_v1  ;;  %2401 = vmatpush.bf16.msra.mxu1 %v2013_v1  ;;  %v1975_v10 = vld [vmem:[%s2830_s26 + $0x100] sm:$0xff]  ;;  %v1976_v14 = vld [vmem:[%s2830_s26 + $0x108] sm:$0xff]  ;;  %v1993_v19 = vld [vmem:[%s2830_s26 + $0x190] sm:$0xff] }
  0x17   : > { %2402 = vmatpush.bf16.msra.mxu2 %v2013_v1  ;;  %2403 = vmatpush.bf16.msra.mxu3 %v2013_v1  ;;  %v1991_v11 = vld [vmem:[%s2830_s26 + $0x180] sm:$0xff]  ;;  %v1992_v15 = vld [vmem:[%s2830_s26 + $0x188] sm:$0xff]  ;;  %v1946_v20 = vld [vmem:[%s2830_s26 + $0x18] sm:$0xff] }
  0x18   : > { %v1962_v21 = vld [vmem:[%s2830_s26 + $0x98] sm:$0xff]  ;;  %v1947_v24 = vld [vmem:[%s2830_s26 + $0x20] sm:$0xff]  ;;  %v1948_v28 = vld [vmem:[%s2830_s26 + $0x28] sm:$0xff] }
  0x19   : > { %v1978_v22 = vld [vmem:[%s2830_s26 + $0x118] sm:$0xff]  ;;  %v1963_v25 = vld [vmem:[%s2830_s26 + $0xa0] sm:$0xff]  ;;  %v1964_v29 = vld [vmem:[%s2830_s26 + $0xa8] sm:$0xff] }
  0x1a   : > { %807 = vmatpush.bf16.msra.mxu0 %v2012_v2  ;;  %2404 = vmatpush.bf16.msra.mxu1 %v2012_v2  ;;  %v1994_v23 = vld [vmem:[%s2830_s26 + $0x198] sm:$0xff]  ;;  %v1979_v26 = vld [vmem:[%s2830_s26 + $0x120] sm:$0xff]  ;;  %v1980_v30 = vld [vmem:[%s2830_s26 + $0x128] sm:$0xff] }
  0x1b   : > { %2405 = vmatpush.bf16.msra.mxu2 %v2012_v2  ;;  %2406 = vmatpush.bf16.msra.mxu3 %v2012_v2  ;;  %v1995_v27 = vld [vmem:[%s2830_s26 + $0x1a0] sm:$0xff]  ;;  %v1996_v31 = vld [vmem:[%s2830_s26 + $0x1a8] sm:$0xff]  ;;  %v1949_v32 = vld [vmem:[%s2830_s26 + $0x30] sm:$0xff] }
  0x1c   : > { %v1965_v33 = vld [vmem:[%s2830_s26 + $0xb0] sm:$0xff]  ;;  %v1950_v36 = vld [vmem:[%s2830_s26 + $0x38] sm:$0xff]  ;;  %v1951_v40 = vld [vmem:[%s2830_s26 + $0x40] sm:$0xff] }
  0x1d   : > { %v1981_v34 = vld [vmem:[%s2830_s26 + $0x130] sm:$0xff]  ;;  %v1966_v37 = vld [vmem:[%s2830_s26 + $0xb8] sm:$0xff]  ;;  %v1967_v41 = vld [vmem:[%s2830_s26 + $0xc0] sm:$0xff] }
  0x1e   : > { %808 = vmatpush.bf16.msra.mxu0 %v2011_v3  ;;  %2407 = vmatpush.bf16.msra.mxu1 %v2011_v3  ;;  %v1997_v35 = vld [vmem:[%s2830_s26 + $0x1b0] sm:$0xff]  ;;  %v1982_v38 = vld [vmem:[%s2830_s26 + $0x138] sm:$0xff]  ;;  %v1983_v44 = vld [vmem:[%s2830_s26 + $0x140] sm:$0xff] }
  0x1f   : > { %2408 = vmatpush.bf16.msra.mxu2 %v2011_v3  ;;  %2409 = vmatpush.bf16.msra.mxu3 %v2011_v3  ;;  %v1998_v39 = vld [vmem:[%s2830_s26 + $0x1b8] sm:$0xff]  ;;  %v1999_v45 = vld [vmem:[%s2830_s26 + $0x1c0] sm:$0xff]  ;;  %v1952_v54 = vld [vmem:[%s2830_s26 + $0x48] sm:$0xff] }
  0x20   : > { %v1968_v55 = vld [vmem:[%s2830_s26 + $0xc8] sm:$0xff] }
  0x21   : > { %v1984_v59 = vld [vmem:[%s2830_s26 + $0x148] sm:$0xff] }
  0x22   : > { %809 = vmatpush.bf16.msra.mxu0 %v2010_v4  ;;  %2410 = vmatpush.bf16.msra.mxu1 %v2010_v4  ;;  %v2000_v60 = vld [vmem:[%s2830_s26 + $0x1c8] sm:$0xff] }
  0x23   : > { %2411 = vmatpush.bf16.msra.mxu2 %v2010_v4  ;;  %2412 = vmatpush.bf16.msra.mxu3 %v2010_v4 }
  0x26   : > { %810 = vmatpush.bf16.msra.mxu0 %v2009_v5  ;;  %2413 = vmatpush.bf16.msra.mxu1 %v2009_v5 }
  0x27   : > { %2414 = vmatpush.bf16.msra.mxu2 %v2009_v5  ;;  %2415 = vmatpush.bf16.msra.mxu3 %v2009_v5 }
  0x2a   : > { %811 = vmatpush.bf16.msra.mxu0 %v2008_v6  ;;  %2416 = vmatpush.bf16.msra.mxu1 %v2008_v6 }
  0x2b   : > { %2417 = vmatpush.bf16.msra.mxu2 %v2008_v6  ;;  %2418 = vmatpush.bf16.msra.mxu3 %v2008_v6 }
  0x2e   : > { %812 = vmatpush.bf16.msra.mxu0 %v2007_v7  ;;  %2419 = vmatpush.bf16.msra.mxu1 %v2007_v7 }
  0x2f   : > { %2420 = vmatpush.bf16.msra.mxu2 %v2007_v7  ;;  %2421 = vmatpush.bf16.msra.mxu3 %v2007_v7 }
  0x31   : > { %813 = vmatmul.bf16.vlgmr.msra.gmra.mxu0 %v1943_v8  ;;  %893 = vmatmul.bf16.vlgmr.msra.gmra.mxu1 %v1959_v9 }
  0x32   : > { %973 = vmatmul.bf16.vlgmr.msra.gmra.mxu2 %v1975_v10  ;;  %1053 = vmatmul.bf16.vlgmr.msra.gmra.mxu3 %v1991_v11 }
  0x41   : > { %818 = vmatmul.bf16.gmra.mxu0 %v1944_v12  ;;  %898 = vmatmul.bf16.gmra.mxu1 %v1960_v13 }
  0x42   : > { %978 = vmatmul.bf16.gmra.mxu2 %v1976_v14  ;;  %1058 = vmatmul.bf16.gmra.mxu3 %v1992_v15  ;;  %v1953_v14 = vld [vmem:[%s2830_s26 + $0x50] sm:$0xff] }
  0x43   : > { %v1969_v15 = vld [vmem:[%s2830_s26 + $0xd0] sm:$0xff] }
  0x51   : > { %823 = vmatmul.bf16.gmra.mxu0 %v1945_v16  ;;  %903 = vmatmul.bf16.gmra.mxu1 %v1961_v17 }
  0x52   : > { %983 = vmatmul.bf16.gmra.mxu2 %v1977_v18  ;;  %1063 = vmatmul.bf16.gmra.mxu3 %v1993_v19  ;;  %v1985_v19 = vld [vmem:[%s2830_s26 + $0x150] sm:$0xff] }
  0x61   : > { %828 = vmatmul.bf16.gmra.mxu0 %v1946_v20  ;;  %908 = vmatmul.bf16.gmra.mxu1 %v1962_v21  ;;  %v2001_v20 = vld [vmem:[%s2830_s26 + $0x1d0] sm:$0xff] }
  0x62   : > { %988 = vmatmul.bf16.gmra.mxu2 %v1978_v22  ;;  %1068 = vmatmul.bf16.gmra.mxu3 %v1994_v23 }
  0x71   : > { %833 = vmatmul.bf16.gmra.mxu0 %v1947_v24  ;;  %913 = vmatmul.bf16.gmra.mxu1 %v1963_v25 }
  0x72   : > { %993 = vmatmul.bf16.gmra.mxu2 %v1979_v26  ;;  %1073 = vmatmul.bf16.gmra.mxu3 %v1995_v27 }
  0x81   : > { %838 = vmatmul.bf16.gmra.mxu0 %v1948_v28  ;;  %918 = vmatmul.bf16.gmra.mxu1 %v1964_v29 }
  0x82   : > { %998 = vmatmul.bf16.gmra.mxu2 %v1980_v30  ;;  %1078 = vmatmul.bf16.gmra.mxu3 %v1996_v31 }
  0x91   : > { %843 = vmatmul.bf16.gmra.mxu0 %v1949_v32  ;;  %923 = vmatmul.bf16.gmra.mxu1 %v1965_v33 }
  0x92   : > { %1003 = vmatmul.bf16.gmra.mxu2 %v1981_v34  ;;  %1083 = vmatmul.bf16.gmra.mxu3 %v1997_v35 }
  0xa1   : > { %848 = vmatmul.bf16.gmra.mxu0 %v1950_v36  ;;  %928 = vmatmul.bf16.gmra.mxu1 %v1966_v37 }
  0xa2   : > { %1008 = vmatmul.bf16.gmra.mxu2 %v1982_v38  ;;  %1088 = vmatmul.bf16.gmra.mxu3 %v1998_v39  ;;  %v1954_v38 = vld [vmem:[%s2830_s26 + $0x58] sm:$0xff] }
  0xa3   : > { %v1970_v39 = vld [vmem:[%s2830_s26 + $0xd8] sm:$0xff] }
  0xae   : > { %v814_v42 = vpop.f32.mrf.mxu0  ;;  %v894_v43 = vpop.f32.mrf.mxu1 }
  0xaf   : > { %2462 = vtanh.f32 %v814_v42 }
  0xb0   : > { %2464 = vtanh.f32 %v894_v43  ;;  %v1986_v43 = vld [vmem:[%s2830_s26 + $0x158] sm:$0xff] }
  0xb1   : > { %853 = vmatmul.bf16.gmra.mxu0 %v1951_v40  ;;  %933 = vmatmul.bf16.gmra.mxu1 %v1967_v41 }
  0xb2   : > { %1013 = vmatmul.bf16.gmra.mxu2 %v1983_v44  ;;  %1093 = vmatmul.bf16.gmra.mxu3 %v1999_v45  ;;  %v2002_v44 = vld [vmem:[%s2830_s26 + $0x1d8] sm:$0xff] }
  0xb5   : > { %v974_v46 = vpop.f32.mrf.mxu2  ;;  %v1054_v47 = vpop.f32.mrf.mxu3 }
  0xb6   : > { %v816_v48 = vpop.f32.mrf.mxu0  ;;  %v896_v49 = vpop.f32.mrf.mxu1 }
  0xb7   : > { %2466 = vtanh.f32 %v816_v48  ;;  %v2463_v50 = vpop.eup %2462 }
  0xb8   : > { %2468 = vtanh.f32 %v896_v49  ;;  %v2465_v51 = vpop.eup %2464 }
  0xb9   : > { %2470 = vtanh.f32 %v974_v46 }
  0xba   : > { %2472 = vtanh.f32 %v1054_v47 }
  0xbd   : > { %v976_v52 = vpop.f32.mrf.mxu2  ;;  %v1056_v53 = vpop.f32.mrf.mxu3 }
  0xbe   : > { %v2467_v56 = vpop.eup %2466  ;;  %2474 = vtanh.f32 %v976_v52  ;;  %v819_v57 = vpop.f32.mrf.mxu0 }
  0xbf   : > { %v899_v58 = vpop.f32.mrf.mxu1  ;;  %v2469_v61 = vpop.eup %2468  ;;  %v2018_v62 = vpack.c.bf16 %v2467_v56, %v2463_v50  ;;  %2476 = vtanh.f32 %v1056_v53 }
  0xc0   : > { %v2098_v63 = vpack.c.bf16 %v2469_v61, %v2465_v51  ;;  %v2471_v0 = vpop.eup %2470  ;;  %2478 = vtanh.f32 %v819_v57 }
  0xc1   : > { %2019 = vst [vmem:[%s2876_s29] sm:$0xff] %v2018_v62   ;;  %858 = vmatmul.bf16.gmra.mxu0 %v1952_v54  ;;  %938 = vmatmul.bf16.gmra.mxu1 %v1968_v55  ;;  %v2473_v1 = vpop.eup %2472  ;;  %2480 = vtanh.f32 %v899_v58  ;;  %v1955_v62 = vld [vmem:[%s2830_s26 + $0x60] sm:$0xff] }
  0xc2   : > { %2350 = vst [vmem:[%s2876_s29 + $0x80] sm:$0xff] %v2098_v63   ;;  %1018 = vmatmul.bf16.gmra.mxu2 %v1984_v59  ;;  %1098 = vmatmul.bf16.gmra.mxu3 %v2000_v60  ;;  %v1971_v63 = vld [vmem:[%s2830_s26 + $0xe0] sm:$0xff] }
  0xc4   : > { %v2475_v2 = vpop.eup %2474 }
  0xc5   : > { %v2477_v3 = vpop.eup %2476  ;;  %v2178_v4 = vpack.c.bf16 %v2475_v2, %v2471_v0  ;;  %v979_v5 = vpop.f32.mrf.mxu2 }
  0xc6   : > { %v1059_v6 = vpop.f32.mrf.mxu3  ;;  %v2258_v7 = vpack.c.bf16 %v2477_v3, %v2473_v1  ;;  %v821_v8 = vpop.f32.mrf.mxu0  ;;  %v1987_v3 = vld [vmem:[%s2830_s26 + $0x160] sm:$0xff] }
  0xc7   : > { %v901_v9 = vpop.f32.mrf.mxu1  ;;  %2366 = vst [vmem:[%s2876_s29 + $0x100] sm:$0xff] %v2178_v4   ;;  %2482 = vtanh.f32 %v821_v8  ;;  %v2479_v10 = vpop.eup %2478  ;;  %v2003_v4 = vld [vmem:[%s2830_s26 + $0x1e0] sm:$0xff] }
  0xc8   : > { %2382 = vst [vmem:[%s2876_s29 + $0x180] sm:$0xff] %v2258_v7   ;;  %2484 = vtanh.f32 %v901_v9  ;;  %v2481_v11 = vpop.eup %2480 }
  0xc9   : > { %2486 = vtanh.f32 %v979_v5 }
  0xca   : > { %2488 = vtanh.f32 %v1059_v6 }
  0xcd   : > { %v981_v12 = vpop.f32.mrf.mxu2  ;;  %v2483_v16 = vpop.eup %2482 }
  0xce   : > { %v1061_v13 = vpop.f32.mrf.mxu3  ;;  %2490 = vtanh.f32 %v981_v12  ;;  %v824_v17 = vpop.f32.mrf.mxu0  ;;  %v2023_v22 = vpack.c.bf16 %v2483_v16, %v2479_v10 }
  0xcf   : > { %v904_v18 = vpop.f32.mrf.mxu1  ;;  %v2485_v21 = vpop.eup %2484  ;;  %2492 = vtanh.f32 %v1061_v13 }
  0xd0   : > { %v2103_v23 = vpack.c.bf16 %v2485_v21, %v2481_v11  ;;  %2335 = vst [vmem:[%s2876_s29 + $0x8] sm:$0xff] %v2023_v22   ;;  %v2487_v24 = vpop.eup %2486  ;;  %2494 = vtanh.f32 %v824_v17  ;;  %v1956_v22 = vld [vmem:[%s2830_s26 + $0x68] sm:$0xff] }
  0xd1   : > { %863 = vmatmul.bf16.gmra.mxu0 %v1953_v14  ;;  %943 = vmatmul.bf16.gmra.mxu1 %v1969_v15  ;;  %v2489_v25 = vpop.eup %2488  ;;  %2496 = vtanh.f32 %v904_v18 }
  0xd2   : > { %2351 = vst [vmem:[%s2876_s29 + $0x88] sm:$0xff] %v2103_v23   ;;  %1023 = vmatmul.bf16.gmra.mxu2 %v1985_v19  ;;  %1103 = vmatmul.bf16.gmra.mxu3 %v2001_v20  ;;  %v1972_v23 = vld [vmem:[%s2830_s26 + $0xe8] sm:$0xff] }
  0xd4   : > { %v2491_v26 = vpop.eup %2490 }
  0xd5   : > { %v2493_v27 = vpop.eup %2492  ;;  %v2183_v28 = vpack.c.bf16 %v2491_v26, %v2487_v24  ;;  %v984_v29 = vpop.f32.mrf.mxu2 }
  0xd6   : > { %v1064_v30 = vpop.f32.mrf.mxu3  ;;  %v2263_v31 = vpack.c.bf16 %v2493_v27, %v2489_v25  ;;  %v826_v32 = vpop.f32.mrf.mxu0  ;;  %v1988_v27 = vld [vmem:[%s2830_s26 + $0x168] sm:$0xff] }
  0xd7   : > { %v906_v33 = vpop.f32.mrf.mxu1  ;;  %2367 = vst [vmem:[%s2876_s29 + $0x108] sm:$0xff] %v2183_v28   ;;  %2498 = vtanh.f32 %v826_v32  ;;  %v2495_v34 = vpop.eup %2494  ;;  %v2004_v28 = vld [vmem:[%s2830_s26 + $0x1e8] sm:$0xff] }
  0xd8   : > { %2383 = vst [vmem:[%s2876_s29 + $0x188] sm:$0xff] %v2263_v31   ;;  %2500 = vtanh.f32 %v906_v33  ;;  %v2497_v35 = vpop.eup %2496 }
  0xd9   : > { %2502 = vtanh.f32 %v984_v29 }
  0xda   : > { %2504 = vtanh.f32 %v1064_v30 }
  0xdd   : > { %v986_v36 = vpop.f32.mrf.mxu2  ;;  %v2499_v40 = vpop.eup %2498 }
  0xde   : > { %v1066_v37 = vpop.f32.mrf.mxu3  ;;  %2506 = vtanh.f32 %v986_v36  ;;  %v829_v41 = vpop.f32.mrf.mxu0  ;;  %v2028_v46 = vpack.c.bf16 %v2499_v40, %v2495_v34 }
  0xdf   : > { %v909_v42 = vpop.f32.mrf.mxu1  ;;  %v2501_v45 = vpop.eup %2500  ;;  %2508 = vtanh.f32 %v1066_v37 }
  0xe0   : > { %v2108_v47 = vpack.c.bf16 %v2501_v45, %v2497_v35  ;;  %2336 = vst [vmem:[%s2876_s29 + $0x10] sm:$0xff] %v2028_v46   ;;  %v2503_v48 = vpop.eup %2502  ;;  %2510 = vtanh.f32 %v829_v41  ;;  %v1957_v46 = vld [vmem:[%s2830_s26 + $0x70] sm:$0xff] }
  0xe1   : > { %868 = vmatmul.bf16.gmra.mxu0 %v1954_v38  ;;  %948 = vmatmul.bf16.gmra.mxu1 %v1970_v39  ;;  %v2505_v49 = vpop.eup %2504  ;;  %2512 = vtanh.f32 %v909_v42 }
  0xe2   : > { %2352 = vst [vmem:[%s2876_s29 + $0x90] sm:$0xff] %v2108_v47   ;;  %1028 = vmatmul.bf16.gmra.mxu2 %v1986_v43  ;;  %1108 = vmatmul.bf16.gmra.mxu3 %v2002_v44  ;;  %v1973_v47 = vld [vmem:[%s2830_s26 + $0xf0] sm:$0xff] }
  0xe4   : > { %v2507_v50 = vpop.eup %2506 }
  0xe5   : > { %v2509_v51 = vpop.eup %2508  ;;  %v2188_v52 = vpack.c.bf16 %v2507_v50, %v2503_v48  ;;  %v989_v53 = vpop.f32.mrf.mxu2 }
  0xe6   : > { %v1069_v54 = vpop.f32.mrf.mxu3  ;;  %v2268_v55 = vpack.c.bf16 %v2509_v51, %v2505_v49  ;;  %v831_v56 = vpop.f32.mrf.mxu0  ;;  %v1989_v51 = vld [vmem:[%s2830_s26 + $0x170] sm:$0xff] }
  0xe7   : > { %v911_v57 = vpop.f32.mrf.mxu1  ;;  %2368 = vst [vmem:[%s2876_s29 + $0x110] sm:$0xff] %v2188_v52   ;;  %2514 = vtanh.f32 %v831_v56  ;;  %v2511_v58 = vpop.eup %2510  ;;  %v2005_v52 = vld [vmem:[%s2830_s26 + $0x1f0] sm:$0xff] }
  0xe8   : > { %2384 = vst [vmem:[%s2876_s29 + $0x190] sm:$0xff] %v2268_v55   ;;  %2516 = vtanh.f32 %v911_v57  ;;  %v2513_v59 = vpop.eup %2512 }
  0xe9   : > { %2518 = vtanh.f32 %v989_v53 }
  0xea   : > { %2520 = vtanh.f32 %v1069_v54 }
  0xed   : > { %v991_v60 = vpop.f32.mrf.mxu2  ;;  %v2515_v0 = vpop.eup %2514 }
  0xee   : > { %v1071_v61 = vpop.f32.mrf.mxu3  ;;  %2522 = vtanh.f32 %v991_v60  ;;  %v834_v1 = vpop.f32.mrf.mxu0  ;;  %v2033_v6 = vpack.c.bf16 %v2515_v0, %v2511_v58 }
  0xef   : > { %v914_v2 = vpop.f32.mrf.mxu1  ;;  %v2517_v5 = vpop.eup %2516  ;;  %2524 = vtanh.f32 %v1071_v61 }
  0xf0   : > { %v2113_v7 = vpack.c.bf16 %v2517_v5, %v2513_v59  ;;  %2337 = vst [vmem:[%s2876_s29 + $0x18] sm:$0xff] %v2033_v6   ;;  %v2519_v8 = vpop.eup %2518  ;;  %2526 = vtanh.f32 %v834_v1  ;;  %v1958_v6 = vld [vmem:[%s2830_s26 + $0x78] sm:$0xff] }
  0xf1   : > { %873 = vmatmul.bf16.gmra.mxu0 %v1955_v62  ;;  %953 = vmatmul.bf16.gmra.mxu1 %v1971_v63  ;;  %v2521_v9 = vpop.eup %2520  ;;  %2528 = vtanh.f32 %v914_v2 }
  0xf2   : > { %2353 = vst [vmem:[%s2876_s29 + $0x98] sm:$0xff] %v2113_v7   ;;  %1033 = vmatmul.bf16.gmra.mxu2 %v1987_v3  ;;  %1113 = vmatmul.bf16.gmra.mxu3 %v2003_v4  ;;  %v1974_v7 = vld [vmem:[%s2830_s26 + $0xf8] sm:$0xff] }
  0xf4   : > { %v2523_v10 = vpop.eup %2522 }
  0xf5   : > { %v2525_v11 = vpop.eup %2524  ;;  %v2193_v12 = vpack.c.bf16 %v2523_v10, %v2519_v8  ;;  %v994_v13 = vpop.f32.mrf.mxu2 }
  0xf6   : > { %v1074_v14 = vpop.f32.mrf.mxu3  ;;  %v2273_v15 = vpack.c.bf16 %v2525_v11, %v2521_v9  ;;  %v836_v16 = vpop.f32.mrf.mxu0  ;;  %v1990_v11 = vld [vmem:[%s2830_s26 + $0x178] sm:$0xff] }
  0xf7   : > { %v916_v17 = vpop.f32.mrf.mxu1  ;;  %2369 = vst [vmem:[%s2876_s29 + $0x118] sm:$0xff] %v2193_v12   ;;  %2530 = vtanh.f32 %v836_v16  ;;  %v2527_v18 = vpop.eup %2526  ;;  %v2006_v12 = vld [vmem:[%s2830_s26 + $0x1f8] sm:$0xff] }
  0xf8   : > { %2385 = vst [vmem:[%s2876_s29 + $0x198] sm:$0xff] %v2273_v15   ;;  %2532 = vtanh.f32 %v916_v17  ;;  %v2529_v19 = vpop.eup %2528 }
  0xf9   : > { %2534 = vtanh.f32 %v994_v13 }
  0xfa   : > { %2536 = vtanh.f32 %v1074_v14 }
  0xfd   : > { %v996_v20 = vpop.f32.mrf.mxu2  ;;  %v2531_v24 = vpop.eup %2530 }
  0xfe   : > { %v1076_v21 = vpop.f32.mrf.mxu3  ;;  %2538 = vtanh.f32 %v996_v20  ;;  %v839_v25 = vpop.f32.mrf.mxu0  ;;  %v2038_v30 = vpack.c.bf16 %v2531_v24, %v2527_v18 }
  0xff   : > { %v919_v26 = vpop.f32.mrf.mxu1  ;;  %v2533_v29 = vpop.eup %2532  ;;  %2540 = vtanh.f32 %v1076_v21 }
 0x100   : > { %v2118_v31 = vpack.c.bf16 %v2533_v29, %v2529_v19  ;;  %2338 = vst [vmem:[%s2876_s29 + $0x20] sm:$0xff] %v2038_v30   ;;  %v2535_v32 = vpop.eup %2534  ;;  %2542 = vtanh.f32 %v839_v25 }
 0x101   : > { %878 = vmatmul.bf16.gmra.mxu0 %v1956_v22  ;;  %958 = vmatmul.bf16.gmra.mxu1 %v1972_v23  ;;  %v2537_v33 = vpop.eup %2536  ;;  %2544 = vtanh.f32 %v919_v26 }
 0x102   : > { %2354 = vst [vmem:[%s2876_s29 + $0xa0] sm:$0xff] %v2118_v31   ;;  %1038 = vmatmul.bf16.gmra.mxu2 %v1988_v27  ;;  %1118 = vmatmul.bf16.gmra.mxu3 %v2004_v28 }
 0x104   : > { %v2539_v34 = vpop.eup %2538 }
 0x105   : > { %v2541_v35 = vpop.eup %2540  ;;  %v2198_v36 = vpack.c.bf16 %v2539_v34, %v2535_v32  ;;  %v999_v37 = vpop.f32.mrf.mxu2 }
 0x106   : > { %v1079_v38 = vpop.f32.mrf.mxu3  ;;  %v2278_v39 = vpack.c.bf16 %v2541_v35, %v2537_v33  ;;  %v841_v40 = vpop.f32.mrf.mxu0 }
 0x107   : > { %v921_v41 = vpop.f32.mrf.mxu1  ;;  %2370 = vst [vmem:[%s2876_s29 + $0x120] sm:$0xff] %v2198_v36   ;;  %2546 = vtanh.f32 %v841_v40  ;;  %v2543_v42 = vpop.eup %2542 }
 0x108   : > { %2386 = vst [vmem:[%s2876_s29 + $0x1a0] sm:$0xff] %v2278_v39   ;;  %2548 = vtanh.f32 %v921_v41  ;;  %v2545_v43 = vpop.eup %2544 }
 0x109   : > { %2550 = vtanh.f32 %v999_v37 }
 0x10a   : > { %2552 = vtanh.f32 %v1079_v38 }
 0x10d   : > { %v1001_v44 = vpop.f32.mrf.mxu2  ;;  %v2547_v48 = vpop.eup %2546 }
 0x10e   : > { %v1081_v45 = vpop.f32.mrf.mxu3  ;;  %2554 = vtanh.f32 %v1001_v44  ;;  %v844_v49 = vpop.f32.mrf.mxu0  ;;  %v2043_v54 = vpack.c.bf16 %v2547_v48, %v2543_v42 }
 0x10f   : > { %v924_v50 = vpop.f32.mrf.mxu1  ;;  %v2549_v53 = vpop.eup %2548  ;;  %2556 = vtanh.f32 %v1081_v45 }
 0x110   : > { %v2123_v55 = vpack.c.bf16 %v2549_v53, %v2545_v43  ;;  %2339 = vst [vmem:[%s2876_s29 + $0x28] sm:$0xff] %v2043_v54   ;;  %v2551_v56 = vpop.eup %2550  ;;  %2558 = vtanh.f32 %v844_v49 }
 0x111   : > { %883 = vmatmul.bf16.gmra.mxu0 %v1957_v46  ;;  %963 = vmatmul.bf16.gmra.mxu1 %v1973_v47  ;;  %v2553_v57 = vpop.eup %2552  ;;  %2560 = vtanh.f32 %v924_v50 }
 0x112   : > { %2355 = vst [vmem:[%s2876_s29 + $0xa8] sm:$0xff] %v2123_v55   ;;  %1043 = vmatmul.bf16.gmra.mxu2 %v1989_v51  ;;  %1123 = vmatmul.bf16.gmra.mxu3 %v2005_v52 }
 0x114   : > { %v2555_v58 = vpop.eup %2554 }
 0x115   : > { %v2557_v59 = vpop.eup %2556  ;;  %v2203_v60 = vpack.c.bf16 %v2555_v58, %v2551_v56  ;;  %v1004_v61 = vpop.f32.mrf.mxu2 }
 0x116   : > { %v1084_v62 = vpop.f32.mrf.mxu3  ;;  %v2283_v63 = vpack.c.bf16 %v2557_v59, %v2553_v57  ;;  %v846_v0 = vpop.f32.mrf.mxu0 }
 0x117   : > { %v926_v1 = vpop.f32.mrf.mxu1  ;;  %2371 = vst [vmem:[%s2876_s29 + $0x128] sm:$0xff] %v2203_v60   ;;  %2562 = vtanh.f32 %v846_v0  ;;  %v2559_v2 = vpop.eup %2558 }
 0x118   : > { %2387 = vst [vmem:[%s2876_s29 + $0x1a8] sm:$0xff] %v2283_v63   ;;  %2564 = vtanh.f32 %v926_v1  ;;  %v2561_v3 = vpop.eup %2560 }
 0x119   : > { %2566 = vtanh.f32 %v1004_v61 }
 0x11a   : > { %2568 = vtanh.f32 %v1084_v62 }
 0x11d   : > { %v1006_v4 = vpop.f32.mrf.mxu2  ;;  %v2563_v8 = vpop.eup %2562 }
 0x11e   : > { %v1086_v5 = vpop.f32.mrf.mxu3  ;;  %2570 = vtanh.f32 %v1006_v4  ;;  %v849_v9 = vpop.f32.mrf.mxu0  ;;  %v2048_v14 = vpack.c.bf16 %v2563_v8, %v2559_v2 }
 0x11f   : > { %v929_v10 = vpop.f32.mrf.mxu1  ;;  %v2565_v13 = vpop.eup %2564  ;;  %2572 = vtanh.f32 %v1086_v5 }
 0x120   : > { %v2128_v15 = vpack.c.bf16 %v2565_v13, %v2561_v3  ;;  %2340 = vst [vmem:[%s2876_s29 + $0x30] sm:$0xff] %v2048_v14   ;;  %v2567_v16 = vpop.eup %2566  ;;  %2574 = vtanh.f32 %v849_v9 }
 0x121   : > { %888 = vmatmul.bf16.gmra.mxu0 %v1958_v6  ;;  %968 = vmatmul.bf16.gmra.mxu1 %v1974_v7  ;;  %v2569_v17 = vpop.eup %2568  ;;  %2576 = vtanh.f32 %v929_v10 }
 0x122   : > { %2356 = vst [vmem:[%s2876_s29 + $0xb0] sm:$0xff] %v2128_v15   ;;  %1048 = vmatmul.bf16.gmra.mxu2 %v1990_v11  ;;  %1128 = vmatmul.bf16.gmra.mxu3 %v2006_v12 }
 0x124   : > { %v2571_v18 = vpop.eup %2570 }
 0x125   : > { %v2573_v19 = vpop.eup %2572  ;;  %v2208_v20 = vpack.c.bf16 %v2571_v18, %v2567_v16  ;;  %v1009_v21 = vpop.f32.mrf.mxu2 }
 0x126   : > { %v1089_v22 = vpop.f32.mrf.mxu3  ;;  %v2288_v23 = vpack.c.bf16 %v2573_v19, %v2569_v17  ;;  %v851_v24 = vpop.f32.mrf.mxu0 }
 0x127   : > { %v931_v25 = vpop.f32.mrf.mxu1  ;;  %2372 = vst [vmem:[%s2876_s29 + $0x130] sm:$0xff] %v2208_v20   ;;  %2578 = vtanh.f32 %v851_v24  ;;  %v2575_v26 = vpop.eup %2574 }
 0x128   : > { %2388 = vst [vmem:[%s2876_s29 + $0x1b0] sm:$0xff] %v2288_v23   ;;  %2580 = vtanh.f32 %v931_v25  ;;  %v2577_v27 = vpop.eup %2576 }
 0x129   : > { %2582 = vtanh.f32 %v1009_v21 }
 0x12a   : > { %2584 = vtanh.f32 %v1089_v22 }
 0x12d   : > { %v1011_v28 = vpop.f32.mrf.mxu2  ;;  %v2579_v30 = vpop.eup %2578 }
 0x12e   : > { %v1091_v29 = vpop.f32.mrf.mxu3  ;;  %2586 = vtanh.f32 %v1011_v28  ;;  %v854_v31 = vpop.f32.mrf.mxu0  ;;  %v2053_v34 = vpack.c.bf16 %v2579_v30, %v2575_v26 }
 0x12f   : > { %v934_v32 = vpop.f32.mrf.mxu1  ;;  %v2581_v33 = vpop.eup %2580  ;;  %2588 = vtanh.f32 %v1091_v29 }
 0x130   : > { %v2133_v35 = vpack.c.bf16 %v2581_v33, %v2577_v27  ;;  %2341 = vst [vmem:[%s2876_s29 + $0x38] sm:$0xff] %v2053_v34   ;;  %v2583_v36 = vpop.eup %2582  ;;  %2590 = vtanh.f32 %v854_v31 }
 0x131   : > { %v2585_v37 = vpop.eup %2584  ;;  %2592 = vtanh.f32 %v934_v32 }
 0x132   : > { %2357 = vst [vmem:[%s2876_s29 + $0xb8] sm:$0xff] %v2133_v35  }
 0x134   : > { %v2587_v38 = vpop.eup %2586 }
 0x135   : > { %v2589_v39 = vpop.eup %2588  ;;  %v2213_v40 = vpack.c.bf16 %v2587_v38, %v2583_v36  ;;  %v1014_v41 = vpop.f32.mrf.mxu2 }
 0x136   : > { %v1094_v42 = vpop.f32.mrf.mxu3  ;;  %v2293_v43 = vpack.c.bf16 %v2589_v39, %v2585_v37  ;;  %v856_v44 = vpop.f32.mrf.mxu0 }
 0x137   : > { %v936_v45 = vpop.f32.mrf.mxu1  ;;  %2373 = vst [vmem:[%s2876_s29 + $0x138] sm:$0xff] %v2213_v40   ;;  %2594 = vtanh.f32 %v856_v44  ;;  %v2591_v46 = vpop.eup %2590 }
 0x138   : > { %2389 = vst [vmem:[%s2876_s29 + $0x1b8] sm:$0xff] %v2293_v43   ;;  %2596 = vtanh.f32 %v936_v45  ;;  %v2593_v47 = vpop.eup %2592 }
 0x139   : > { %2598 = vtanh.f32 %v1014_v41 }
 0x13a   : > { %2600 = vtanh.f32 %v1094_v42 }
 0x13d   : > { %v1016_v48 = vpop.f32.mrf.mxu2  ;;  %v2595_v50 = vpop.eup %2594 }
 0x13e   : > { %v1096_v49 = vpop.f32.mrf.mxu3  ;;  %2602 = vtanh.f32 %v1016_v48  ;;  %v859_v51 = vpop.f32.mrf.mxu0  ;;  %v2058_v54 = vpack.c.bf16 %v2595_v50, %v2591_v46 }
 0x13f   : > { %v939_v52 = vpop.f32.mrf.mxu1  ;;  %v2597_v53 = vpop.eup %2596  ;;  %2604 = vtanh.f32 %v1096_v49 }
 0x140   : > { %v2138_v55 = vpack.c.bf16 %v2597_v53, %v2593_v47  ;;  %2342 = vst [vmem:[%s2876_s29 + $0x40] sm:$0xff] %v2058_v54   ;;  %v2599_v56 = vpop.eup %2598  ;;  %2606 = vtanh.f32 %v859_v51 }
 0x141   : > { %v2601_v57 = vpop.eup %2600  ;;  %2608 = vtanh.f32 %v939_v52 }
 0x142   : > { %2358 = vst [vmem:[%s2876_s29 + $0xc0] sm:$0xff] %v2138_v55  }
 0x144   : > { %v2603_v58 = vpop.eup %2602 }
 0x145   : > { %v2605_v59 = vpop.eup %2604  ;;  %v2218_v60 = vpack.c.bf16 %v2603_v58, %v2599_v56  ;;  %v1019_v61 = vpop.f32.mrf.mxu2 }
 0x146   : > { %v1099_v62 = vpop.f32.mrf.mxu3  ;;  %v2298_v63 = vpack.c.bf16 %v2605_v59, %v2601_v57  ;;  %v861_v0 = vpop.f32.mrf.mxu0 }
 0x147   : > { %v941_v1 = vpop.f32.mrf.mxu1  ;;  %2374 = vst [vmem:[%s2876_s29 + $0x140] sm:$0xff] %v2218_v60   ;;  %2610 = vtanh.f32 %v861_v0  ;;  %v2607_v2 = vpop.eup %2606 }
 0x148   : > { %2390 = vst [vmem:[%s2876_s29 + $0x1c0] sm:$0xff] %v2298_v63   ;;  %2612 = vtanh.f32 %v941_v1  ;;  %v2609_v3 = vpop.eup %2608 }
 0x149   : > { %2614 = vtanh.f32 %v1019_v61 }
 0x14a   : > { %2616 = vtanh.f32 %v1099_v62 }
 0x14d   : > { %v1021_v4 = vpop.f32.mrf.mxu2  ;;  %v2611_v6 = vpop.eup %2610 }
 0x14e   : > { %v1101_v5 = vpop.f32.mrf.mxu3  ;;  %2618 = vtanh.f32 %v1021_v4  ;;  %v864_v7 = vpop.f32.mrf.mxu0  ;;  %v2063_v10 = vpack.c.bf16 %v2611_v6, %v2607_v2 }
 0x14f   : > { %v944_v8 = vpop.f32.mrf.mxu1  ;;  %v2613_v9 = vpop.eup %2612  ;;  %2620 = vtanh.f32 %v1101_v5 }
 0x150   : > { %v2143_v11 = vpack.c.bf16 %v2613_v9, %v2609_v3  ;;  %2343 = vst [vmem:[%s2876_s29 + $0x48] sm:$0xff] %v2063_v10   ;;  %v2615_v12 = vpop.eup %2614  ;;  %2622 = vtanh.f32 %v864_v7 }
 0x151   : > { %v2617_v13 = vpop.eup %2616  ;;  %2624 = vtanh.f32 %v944_v8 }
 0x152   : > { %2359 = vst [vmem:[%s2876_s29 + $0xc8] sm:$0xff] %v2143_v11  }
 0x154   : > { %v2619_v14 = vpop.eup %2618 }
 0x155   : > { %v2621_v15 = vpop.eup %2620  ;;  %v2223_v16 = vpack.c.bf16 %v2619_v14, %v2615_v12  ;;  %v1024_v17 = vpop.f32.mrf.mxu2 }
 0x156   : > { %v1104_v18 = vpop.f32.mrf.mxu3  ;;  %v2303_v19 = vpack.c.bf16 %v2621_v15, %v2617_v13  ;;  %v866_v20 = vpop.f32.mrf.mxu0 }
 0x157   : > { %v946_v21 = vpop.f32.mrf.mxu1  ;;  %2375 = vst [vmem:[%s2876_s29 + $0x148] sm:$0xff] %v2223_v16   ;;  %2626 = vtanh.f32 %v866_v20  ;;  %v2623_v22 = vpop.eup %2622 }
 0x158   : > { %2391 = vst [vmem:[%s2876_s29 + $0x1c8] sm:$0xff] %v2303_v19   ;;  %2628 = vtanh.f32 %v946_v21  ;;  %v2625_v23 = vpop.eup %2624 }
 0x159   : > { %2630 = vtanh.f32 %v1024_v17 }
 0x15a   : > { %2632 = vtanh.f32 %v1104_v18 }
 0x15d   : > { %v1026_v24 = vpop.f32.mrf.mxu2  ;;  %v2627_v26 = vpop.eup %2626 }
 0x15e   : > { %v1106_v25 = vpop.f32.mrf.mxu3  ;;  %2634 = vtanh.f32 %v1026_v24  ;;  %v869_v27 = vpop.f32.mrf.mxu0  ;;  %v2068_v30 = vpack.c.bf16 %v2627_v26, %v2623_v22 }
 0x15f   : > { %v949_v28 = vpop.f32.mrf.mxu1  ;;  %v2629_v29 = vpop.eup %2628  ;;  %2636 = vtanh.f32 %v1106_v25 }
 0x160   : > { %v2148_v31 = vpack.c.bf16 %v2629_v29, %v2625_v23  ;;  %2344 = vst [vmem:[%s2876_s29 + $0x50] sm:$0xff] %v2068_v30   ;;  %v2631_v32 = vpop.eup %2630  ;;  %2638 = vtanh.f32 %v869_v27 }
 0x161   : > { %v2633_v33 = vpop.eup %2632  ;;  %2640 = vtanh.f32 %v949_v28 }
 0x162   : > { %2360 = vst [vmem:[%s2876_s29 + $0xd0] sm:$0xff] %v2148_v31  }
 0x164   : > { %v2635_v34 = vpop.eup %2634 }
 0x165   : > { %v2637_v35 = vpop.eup %2636  ;;  %v2228_v36 = vpack.c.bf16 %v2635_v34, %v2631_v32  ;;  %v1029_v37 = vpop.f32.mrf.mxu2 }
 0x166   : > { %v1109_v38 = vpop.f32.mrf.mxu3  ;;  %v2308_v39 = vpack.c.bf16 %v2637_v35, %v2633_v33  ;;  %v871_v40 = vpop.f32.mrf.mxu0 }
 0x167   : > { %v951_v41 = vpop.f32.mrf.mxu1  ;;  %2376 = vst [vmem:[%s2876_s29 + $0x150] sm:$0xff] %v2228_v36   ;;  %2642 = vtanh.f32 %v871_v40  ;;  %v2639_v42 = vpop.eup %2638 }
 0x168   : > { %2392 = vst [vmem:[%s2876_s29 + $0x1d0] sm:$0xff] %v2308_v39   ;;  %2644 = vtanh.f32 %v951_v41  ;;  %v2641_v43 = vpop.eup %2640 }
 0x169   : > { %2646 = vtanh.f32 %v1029_v37 }
 0x16a   : > { %2648 = vtanh.f32 %v1109_v38 }
 0x16d   : > { %v1031_v44 = vpop.f32.mrf.mxu2  ;;  %v2643_v46 = vpop.eup %2642 }
 0x16e   : > { %v1111_v45 = vpop.f32.mrf.mxu3  ;;  %2650 = vtanh.f32 %v1031_v44  ;;  %v874_v47 = vpop.f32.mrf.mxu0  ;;  %v2073_v50 = vpack.c.bf16 %v2643_v46, %v2639_v42 }
 0x16f   : > { %v954_v48 = vpop.f32.mrf.mxu1  ;;  %v2645_v49 = vpop.eup %2644  ;;  %2652 = vtanh.f32 %v1111_v45 }
 0x170   : > { %v2153_v51 = vpack.c.bf16 %v2645_v49, %v2641_v43  ;;  %2345 = vst [vmem:[%s2876_s29 + $0x58] sm:$0xff] %v2073_v50   ;;  %v2647_v52 = vpop.eup %2646  ;;  %2654 = vtanh.f32 %v874_v47 }
 0x171   : > { %v2649_v53 = vpop.eup %2648  ;;  %2656 = vtanh.f32 %v954_v48 }
 0x172   : > { %2361 = vst [vmem:[%s2876_s29 + $0xd8] sm:$0xff] %v2153_v51  }
 0x174   : > { %v2651_v54 = vpop.eup %2650 }
 0x175   : > { %v2653_v55 = vpop.eup %2652  ;;  %v2233_v56 = vpack.c.bf16 %v2651_v54, %v2647_v52  ;;  %v1034_v57 = vpop.f32.mrf.mxu2 }
 0x176   : > { %v1114_v58 = vpop.f32.mrf.mxu3  ;;  %v2313_v59 = vpack.c.bf16 %v2653_v55, %v2649_v53  ;;  %v876_v60 = vpop.f32.mrf.mxu0 }
 0x177   : > { %v956_v61 = vpop.f32.mrf.mxu1  ;;  %2377 = vst [vmem:[%s2876_s29 + $0x158] sm:$0xff] %v2233_v56   ;;  %2658 = vtanh.f32 %v876_v60  ;;  %v2655_v62 = vpop.eup %2654 }
 0x178   : > { %2393 = vst [vmem:[%s2876_s29 + $0x1d8] sm:$0xff] %v2313_v59   ;;  %2660 = vtanh.f32 %v956_v61  ;;  %v2657_v63 = vpop.eup %2656 }
 0x179   : > { %2662 = vtanh.f32 %v1034_v57 }
 0x17a   : > { %2664 = vtanh.f32 %v1114_v58 }
 0x17d   : > { %v1036_v0 = vpop.f32.mrf.mxu2  ;;  %v2659_v2 = vpop.eup %2658 }
 0x17e   : > { %v1116_v1 = vpop.f32.mrf.mxu3  ;;  %2666 = vtanh.f32 %v1036_v0  ;;  %v879_v3 = vpop.f32.mrf.mxu0  ;;  %v2078_v6 = vpack.c.bf16 %v2659_v2, %v2655_v62 }
 0x17f   : > { %v959_v4 = vpop.f32.mrf.mxu1  ;;  %v2661_v5 = vpop.eup %2660  ;;  %2668 = vtanh.f32 %v1116_v1 }
 0x180   : > { %v2158_v7 = vpack.c.bf16 %v2661_v5, %v2657_v63  ;;  %2346 = vst [vmem:[%s2876_s29 + $0x60] sm:$0xff] %v2078_v6   ;;  %v2663_v8 = vpop.eup %2662  ;;  %2670 = vtanh.f32 %v879_v3 }
 0x181   : > { %v2665_v9 = vpop.eup %2664  ;;  %2672 = vtanh.f32 %v959_v4 }
 0x182   : > { %2362 = vst [vmem:[%s2876_s29 + $0xe0] sm:$0xff] %v2158_v7  }
 0x184   : > { %v2667_v10 = vpop.eup %2666 }
 0x185   : > { %v2669_v11 = vpop.eup %2668  ;;  %v2238_v12 = vpack.c.bf16 %v2667_v10, %v2663_v8  ;;  %v1039_v13 = vpop.f32.mrf.mxu2 }
 0x186   : > { %v1119_v14 = vpop.f32.mrf.mxu3  ;;  %v2318_v15 = vpack.c.bf16 %v2669_v11, %v2665_v9  ;;  %v881_v16 = vpop.f32.mrf.mxu0 }
 0x187   : > { %v961_v17 = vpop.f32.mrf.mxu1  ;;  %2378 = vst [vmem:[%s2876_s29 + $0x160] sm:$0xff] %v2238_v12   ;;  %2674 = vtanh.f32 %v881_v16  ;;  %v2671_v18 = vpop.eup %2670 }
 0x188   : > { %2394 = vst [vmem:[%s2876_s29 + $0x1e0] sm:$0xff] %v2318_v15   ;;  %2676 = vtanh.f32 %v961_v17  ;;  %v2673_v19 = vpop.eup %2672 }
 0x189   : > { %2678 = vtanh.f32 %v1039_v13 }
 0x18a   : > { %2680 = vtanh.f32 %v1119_v14 }
 0x18d   : > { %v1041_v20 = vpop.f32.mrf.mxu2  ;;  %v2675_v22 = vpop.eup %2674 }
 0x18e   : > { %v1121_v21 = vpop.f32.mrf.mxu3  ;;  %2682 = vtanh.f32 %v1041_v20  ;;  %v884_v23 = vpop.f32.mrf.mxu0  ;;  %v2083_v26 = vpack.c.bf16 %v2675_v22, %v2671_v18 }
 0x18f   : > { %v964_v24 = vpop.f32.mrf.mxu1  ;;  %v2677_v25 = vpop.eup %2676  ;;  %2684 = vtanh.f32 %v1121_v21 }
 0x190   : > { %v2163_v27 = vpack.c.bf16 %v2677_v25, %v2673_v19  ;;  %2347 = vst [vmem:[%s2876_s29 + $0x68] sm:$0xff] %v2083_v26   ;;  %v2679_v28 = vpop.eup %2678  ;;  %2686 = vtanh.f32 %v884_v23 }
 0x191   : > { %v2681_v29 = vpop.eup %2680  ;;  %2688 = vtanh.f32 %v964_v24 }
 0x192   : > { %2363 = vst [vmem:[%s2876_s29 + $0xe8] sm:$0xff] %v2163_v27  }
 0x194   : > { %v2683_v30 = vpop.eup %2682 }
 0x195   : > { %v2685_v31 = vpop.eup %2684  ;;  %v2243_v32 = vpack.c.bf16 %v2683_v30, %v2679_v28  ;;  %v1044_v33 = vpop.f32.mrf.mxu2 }
 0x196   : > { %v1124_v34 = vpop.f32.mrf.mxu3  ;;  %v2323_v35 = vpack.c.bf16 %v2685_v31, %v2681_v29  ;;  %v886_v36 = vpop.f32.mrf.mxu0 }
 0x197   : > { %v966_v37 = vpop.f32.mrf.mxu1  ;;  %2379 = vst [vmem:[%s2876_s29 + $0x168] sm:$0xff] %v2243_v32   ;;  %2690 = vtanh.f32 %v886_v36  ;;  %v2687_v38 = vpop.eup %2686 }
 0x198   : > { %2395 = vst [vmem:[%s2876_s29 + $0x1e8] sm:$0xff] %v2323_v35   ;;  %2692 = vtanh.f32 %v966_v37  ;;  %v2689_v39 = vpop.eup %2688 }
 0x199   : > { %2694 = vtanh.f32 %v1044_v33 }
 0x19a   : > { %2696 = vtanh.f32 %v1124_v34 }
 0x19d   : > { %v1046_v40 = vpop.f32.mrf.mxu2  ;;  %v2691_v42 = vpop.eup %2690 }
 0x19e   : > { %v1126_v41 = vpop.f32.mrf.mxu3  ;;  %2698 = vtanh.f32 %v1046_v40  ;;  %v889_v43 = vpop.f32.mrf.mxu0  ;;  %v2088_v46 = vpack.c.bf16 %v2691_v42, %v2687_v38 }
 0x19f   : > { %v969_v44 = vpop.f32.mrf.mxu1  ;;  %v2693_v45 = vpop.eup %2692  ;;  %2700 = vtanh.f32 %v1126_v41 }
 0x1a0   : > { %v2168_v47 = vpack.c.bf16 %v2693_v45, %v2689_v39  ;;  %2348 = vst [vmem:[%s2876_s29 + $0x70] sm:$0xff] %v2088_v46   ;;  %v2695_v48 = vpop.eup %2694  ;;  %2702 = vtanh.f32 %v889_v43 }
 0x1a1   : > { %v2697_v49 = vpop.eup %2696  ;;  %2704 = vtanh.f32 %v969_v44 }
 0x1a2   : > { %2364 = vst [vmem:[%s2876_s29 + $0xf0] sm:$0xff] %v2168_v47  }
 0x1a4   : > { %v2699_v50 = vpop.eup %2698 }
 0x1a5   : > { %v2701_v51 = vpop.eup %2700  ;;  %v2248_v52 = vpack.c.bf16 %v2699_v50, %v2695_v48  ;;  %v1049_v53 = vpop.f32.mrf.mxu2 }
 0x1a6   : > { %v1129_v54 = vpop.f32.mrf.mxu3  ;;  %v2328_v55 = vpack.c.bf16 %v2701_v51, %v2697_v49  ;;  %v891_v56 = vpop.f32.mrf.mxu0 }
 0x1a7   : > { %v971_v57 = vpop.f32.mrf.mxu1  ;;  %2380 = vst [vmem:[%s2876_s29 + $0x170] sm:$0xff] %v2248_v52   ;;  %2706 = vtanh.f32 %v891_v56  ;;  %v2703_v58 = vpop.eup %2702 }
 0x1a8   : > { %2396 = vst [vmem:[%s2876_s29 + $0x1f0] sm:$0xff] %v2328_v55   ;;  %2708 = vtanh.f32 %v971_v57  ;;  %v2705_v59 = vpop.eup %2704 }
 0x1a9   : > { %2710 = vtanh.f32 %v1049_v53 }
 0x1aa   : > { %2712 = vtanh.f32 %v1129_v54 }
 0x1ad   : > { %v1051_v60 = vpop.f32.mrf.mxu2  ;;  %v2707_v62 = vpop.eup %2706 }
 0x1ae   : > { %v1131_v61 = vpop.f32.mrf.mxu3  ;;  %2714 = vtanh.f32 %v1051_v60  ;;  %v2709_v63 = vpop.eup %2708  ;;  %v2093_v0 = vpack.c.bf16 %v2707_v62, %v2703_v58 }
 0x1af   : > { %2716 = vtanh.f32 %v1131_v61  ;;  %v2173_v1 = vpack.c.bf16 %v2709_v63, %v2705_v59  ;;  %v2711_v2 = vpop.eup %2710 }
 0x1b0   : > { %2349 = vst [vmem:[%s2876_s29 + $0x78] sm:$0xff] %v2093_v0   ;;  %v2713_v3 = vpop.eup %2712 }
 0x1b1   : > { %2365 = vst [vmem:[%s2876_s29 + $0xf8] sm:$0xff] %v2173_v1  }
 0x1b4   : > { %v2715_v4 = vpop.eup %2714 }
 0x1b5   : > { %v2717_v5 = vpop.eup %2716  ;;  %v2253_v6 = vpack.c.bf16 %v2715_v4, %v2711_v2 }
 0x1b6   : > { %v2333_v7 = vpack.c.bf16 %v2717_v5, %v2713_v3 }
 0x1b7   : > { %2381 = vst [vmem:[%s2876_s29 + $0x178] sm:$0xff] %v2253_v6  }
 0x1b8   : > { %2397 = vst [vmem:[%s2876_s29 + $0x1f8] sm:$0xff] %v2333_v7  }
 0x1b9 PF: > { %s12_s13 = sadd.s32 1, %s2756_s13   ;;  %s2986_s9 = smov %s2748_s11 }
 0x1ba   : > { %p9_p7 = scmp.ge.s32.totalorder %s12_s13, 10   ;;  %s2987_s10 = smov %s2752_s12 }
 0x1bb   : > { %s2988_s11 = smov %s2991_s14  ;;  %s2989_s12 = smov %s2995_s15 }
 0x1bc   :  { %11 = sbr.rel (!%p9_p7) target bundleno = 3 (0x3), region = 61 }

</bundles_post_ra>
